<compile_context>
chip_gen: v7x
topology: tpu7x:2x2x1
jax: 0.10.0
libtpu: 0.0.40
codegen_flags: <defaults>
</compile_context>

<pallas_src>
import jax
import jax.numpy as jnp
from jax.experimental import pallas as pl
from jax.experimental.pallas import tpu as pltpu


def residual_block_kernel(x_ref, w1_ref, w2_ref, o_ref):
    # x: (TILE_N, C) f32, w1/w2: (C, C) bf16, o: (TILE_N, C) f32
    x = x_ref[...]

    # Linear(C -> C, bias=False) + ReLU: bf16 MXU inputs, f32 accumulation.
    h = jnp.dot(x.astype(jnp.bfloat16), w1_ref[...],
                preferred_element_type=jnp.float32)
    h = jnp.maximum(h, 0.0)

    # Linear(C -> C, bias=False) + ReLU
    tt = jnp.dot(h.astype(jnp.bfloat16), w2_ref[...],
                 preferred_element_type=jnp.float32)
    tt = jnp.maximum(tt, 0.0)

    # Residual add in f32, lane-dense (TILE_N, C) store.
    o_ref[...] = (x + tt).astype(o_ref.dtype)


def _select_tile_n(n_rows, *, max_tile=1024, align=256):
    """Pick a row-tile: big enough to amortize per-step overhead, but keep
    ~8+ grid steps when possible so v7x's two TensorCores both get work."""
    target = pl.cdiv(n_rows, 8)                       # aim for >= 8 grid steps
    tile = ((target + align - 1) // align) * align    # round up to 256
    return max(align, min(max_tile, tile))


def residual_block_forward(x, w1, w2, *, tile_n=None):
    """x: (N, C) f32; w1, w2: (C, C) (PyTorch weights transposed)."""
    N, C = x.shape
    assert w1.shape == (C, C) and w2.shape == (C, C)
    assert C % 128 == 0, "feature dim should be lane-aligned (multiple of 128)"

    if tile_n is None:
        tile_n = _select_tile_n(N)
    assert tile_n % 128 == 0, "tile_n should be MXU-friendly (multiple of 128)"

    # Weights feed the MXU in bf16 (f32 accumulation happens in-kernel).
    w1 = w1.astype(jnp.bfloat16)
    w2 = w2.astype(jnp.bfloat16)

    # Ragged trailing block handled by Pallas; no wrapper pad / slice copies.
    grid = (pl.cdiv(N, tile_n),)

    out = pl.pallas_call(
        residual_block_kernel,
        out_shape=jax.ShapeDtypeStruct((N, C), jnp.float32),
        grid_spec=pltpu.PrefetchScalarGridSpec(
            num_scalar_prefetch=0,
            grid=grid,
            in_specs=[
                # x: one (tile_n, C) row block per grid step
                pl.BlockSpec((tile_n, C), lambda i: (i, 0)),
                # weights: same (and only) block every step -> stay resident
                pl.BlockSpec((C, C), lambda i: (0, 0)),
                pl.BlockSpec((C, C), lambda i: (0, 0)),
            ],
            out_specs=pl.BlockSpec((tile_n, C), lambda i: (i, 0)),
        ),
        compiler_params=pltpu.CompilerParams(
            # Row blocks are independent: let both TCs split the grid on v7x.
            dimension_semantics=("parallel",),
            # Safe on v7x (64 MiB physical VMEM); with bf16 weights and
            # tile_n <= 1024 the kernel needs well under 16 MiB anyway.
            vmem_limit_bytes=32 * 1024 * 1024,
        ),
    )(x, w1, w2)

    return out


def _reference(x, w1, w2):
    hi = jax.lax.Precision.HIGHEST
    h = jnp.maximum(jnp.dot(x, w1, precision=hi), 0.0)
    tt = jnp.maximum(jnp.dot(h, w2, precision=hi), 0.0)
    return x + tt


if __name__ == "__main__":
    # Small shapes consistent with the module: nChn=512 (module default),
    # N=300 instances (exercises the ragged trailing grid block).
    N, C = 300, 512

    key = jax.random.PRNGKey(0)
    kx, kw1, kw2 = jax.random.split(key, 3)

    x = jax.random.normal(kx, (N, C), dtype=jnp.float32)
    # Deterministic synthetic parameters (already transposed: w = W.T).
    w1 = jax.random.normal(kw1, (C, C), dtype=jnp.float32) * (1.0 / jnp.sqrt(C))
    w2 = jax.random.normal(kw2, (C, C), dtype=jnp.float32) * (1.0 / jnp.sqrt(C))

    out = residual_block_forward(x, w1, w2)
    out = jax.block_until_ready(out)

    ref = _reference(x, w1, w2)
    assert out.shape == (N, C)
    # bf16 MXU inputs with f32 accumulation over K=512: ~1e-2-level agreement.
    assert jnp.allclose(out, ref, atol=2e-2, rtol=2e-2), "mismatch vs reference"

    print("KERNEL_OK")
</pallas_src>

<mosaic_0001>
module attributes {stable_mosaic.version = 11 : i64} {
  func.func @residual_block_kernel(%arg0: i32, %arg1: memref<256x512xf32, #tpu.memory_space<vmem>>, %arg2: memref<512x512xbf16, #tpu.memory_space<vmem>>, %arg3: memref<512x512xbf16, #tpu.memory_space<vmem>>, %arg4: memref<256x512xf32, #tpu.memory_space<vmem>>) attributes {dimension_semantics = [#tpu.dimension_semantics<parallel>], iteration_bounds = array<i64: 2>, scalar_prefetch = 0 : i64, scratch_operands = 0 : i64, tpu.core_type = #tpu.core_type<tc>, window_params = [{transform_indices = @transform_0, window_bounds = array<i64: 256, 512>}, {pipeline_mode = #tpu.pipeline_mode<synchronous>, transform_indices = @transform_1, window_bounds = array<i64: 512, 512>}, {pipeline_mode = #tpu.pipeline_mode<synchronous>, transform_indices = @transform_2, window_bounds = array<i64: 512, 512>}, {transform_indices = @transform_3, window_bounds = array<i64: 256, 512>}]} {
    %c0 = arith.constant 0 : index
    %c0_0 = arith.constant 0 : index
    %0 = vector.load %arg1[%c0, %c0_0] : memref<256x512xf32, #tpu.memory_space<vmem>>, vector<256x512xf32>
    %1 = arith.truncf %0 : vector<256x512xf32> to vector<256x512xbf16>
    %c0_1 = arith.constant 0 : index
    %c0_2 = arith.constant 0 : index
    %2 = vector.load %arg2[%c0_1, %c0_2] : memref<512x512xbf16, #tpu.memory_space<vmem>>, vector<512x512xbf16>
    %cst = arith.constant dense<0.000000e+00> : vector<256x512xf32>
    %3 = tpu.matmul %1, %2, %cst {dimension_numbers = #tpu.dot_dimension_numbers<[1], [0], [0], [1], [0, 0, 1, 1], [], []>} : vector<256x512xbf16>, vector<512x512xbf16>, vector<256x512xf32> -> vector<256x512xf32>
    %cst_3 = arith.constant 0.000000e+00 : f32
    %4 = vector.broadcast %cst_3 : f32 to vector<256x512xf32>
    %5 = arith.maximumf %3, %4 : vector<256x512xf32>
    %6 = arith.truncf %5 : vector<256x512xf32> to vector<256x512xbf16>
    %c0_4 = arith.constant 0 : index
    %c0_5 = arith.constant 0 : index
    %7 = vector.load %arg3[%c0_4, %c0_5] : memref<512x512xbf16, #tpu.memory_space<vmem>>, vector<512x512xbf16>
    %cst_6 = arith.constant dense<0.000000e+00> : vector<256x512xf32>
    %8 = tpu.matmul %6, %7, %cst_6 {dimension_numbers = #tpu.dot_dimension_numbers<[1], [0], [0], [1], [0, 0, 1, 1], [], []>} : vector<256x512xbf16>, vector<512x512xbf16>, vector<256x512xf32> -> vector<256x512xf32>
    %cst_7 = arith.constant 0.000000e+00 : f32
    %9 = vector.broadcast %cst_7 : f32 to vector<256x512xf32>
    %10 = arith.maximumf %8, %9 : vector<256x512xf32>
    %11 = arith.addf %0, %10 : vector<256x512xf32>
    %c0_8 = arith.constant 0 : index
    %c0_9 = arith.constant 0 : index
    %12 = vector.load %arg4[%c0_8, %c0_9] : memref<256x512xf32, #tpu.memory_space<vmem>>, vector<256x512xf32>
    tpu.vector_store %arg4[%c0_8, %c0_9], %11 {strides = array<i32>} : memref<256x512xf32, #tpu.memory_space<vmem>>, vector<256x512xf32>,
    return
  }
  func.func @transform_0(%arg0: i32) -> (i32, i32) {
    %c0_i32 = arith.constant 0 : i32
    %c0_i32_0 = arith.constant 0 : i32
    return %arg0, %c0_i32 : i32, i32
  }
  func.func @transform_1(%arg0: i32) -> (i32, i32) {
    %c0_i32 = arith.constant 0 : i32
    %c0_i32_0 = arith.constant 0 : i32
    %c0_i32_1 = arith.constant 0 : i32
    return %c0_i32, %c0_i32_0 : i32, i32
  }
  func.func @transform_2(%arg0: i32) -> (i32, i32) {
    %c0_i32 = arith.constant 0 : i32
    %c0_i32_0 = arith.constant 0 : i32
    %c0_i32_1 = arith.constant 0 : i32
    return %c0_i32, %c0_i32_0 : i32, i32
  }
  func.func @transform_3(%arg0: i32) -> (i32, i32) {
    %c0_i32 = arith.constant 0 : i32
    %c0_i32_0 = arith.constant 0 : i32
    return %arg0, %c0_i32 : i32, i32
  }
}

</mosaic_0001>

<bundles_post_ra>
// kernel: tpu_custom_call.1
= control target key start
LH: loop header
LB: loop body
LE: loop exit
PB: predicated region body
PF: predicated region fallthrough
CT: control target
= control target key end

     0   :  { %8 = vsyncpa [#allocation3], 0  ;;  %s6278_s0 = inlined_call_operand.hbm [shape: f32[300,512], index: 0, kind: input, shape index: {}]   ;;  %s6279_s1 = inlined_call_operand.hbm [shape: bf16[512,512], index: 1, kind: input, shape index: {}]   ;;  %s6280_s2 = inlined_call_operand.hbm [shape: bf16[512,512], index: 2, kind: input, shape index: {}]   ;;  %s6281_s3 = inlined_call_operand.hbm [shape: f32[300,512], index: 3, kind: output, shape index: {}]  }
   0x1   :  { %10 = vsyncpa [#allocation3 + $0x1], 0 }
   0x2   :  { %11 = vsyncpa [#allocation6], 0 }
   0x3   :  { %12 = vsyncpa [#allocation4], 0 }
   0x4   :  { %14 = vsyncpa [#allocation4 + $0x1], 0  ;;  %s5512_s12 = smov 0   ;;  %s5514_s13 = smov 0  }
   0x5   :  { %s5516_s14 = smov 0   ;;  %s5518_s15 = smov 0  }
   0x6 LB: > { %s5533_s16 = sadd.s32 4294967295, %s5480_s15   ;;  %s4200_s17 = sadd.s32 4294967294, %s5480_s15   ;;  %s5480_s15 = sphi %s5518_s15, %s6301_s15   ;;  %s5476_s14 = sphi %s5516_s14, %s6300_s14   ;;  %s5472_s13 = sphi %s5514_s13, %s6299_s13   ;;  %s5468_s12 = sphi %s5512_s12, %s6298_s12  }
   0x7   : > { %s5537_s18 = sadd.s32 1, %s5480_s15   ;;  %s27_s19 = sadd.s32 1, %s5476_s14 }
   0x8   : > { %s24_s20 = ssub.s32 %s5480_s15, %s5537_s18  ;;  %p34_p0 = scmp.ne.s32.totalorder %s5476_s14, %s5472_s13 }
   0x9   : > { %p25_p1 = scmp.eq.s32.totalorder %s24_s20, 0  ;;  %p35_p2 = scmp.eq.s32.totalorder %s5480_s15, 0 }
   0xa   : > { %p40_p3 = scmp.ne.s32.totalorder %s5472_s13, %s5468_s12  ;;  %p6282_p4 = scmp.eq.s32.totalorder %s5533_s16, 0 }
   0xb   : > { %s5549_s21 = scalar_select %p25_p1, %s5476_s14, %s27_s19  }
   0xc   : > { %p5551_p5 = por %p35_p2, %p34_p0  ;;  %p5557_p6 = por %p6282_p4, %p40_p3 }
   0xd   : > { %p106_p7 = scmp.eq.s32.totalorder %s5533_s16, 1  ;;  %p112_p8 = scmp.eq.s32.totalorder %s4200_s17, 1 }
   0xe   : > { %s6285_s22 = scalar_select %p5551_p5, 1, 0 }
   0xf   : > { %s6286_s23 = scalar_select %p5557_p6, 1, 0 }
  0x10   : > { %p4201_p9 = scmp.ge.s32.totalorder %s5480_s15, 1  ;;  %p119_p10 = scmp.lt.s32.totalorder %s5480_s15, 3 }
  0x11   : > { %p5564_p11 = por %p106_p7, %p34_p0  ;;  %p5568_p12 = por %p112_p8, %p40_p3 }
  0x12   : > { %p5572_p13 = pnand %p4201_p9, %p119_p10  ;;  %s5482_s27 = smov [#allocation5]  }
  0x13   : > { %s6287_s24 = scalar_select %p5564_p11, 1, 0 }
  0x14   : > { %s6288_s25 = scalar_select %p5568_p12, 1, 0 }
  0x15   : > { %s6289_s26 = scalar_select %p5572_p13, 1, 0 }
  0x16   : > { %p4758_p1 = pneg %p5572_p13  ;;  %s131_s28 = sshll.u32 %s5482_s27, 4  ;;  %s132_s28 = int_to_ptr.vmem [resolvable:$true] %s131_s28 }
  0x17   : > { %s5483_s30 = smov [#allocation7]   ;;  %s5326_s7 = scalar_lea.hbm %s6279_s1, 16384 }
  0x18   : > { %p5580_p2 = pnand %p4758_p1, %p6282_p4  ;;  %s144_s4 = sshll.u32 %s5483_s30, 4  ;;  %s5584_s4 = int_to_ptr.vmem [resolvable:$true] %s144_s4 }
  0x19   : > { %p5327_p0 = scmp.ne.s32.totalorder %s6279_s1, %s5326_s7  ;;  %p5333_p9 = scmp.lt.u32.totalorder %s5326_s7, %s6279_s1 }
  0x1a   : > { %p5328_p3 = pneg %p5580_p2 }
  0x1c   : > { %p5329_p7 = pnand %p5328_p3, %p5327_p0 }
  0x1e   : > { %p5330_p8 = pneg %p5329_p7 }
  0x20   : > { %p5335_p10 = pnand %p5333_p9, %p5330_p8 }
  0x22   : > { %5338 = shalt.err (!%p5335_p10)
}
  0x23   : > { %s5339_s17 = scalar_lea.vmem %s132_s28, 16384  ;;  %p5347_p11 = scmp.lt.s32.totalorder %s132_s28, %s132_s28 }
  0x24   : > { %p5340_p1 = scmp.ne.s32.totalorder %s132_s28, %s5339_s17  ;;  %p5348_p6 = scmp.lt.s32.totalorder %s5339_s17, %s5339_s17 }
  0x26   : > { %p5342_p4 = pnand %p5340_p1, %p5328_p3  ;;  %p5349_p13 = por %p5348_p6, %p5347_p11 }
  0x28   : > { %p5343_p12 = pneg %p5342_p4 }
  0x2a   : > { %p5350_p5 = pnand %p5349_p13, %p5343_p12 }
  0x2c   : > { %5353 = shalt.err (!%p5350_p5)
}
  0x2d   : > { %s5484_s19 = smov 256   ;;  %s5485_s20 = smov 16  }
  0x2e   : > { %4761 = dma.hbm_to_vmem [thread:$0]  (!%p5580_p2), %s6279_s1, 16384, %s132_s28, [#allocation6], %s5484_s19, %s5484_s19, %s5485_s20  }
  0x2f   : > { %s5354_s7 = scalar_lea.hbm %s6280_s2, 16384 }
  0x30   : > { %p5355_p4 = scmp.ne.s32.totalorder %s6280_s2, %s5354_s7  ;;  %p5361_p11 = scmp.lt.u32.totalorder %s5354_s7, %s6280_s2 }
  0x32   : > { %p5357_p5 = pnand %p5355_p4, %p5328_p3 }
  0x34   : > { %p5358_p6 = pneg %p5357_p5 }
  0x36   : > { %p5363_p12 = pnand %p5361_p11, %p5358_p6 }
  0x38   : > { %5366 = shalt.err (!%p5363_p12)
}
  0x39   : > { %s5367_s28 = scalar_lea.vmem %s5584_s4, 16384  ;;  %p5375_p8 = scmp.lt.s32.totalorder %s5584_s4, %s5584_s4 }
  0x3a   : > { %p5368_p13 = scmp.ne.s32.totalorder %s5584_s4, %s5367_s28  ;;  %p5376_p9 = scmp.lt.s32.totalorder %s5367_s28, %s5367_s28 }
  0x3c   : > { %p5370_p0 = pnand %p5368_p13, %p5328_p3  ;;  %p5377_p10 = por %p5376_p9, %p5375_p8 }
  0x3e   : > { %p5371_p7 = pneg %p5370_p0 }
  0x40   : > { %p5378_p1 = pnand %p5377_p10, %p5371_p7 }
  0x42   : > { %5381 = shalt.err (!%p5378_p1)
}
  0x43   : > { %4764 = dma.hbm_to_vmem [thread:$0]  (!%p5580_p2), %s6280_s2, 16384, %s5584_s4, [#allocation6], %s5484_s19, %s5484_s19, %s5485_s20  }
  0x44   : > { %p4204_p4 = scmp.ge.s32.totalorder %s5480_s15, 2 }
  0x45   : > { %p6291_p3 = scmp.ne.s32.totalorder (!%p4204_p4), %s6285_s22, 0 }
  0x46   : > { %154 = sbr.rel (%p4204_p4) target bundleno = 112 (0x70), region = 24 }
  0x4d   : > { %157 = sbr.rel (!%p6291_p3) target bundleno = 112 (0x70), region = 28  ;;  %s158_s30 = sand.u32 (%p6291_p3), 1, %s5476_s14  }
  0x4e   : > { %s4206_s5 = sshll.u32 (%p6291_p3), %s5480_s15, 5  ;;  %s4205_s6 = sshll.u32 (%p6291_p3), %s158_s30, 10 }
  0x4f   : > { %s164_s7 = ssub.s32 (%p6291_p3), 38, %s4206_s5  ;;  %s5643_s19 = scalar_lea.sflag (%p6291_p3), [#allocation3], %s158_s30 }
  0x50   : > { %p165_p5 = scmp.lt.s32.totalorder (%p6291_p3), %s164_s7, 32  ;;  %s162_s20 = scalar_lea.vmem (%p6291_p3), [#allocation2], %s4205_s6 }
  0x54   : > { %s6303_s7 = smov (!%p165_p5, %s164_s7), 32 }
  0x55   : > { %s5640_s29 = sshll.u32 %s6303_s7, 9 }
  0x56   : > { %s170_s4 = ssub.s32 16384, %s5640_s29 }
  0x57   : > { %171 = vsyncadd %s5643_s19, %s170_s4  ;;  %p4209_p2 = scmp.ne.s32.totalorder %s5640_s29, 0  ;;  %s4488_s22 = sshll.u32 %s5480_s15, 14 }
  0x58   : > { %s5651_s10 = scalar_lea.hbm %s6278_s0, %s4488_s22  ;;  %s177_s11 = sshll.u32 %s162_s20, 4  ;;  %s5653_s11 = int_to_ptr.vmem [resolvable:$true] %s177_s11 }
  0x59   : > { %s5382_s28 = scalar_lea.hbm %s5651_s10, %s5640_s29  ;;  %s5386_s30 = scalar_lea.hbm %s6278_s0, 19456 }
  0x5a   : > { %p5383_p6 = scmp.ne.s32.totalorder %s5651_s10, %s5382_s28  ;;  %p5387_p13 = scmp.lt.u32.totalorder %s5651_s10, %s6278_s0 }
  0x5b   : > { %p5388_p0 = scmp.lt.u32.totalorder %s5386_s30, %s5382_s28  ;;  %p5390_p8 = scmp.lt.u32.totalorder %s5382_s28, %s5651_s10 }
  0x5c   : > { %p5384_p11 = pnand %p5383_p6, %p4209_p2 }
  0x5d   : > { %p5389_p7 = por %p5388_p0, %p5387_p13 }
  0x5e   : > { %p5385_p12 = pneg %p5384_p11 }
  0x5f   : > { %p5391_p9 = por %p5390_p8, %p5389_p7 }
  0x61   : > { %p5392_p10 = pnand %p5391_p9, %p5385_p12 }
  0x63   : > { %5395 = shalt.err (!%p5392_p10)
}
  0x64   : > { %s5396_s7 = scalar_lea.vmem %s5653_s11, %s5640_s29  ;;  %s5486_s4 = smov [#allocation2]  }
  0x65   : > { %p5397_p1 = scmp.ne.s32.totalorder %s5653_s11, %s5396_s7  ;;  %s5400_s20 = sshll.u32 %s5486_s4, 4  ;;  %s5401_s20 = int_to_ptr.vmem [resolvable:$false] %s5400_s20 }
  0x66   : > { %s5402_s22 = scalar_lea.vmem %s5401_s20, 32768  ;;  %p5403_p6 = scmp.lt.s32.totalorder %s5653_s11, %s5401_s20 }
  0x67   : > { %p5398_p3 = pnand %p5397_p1, %p4209_p2  ;;  %p5404_p11 = scmp.lt.s32.totalorder %s5402_s22, %s5396_s7 }
  0x69   : > { %p5399_p5 = pneg %p5398_p3  ;;  %p5405_p13 = por %p5404_p11, %p5403_p6 }
  0x6b   : > { %p5406_p0 = pnand %p5405_p13, %p5399_p5 }
  0x6d   : > { %5409 = shalt.err (!%p5406_p0)
}
  0x6e   : > { %s5487_s8 = smov 512   ;;  %s5488_s9 = smov 32  }
  0x6f   : > { %183 = dma.hbm_to_vmem [thread:$0]  (%p4209_p2), %s5651_s10, %s5640_s29, %s5653_s11, %s5643_s19, %s5487_s8, %s5487_s8, %s5488_s9  }
  0x70 PF: > { %p6292_p12 = scmp.ne.s32.totalorder %s6289_s26, 0 }
  0x71   : > { %s5683_s28 = sand.u32 (!%p6292_p12), 1, %s5472_s13   ;;  %p6293_p7 = scmp.ne.s32.totalorder (!%p6292_p12), %s6286_s23, 0 }
  0x72   : > { %189 = sbr.rel (%p6292_p12) target bundleno = 1034 (0x40a), region = 32  ;;  %s4215_s17 = sshll.u32 (!%p6292_p12), %s5683_s28, 10 }
  0x73   : > { %s192_s27 = scalar_lea.sflag (!%p6292_p12), [#allocation3], %s5683_s28  ;;  %s5689_s30 = scalar_lea.vmem (!%p6292_p12), [#allocation2], %s4215_s17 }
  0x79   : > { %5455 = dma.done.wait (%p6293_p7), %s192_s27, 16384  }
  0x7a   : > { %5457 = vsyncadd (%p6293_p7), %s192_s27, 4294950912  ;;  %p6294_p2 = scmp.eq.s32.totalorder %s5533_s16, 0 }
  0x7c   : > { %5459 = dma.done.wait (%p6294_p2), [#allocation6], 32768   ;;  %p6295_p8 = pmov %p6294_p2 }
  0x7d   : > { %v4814_v0 = vld [vmem:[#allocation5 + $0x4] ss:$16 sps:$4 sm:$0xff]   ;;  %v4816_v1 = vld [vmem:[#allocation5 + $0xc] ss:$16 sps:$4 sm:$0xff]   ;;  %v4818_v2 = vld [vmem:[#allocation5] ss:$16 sps:$4 sm:$0xff]  }
  0x7e   : > { %5461 = vsyncadd (%p6295_p8), [#allocation6], 4294934528  ;;  %1198 = vmatprep.subr.bf16.mxu0 %v4814_v0  ;;  %v4819_v3 = vld [vmem:[#allocation5 + $0x8] ss:$16 sps:$4 sm:$0xff]   ;;  %1584 = vmatprep.subr.bf16.mxu1 %v4816_v1  ;;  %v4820_v4 = vld [vmem:[#allocation5 + $0x24] ss:$16 sps:$4 sm:$0xff]  }
  0x7f   : > { %1199 = vmatpush1.bf16.msra.mxu0 %v4818_v2  ;;  %1585 = vmatpush1.bf16.msra.mxu1 %v4819_v3  ;;  %v4822_v5 = vld [vmem:[#allocation5 + $0x2c] ss:$16 sps:$4 sm:$0xff]   ;;  %v4824_v6 = vld [vmem:[#allocation5 + $0x20] ss:$16 sps:$4 sm:$0xff]   ;;  %v4825_v7 = vld [vmem:[#allocation5 + $0x28] ss:$16 sps:$4 sm:$0xff]  }
  0x80   : > { %1200 = vmatprep.subr.bf16.mxu0 %v4820_v4  ;;  %1586 = vmatprep.subr.bf16.mxu1 %v4822_v5  ;;  %v4826_v8 = vld [vmem:[#allocation5 + $0x44] ss:$16 sps:$4 sm:$0xff]   ;;  %v4828_v9 = vld [vmem:[#allocation5 + $0x4c] ss:$16 sps:$4 sm:$0xff]   ;;  %v4830_v10 = vld [vmem:[#allocation5 + $0x40] ss:$16 sps:$4 sm:$0xff]  }
  0x81   : > { %v4831_v11 = vld [vmem:[#allocation5 + $0x48] ss:$16 sps:$4 sm:$0xff]   ;;  %v4832_v12 = vld [vmem:[#allocation5 + $0x64] ss:$16 sps:$4 sm:$0xff]   ;;  %v4834_v13 = vld [vmem:[#allocation5 + $0x6c] ss:$16 sps:$4 sm:$0xff]  }
  0x82   : > { %v4836_v14 = vld [vmem:[#allocation5 + $0x60] ss:$16 sps:$4 sm:$0xff]   ;;  %v4837_v15 = vld [vmem:[#allocation5 + $0x68] ss:$16 sps:$4 sm:$0xff]   ;;  %v4838_v16 = vld [vmem:[#allocation5 + $0x84] ss:$16 sps:$4 sm:$0xff]  }
  0x83   : > { %1201 = vmatpush1.bf16.msra.mxu0 %v4824_v6  ;;  %1587 = vmatpush1.bf16.msra.mxu1 %v4825_v7  ;;  %v4840_v17 = vld [vmem:[#allocation5 + $0x8c] ss:$16 sps:$4 sm:$0xff]   ;;  %v4842_v18 = vld [vmem:[#allocation5 + $0x80] ss:$16 sps:$4 sm:$0xff]   ;;  %v4843_v19 = vld [vmem:[#allocation5 + $0x88] ss:$16 sps:$4 sm:$0xff]  }
  0x84   : > { %1202 = vmatprep.subr.bf16.mxu0 %v4826_v8  ;;  %1588 = vmatprep.subr.bf16.mxu1 %v4828_v9  ;;  %v4844_v20 = vld [vmem:[#allocation5 + $0xa4] ss:$16 sps:$4 sm:$0xff]   ;;  %v4846_v21 = vld [vmem:[#allocation5 + $0xac] ss:$16 sps:$4 sm:$0xff]   ;;  %v4848_v22 = vld [vmem:[#allocation5 + $0xa0] ss:$16 sps:$4 sm:$0xff]  }
  0x85   : > { %v4849_v23 = vld [vmem:[#allocation5 + $0xa8] ss:$16 sps:$4 sm:$0xff]   ;;  %v4850_v24 = vld [vmem:[#allocation5 + $0xc4] ss:$16 sps:$4 sm:$0xff]   ;;  %v4852_v25 = vld [vmem:[#allocation5 + $0xcc] ss:$16 sps:$4 sm:$0xff]  }
  0x86   : > { %v4854_v26 = vld [vmem:[#allocation5 + $0xc0] ss:$16 sps:$4 sm:$0xff]   ;;  %v4855_v27 = vld [vmem:[#allocation5 + $0xc8] ss:$16 sps:$4 sm:$0xff]   ;;  %v4856_v28 = vld [vmem:[#allocation5 + $0xe4] ss:$16 sps:$4 sm:$0xff]  }
  0x87   : > { %1203 = vmatpush1.bf16.msra.mxu0 %v4830_v10  ;;  %1589 = vmatpush1.bf16.msra.mxu1 %v4831_v11  ;;  %v4858_v29 = vld [vmem:[#allocation5 + $0xec] ss:$16 sps:$4 sm:$0xff]   ;;  %v4860_v30 = vld [vmem:[#allocation5 + $0xe0] ss:$16 sps:$4 sm:$0xff]   ;;  %v4861_v31 = vld [vmem:[#allocation5 + $0xe8] ss:$16 sps:$4 sm:$0xff]  }
  0x88   : > { %1204 = vmatprep.subr.bf16.mxu0 %v4832_v12  ;;  %1590 = vmatprep.subr.bf16.mxu1 %v4834_v13  ;;  %v4862_v32 = vld [vmem:[#allocation5 + $0x104] ss:$16 sps:$4 sm:$0xff]   ;;  %v4864_v33 = vld [vmem:[#allocation5 + $0x10c] ss:$16 sps:$4 sm:$0xff]   ;;  %v4866_v34 = vld [vmem:[#allocation5 + $0x100] ss:$16 sps:$4 sm:$0xff]  }
  0x89   : > { %v4867_v35 = vld [vmem:[#allocation5 + $0x108] ss:$16 sps:$4 sm:$0xff]   ;;  %v4868_v36 = vld [vmem:[#allocation5 + $0x124] ss:$16 sps:$4 sm:$0xff]   ;;  %v4870_v37 = vld [vmem:[#allocation5 + $0x12c] ss:$16 sps:$4 sm:$0xff]  }
  0x8a   : > { %v4872_v38 = vld [vmem:[#allocation5 + $0x120] ss:$16 sps:$4 sm:$0xff]   ;;  %v4873_v39 = vld [vmem:[#allocation5 + $0x128] ss:$16 sps:$4 sm:$0xff]   ;;  %v4874_v40 = vld [vmem:[#allocation5 + $0x144] ss:$16 sps:$4 sm:$0xff]  }
  0x8b   : > { %1205 = vmatpush1.bf16.msra.mxu0 %v4836_v14  ;;  %1591 = vmatpush1.bf16.msra.mxu1 %v4837_v15  ;;  %v4876_v41 = vld [vmem:[#allocation5 + $0x14c] ss:$16 sps:$4 sm:$0xff]   ;;  %v4878_v42 = vld [vmem:[#allocation5 + $0x140] ss:$16 sps:$4 sm:$0xff]   ;;  %v4879_v43 = vld [vmem:[#allocation5 + $0x148] ss:$16 sps:$4 sm:$0xff]  }
  0x8c   : > { %1206 = vmatprep.subr.bf16.mxu0 %v4838_v16  ;;  %1592 = vmatprep.subr.bf16.mxu1 %v4840_v17  ;;  %v4880_v44 = vld [vmem:[#allocation5 + $0x164] ss:$16 sps:$4 sm:$0xff]   ;;  %v4882_v45 = vld [vmem:[#allocation5 + $0x16c] ss:$16 sps:$4 sm:$0xff]   ;;  %v4884_v47 = vld [vmem:[#allocation5 + $0x160] ss:$16 sps:$4 sm:$0xff]  }
  0x8d   : > { %v239_v46 = vld [vmem:[%s5689_s30 + $0x8] sm:$0xff]  ;;  %v4886_v51 = vld [vmem:[#allocation5 + $0x184] ss:$16 sps:$4 sm:$0xff]   ;;  %v4890_v53 = vld [vmem:[#allocation5 + $0x180] ss:$16 sps:$4 sm:$0xff]   ;;  %s5961_s23 = scalar_lea.vmem [#allocation8], %s4215_s17 }
  0x8e   : > { %v243_v48 = vld [vmem:[%s5689_s30 + $0x28] sm:$0xff]  ;;  %v4892_v55 = vld [vmem:[#allocation5 + $0x1a4] ss:$16 sps:$4 sm:$0xff]   ;;  %v4896_v57 = vld [vmem:[#allocation5 + $0x1a0] ss:$16 sps:$4 sm:$0xff]   ;;  %s4087_s26 = scalar_lea.sflag [#allocation4], %s5683_s28 }
  0x8f   : > { %1207 = vmatpush1.bf16.msra.mxu0 %v4842_v18  ;;  %1593 = vmatpush1.bf16.msra.mxu1 %v4843_v19  ;;  %v4885_v49 = vld [vmem:[#allocation5 + $0x168] ss:$16 sps:$4 sm:$0xff]   ;;  %v367_v50 = vpack.c.bf16 %v243_v48, %v239_v46  ;;  %v4888_v52 = vld [vmem:[#allocation5 + $0x18c] ss:$16 sps:$4 sm:$0xff]   ;;  %v4898_v59 = vld [vmem:[#allocation5 + $0x1c4] ss:$16 sps:$4 sm:$0xff]  }
  0x90   : > { %1208 = vmatprep.subr.bf16.mxu0 %v4844_v20  ;;  %1594 = vmatprep.subr.bf16.mxu1 %v4846_v21  ;;  %v4891_v54 = vld [vmem:[#allocation5 + $0x188] ss:$16 sps:$4 sm:$0xff]   ;;  %v4894_v56 = vld [vmem:[#allocation5 + $0x1ac] ss:$16 sps:$4 sm:$0xff]   ;;  %v4902_v61 = vld [vmem:[#allocation5 + $0x1c0] ss:$16 sps:$4 sm:$0xff]  }
  0x91   : > { %1230 = vmatprep.mubr.bf16.mxu0 %v367_v50  ;;  %1616 = vmatprep.mubr.bf16.mxu1 %v367_v50  ;;  %v4897_v58 = vld [vmem:[#allocation5 + $0x1a8] ss:$16 sps:$4 sm:$0xff]   ;;  %v4900_v60 = vld [vmem:[#allocation5 + $0x1cc] ss:$16 sps:$4 sm:$0xff]   ;;  %v4904_v63 = vld [vmem:[#allocation5 + $0x1e4] ss:$16 sps:$4 sm:$0xff]  }
  0x92   : > { %v4903_v62 = vld [vmem:[#allocation5 + $0x1c8] ss:$16 sps:$4 sm:$0xff]   ;;  %v4906_v0 = vld [vmem:[#allocation5 + $0x1ec] ss:$16 sps:$4 sm:$0xff]   ;;  %v4908_v1 = vld [vmem:[#allocation5 + $0x1e0] ss:$16 sps:$4 sm:$0xff]  }
  0x93   : > { %1209 = vmatpush1.bf16.msra.mxu0 %v4848_v22  ;;  %1595 = vmatpush1.bf16.msra.mxu1 %v4849_v23  ;;  %v4909_v2 = vld [vmem:[#allocation5 + $0x1e8] ss:$16 sps:$4 sm:$0xff]   ;;  %v238_v3 = vld [vmem:[%s5689_s30] sm:$0xff]  ;;  %v4939_v16 = vld [vmem:[#allocation5 + $0x20c] ss:$16 sps:$4 sm:$0xff]   ;;  %p6296_p9 = scmp.ne.s32.totalorder %s6287_s24, 0 }
  0x94   : > { %1210 = vmatprep.subr.bf16.mxu0 %v4850_v24  ;;  %1596 = vmatprep.subr.bf16.mxu1 %v4852_v25  ;;  %v242_v4 = vld [vmem:[%s5689_s30 + $0x20] sm:$0xff]  ;;  %v247_v6 = vld [vmem:[%s5689_s30 + $0x48] sm:$0xff]  ;;  %s4476_s29 = sshll.u32 (%p6296_p9), %s5533_s16, 5 }
  0x95   : > { %v4912_v5 = vld [vmem:[#allocation5 + $0x204] ss:$16 sps:$4 sm:$0xff]   ;;  %v251_v7 = vld [vmem:[%s5689_s30 + $0x68] sm:$0xff]  ;;  %v366_v8 = vpack.c.bf16 %v242_v4, %v238_v3  ;;  %v4910_v9 = vld [vmem:[#allocation5 + $0x200] ss:$16 sps:$4 sm:$0xff]   ;;  %s4095_s19 = ssub.s32 (%p6296_p9), 38, %s4476_s29 }
  0x96   : > { %v371_v10 = vpack.c.bf16 %v251_v7, %v247_v6  ;;  %v4915_v11 = vld [vmem:[#allocation5 + $0x224] ss:$16 sps:$4 sm:$0xff]   ;;  %v4913_v14 = vld [vmem:[#allocation5 + $0x220] ss:$16 sps:$4 sm:$0xff]   ;;  %v4937_v15 = vld [vmem:[#allocation5 + $0x208] ss:$16 sps:$4 sm:$0xff]  }
  0x97   : > { %1211 = vmatpush1.bf16.msra.mxu0 %v4854_v26  ;;  %1597 = vmatpush1.bf16.msra.mxu1 %v4855_v27  ;;  %v246_v12 = vld [vmem:[%s5689_s30 + $0x40] sm:$0xff]  ;;  %v255_v17 = vld [vmem:[%s5689_s30 + $0x88] sm:$0xff]  ;;  %p4096_p10 = scmp.lt.s32.totalorder (%p6296_p9), %s4095_s19, 32 }
  0x98   : > { %1212 = vmatprep.subr.bf16.mxu0 %v4856_v28  ;;  %1598 = vmatprep.subr.bf16.mxu1 %v4858_v29  ;;  %v250_v13 = vld [vmem:[%s5689_s30 + $0x60] sm:$0xff]  ;;  %v259_v18 = vld [vmem:[%s5689_s30 + $0xa8] sm:$0xff] }
  0x99   : > { %v4918_v19 = vld [vmem:[#allocation5 + $0x244] ss:$16 sps:$4 sm:$0xff]   ;;  %v4942_v20 = vld [vmem:[#allocation5 + $0x22c] ss:$16 sps:$4 sm:$0xff]   ;;  %v370_v21 = vpack.c.bf16 %v250_v13, %v246_v12  ;;  %v375_v22 = vpack.c.bf16 %v259_v18, %v255_v17  ;;  %v4916_v23 = vld [vmem:[#allocation5 + $0x240] ss:$16 sps:$4 sm:$0xff]  }
  0x9a   : > { %v4940_v24 = vld [vmem:[#allocation5 + $0x228] ss:$16 sps:$4 sm:$0xff]   ;;  %v254_v25 = vld [vmem:[%s5689_s30 + $0x80] sm:$0xff]  ;;  %v4948_v27 = vld [vmem:[#allocation5 + $0x24c] ss:$16 sps:$4 sm:$0xff]  }
  0x9b   : > { %1213 = vmatpush1.bf16.msra.mxu0 %v4860_v30  ;;  %1599 = vmatpush1.bf16.msra.mxu1 %v4861_v31  ;;  %v4921_v26 = vld [vmem:[#allocation5 + $0x264] ss:$16 sps:$4 sm:$0xff]   ;;  %v263_v29 = vld [vmem:[%s5689_s30 + $0xc8] sm:$0xff]  ;;  %v4919_v31 = vld [vmem:[#allocation5 + $0x260] ss:$16 sps:$4 sm:$0xff]  }
  0x9c   : > { %1214 = vmatprep.subr.bf16.mxu0 %v4862_v32  ;;  %1600 = vmatprep.subr.bf16.mxu1 %v4864_v33  ;;  %v258_v28 = vld [vmem:[%s5689_s30 + $0xa0] sm:$0xff]  ;;  %v267_v30 = vld [vmem:[%s5689_s30 + $0xe8] sm:$0xff] }
  0x9d   : > { %v4946_v32 = vld [vmem:[#allocation5 + $0x248] ss:$16 sps:$4 sm:$0xff]   ;;  %v4924_v33 = vld [vmem:[#allocation5 + $0x284] ss:$16 sps:$4 sm:$0xff]   ;;  %v4960_v48 = vld [vmem:[#allocation5 + $0x2ac] ss:$16 sps:$4 sm:$0xff]  }
  0x9e   : > { %v4955_v46 = vld [vmem:[#allocation5 + $0x288] ss:$16 sps:$4 sm:$0xff]   ;;  %v4945_v3 = vld [vmem:[#allocation5 + $0x324] ss:$16 sps:$4 sm:$0xff]   ;;  %v4975_v4 = vld [vmem:[#allocation5 + $0x30c] ss:$16 sps:$4 sm:$0xff]  }
  0x9f   : > { %1215 = vmatpush1.bf16.msra.mxu0 %v4866_v34  ;;  %1601 = vmatpush1.bf16.msra.mxu1 %v4867_v35  ;;  %v4951_v34 = vld [vmem:[#allocation5 + $0x26c] ss:$16 sps:$4 sm:$0xff]   ;;  %v374_v35 = vpack.c.bf16 %v258_v28, %v254_v25  ;;  %v282_v6 = vld [vmem:[%s5689_s30 + $0x160] sm:$0xff] }
  0xa0   : > { %1216 = vmatprep.subr.bf16.mxu0 %v4868_v36  ;;  %1602 = vmatprep.subr.bf16.mxu1 %v4870_v37  ;;  %v379_v36 = vpack.c.bf16 %v267_v30, %v263_v29  ;;  %v4922_v37 = vld [vmem:[#allocation5 + $0x280] ss:$16 sps:$4 sm:$0xff]   ;;  %v287_v7 = vld [vmem:[%s5689_s30 + $0x188] sm:$0xff]  ;;  %v4963_v17 = vld [vmem:[#allocation5 + $0x364] ss:$16 sps:$4 sm:$0xff]  }
  0xa1   : > { %v4978_v12 = vld [vmem:[#allocation5 + $0x32c] ss:$16 sps:$4 sm:$0xff]   ;;  %v4972_v25 = vld [vmem:[#allocation5 + $0x384] ss:$16 sps:$4 sm:$0xff]   ;;  %v4970_v29 = vld [vmem:[#allocation5 + $0x380] ss:$16 sps:$4 sm:$0xff]  }
  0xa2   : > { %v4984_v18 = vld [vmem:[#allocation5 + $0x34c] ss:$16 sps:$4 sm:$0xff]   ;;  %v4985_v30 = vld [vmem:[#allocation5 + $0x368] ss:$16 sps:$4 sm:$0xff]  }
  0xa3   : > { %1217 = vmatpush1.bf16.msra.mxu0 %v4872_v38  ;;  %1603 = vmatpush1.bf16.msra.mxu1 %v4873_v39  ;;  %v4949_v38 = vld [vmem:[#allocation5 + $0x268] ss:$16 sps:$4 sm:$0xff]   ;;  %v4927_v39 = vld [vmem:[#allocation5 + $0x2a4] ss:$16 sps:$4 sm:$0xff]  }
  0xa4   : > { %1218 = vmatprep.subr.bf16.mxu0 %v4874_v40  ;;  %1604 = vmatprep.subr.bf16.mxu1 %v4876_v41  ;;  %v4957_v40 = vld [vmem:[#allocation5 + $0x28c] ss:$16 sps:$4 sm:$0xff]   ;;  %v262_v41 = vld [vmem:[%s5689_s30 + $0xc0] sm:$0xff] }
  0xa7   : > { %1219 = vmatpush1.bf16.msra.mxu0 %v4878_v42  ;;  %1605 = vmatpush1.bf16.msra.mxu1 %v4879_v43  ;;  %v266_v42 = vld [vmem:[%s5689_s30 + $0xe0] sm:$0xff]  ;;  %v271_v43 = vld [vmem:[%s5689_s30 + $0x108] sm:$0xff] }
  0xa8   : > { %1220 = vmatprep.subr.bf16.mxu0 %v4880_v44  ;;  %1606 = vmatprep.subr.bf16.mxu1 %v4882_v45  ;;  %v275_v44 = vld [vmem:[%s5689_s30 + $0x128] sm:$0xff]  ;;  %v4925_v45 = vld [vmem:[#allocation5 + $0x2a0] ss:$16 sps:$4 sm:$0xff]  }
  0xa9   : > { %v383_v50 = vpack.c.bf16 %v275_v44, %v271_v43  ;;  %v4994_v43 = vld [vmem:[#allocation5 + $0x3a8] ss:$16 sps:$4 sm:$0xff]  }
  0xab   : > { %1221 = vmatpush1.bf16.msra.mxu0 %v4884_v47  ;;  %1607 = vmatpush1.bf16.msra.mxu1 %v4885_v49  ;;  %v4930_v47 = vld [vmem:[#allocation5 + $0x2c4] ss:$16 sps:$4 sm:$0xff]   ;;  %v378_v49 = vpack.c.bf16 %v266_v42, %v262_v41  ;;  %v4988_v42 = vld [vmem:[#allocation5 + $0x3c0] ss:$16 sps:$4 sm:$0xff]  }
  0xac   : > { %1222 = vmatprep.subr.bf16.mxu0 %v4886_v51  ;;  %1608 = vmatprep.subr.bf16.mxu1 %v4888_v52  ;;  %v4928_v51 = vld [vmem:[#allocation5 + $0x2c0] ss:$16 sps:$4 sm:$0xff]   ;;  %v4958_v52 = vld [vmem:[#allocation5 + $0x2a8] ss:$16 sps:$4 sm:$0xff]  }
  0xaf   : > { %1223 = vmatpush1.bf16.msra.mxu0 %v4890_v53  ;;  %1609 = vmatpush1.bf16.msra.mxu1 %v4891_v54  ;;  %v270_v53 = vld [vmem:[%s5689_s30 + $0x100] sm:$0xff] }
  0xb0   : > { %1224 = vmatprep.subr.bf16.mxu0 %v4892_v55  ;;  %1610 = vmatprep.subr.bf16.mxu1 %v4894_v56  ;;  %v4933_v54 = vld [vmem:[#allocation5 + $0x2e4] ss:$16 sps:$4 sm:$0xff]   ;;  %v4966_v55 = vld [vmem:[#allocation5 + $0x2cc] ss:$16 sps:$4 sm:$0xff]  }
  0xb1   : > { %v274_v56 = vld [vmem:[%s5689_s30 + $0x120] sm:$0xff] }
  0xb3   : > { %1225 = vmatpush1.bf16.msra.mxu0 %v4896_v57  ;;  %1611 = vmatpush1.bf16.msra.mxu1 %v4897_v58  ;;  %v279_v57 = vld [vmem:[%s5689_s30 + $0x148] sm:$0xff] }
  0xb4   : > { %1226 = vmatprep.subr.bf16.mxu0 %v4898_v59  ;;  %1612 = vmatprep.subr.bf16.mxu1 %v4900_v60  ;;  %v283_v58 = vld [vmem:[%s5689_s30 + $0x168] sm:$0xff]  ;;  %v4931_v59 = vld [vmem:[#allocation5 + $0x2e0] ss:$16 sps:$4 sm:$0xff]  }
  0xb5   : > { %v4964_v60 = vld [vmem:[#allocation5 + $0x2c8] ss:$16 sps:$4 sm:$0xff]  }
  0xb7   : > { %1227 = vmatpush1.bf16.msra.mxu0 %v4902_v61  ;;  %1613 = vmatpush1.bf16.msra.mxu1 %v4903_v62  ;;  %v4936_v61 = vld [vmem:[#allocation5 + $0x304] ss:$16 sps:$4 sm:$0xff]   ;;  %v4969_v62 = vld [vmem:[#allocation5 + $0x2ec] ss:$16 sps:$4 sm:$0xff]  }
  0xb8   : > { %1228 = vmatprep.subr.bf16.mxu0 %v4904_v63  ;;  %1614 = vmatprep.subr.bf16.mxu1 %v4906_v0  ;;  %v382_v63 = vpack.c.bf16 %v274_v56, %v270_v53  ;;  %v387_v0 = vpack.c.bf16 %v283_v58, %v279_v57  ;;  %v5005_v53 = vld [vmem:[#allocation5 + $0x3ec] ss:$16 sps:$4 sm:$0xff]   ;;  %v310_v57 = vld [vmem:[%s5689_s30 + $0x240] sm:$0xff] }
  0xb9   : > { %v314_v58 = vld [vmem:[%s5689_s30 + $0x260] sm:$0xff] }
  0xbb   : > { %1229 = vmatpush1.bf16.msra.mxu0 %v4908_v1  ;;  %1615 = vmatpush1.bf16.msra.mxu1 %v4909_v2  ;;  %v4934_v1 = vld [vmem:[#allocation5 + $0x300] ss:$16 sps:$4 sm:$0xff]   ;;  %v4967_v2 = vld [vmem:[#allocation5 + $0x2e8] ss:$16 sps:$4 sm:$0xff]  }
  0xbc   : > { %1391 = vmatprep.subr.bf16.mxu0 %v4912_v5  ;;  %1777 = vmatprep.subr.bf16.mxu1 %v4939_v16  ;;  %v278_v5 = vld [vmem:[%s5689_s30 + $0x140] sm:$0xff]  ;;  %v4976_v16 = vld [vmem:[#allocation5 + $0x328] ss:$16 sps:$4 sm:$0xff]  }
  0xbd   : > { %v386_v13 = vpack.c.bf16 %v282_v6, %v278_v5  ;;  %v326_v5 = vld [vmem:[%s5689_s30 + $0x2c0] sm:$0xff] }
  0xbe   : > { %1231 = vmatmul.mubr.bf16.vlgmr.msra.gmra.mrb[0].mxu0 %v366_v8  ;;  %1617 = vmatmul.mubr.bf16.vlgmr.msra.gmra.mrb[0].mxu1 %v366_v8  ;;  %v291_v8 = vld [vmem:[%s5689_s30 + $0x1a8] sm:$0xff]  ;;  %v330_v6 = vld [vmem:[%s5689_s30 + $0x2e0] sm:$0xff] }
  0xbf   : > { %1392 = vmatpush1.bf16.msra.mxu0 %v4910_v9  ;;  %1240 = vmatprep.mubr.bf16.mxu0 %v371_v10  ;;  %v4943_v9 = vld [vmem:[#allocation5 + $0x320] ss:$16 sps:$4 sm:$0xff]  }
  0xc0   : > { %1626 = vmatprep.mubr.bf16.mxu1 %v371_v10  ;;  %1393 = vmatprep.subr.bf16.mxu0 %v4915_v11  ;;  %v4973_v10 = vld [vmem:[#allocation5 + $0x308] ss:$16 sps:$4 sm:$0xff]   ;;  %v4954_v11 = vld [vmem:[#allocation5 + $0x344] ss:$16 sps:$4 sm:$0xff]  }
  0xc1   : > { %1778 = vmatpush1.bf16.msra.mxu1 %v4937_v15  ;;  %v4952_v15 = vld [vmem:[#allocation5 + $0x340] ss:$16 sps:$4 sm:$0xff]  }
  0xc2   : > { %1779 = vmatprep.subr.bf16.mxu1 %v4942_v20  ;;  %v290_v20 = vld [vmem:[%s5689_s30 + $0x1a0] sm:$0xff] }
  0xc3   : > { %1394 = vmatpush1.bf16.msra.mxu0 %v4913_v14  ;;  %v391_v14 = vpack.c.bf16 %v291_v8, %v287_v7  ;;  %v335_v7 = vld [vmem:[%s5689_s30 + $0x308] sm:$0xff] }
  0xc4   : > { %1395 = vmatprep.subr.bf16.mxu0 %v4918_v19  ;;  %v286_v19 = vld [vmem:[%s5689_s30 + $0x180] sm:$0xff]  ;;  %v339_v8 = vld [vmem:[%s5689_s30 + $0x328] sm:$0xff] }
  0xc5   : > { %1780 = vmatpush1.bf16.msra.mxu1 %v4940_v24  ;;  %v4982_v24 = vld [vmem:[#allocation5 + $0x348] ss:$16 sps:$4 sm:$0xff]  }
  0xc6   : > { %1241 = vmatmul.mubr.bf16.gmra.mrb[4].mxu0 %v370_v21  ;;  %1627 = vmatmul.mubr.bf16.gmra.mrb[4].mxu1 %v370_v21  ;;  %v295_v21 = vld [vmem:[%s5689_s30 + $0x1c8] sm:$0xff] }
  0xc7   : > { %1250 = vmatprep.mubr.bf16.mxu0 %v375_v22  ;;  %1636 = vmatprep.mubr.bf16.mxu1 %v375_v22  ;;  %v299_v22 = vld [vmem:[%s5689_s30 + $0x1e8] sm:$0xff] }
  0xc8   : > { %1396 = vmatpush1.bf16.msra.mxu0 %v4916_v23  ;;  %1781 = vmatprep.subr.bf16.mxu1 %v4948_v27  ;;  %v4961_v23 = vld [vmem:[#allocation5 + $0x360] ss:$16 sps:$4 sm:$0xff]   ;;  %v390_v27 = vpack.c.bf16 %v290_v20, %v286_v19  ;;  %v395_v28 = vpack.c.bf16 %v299_v22, %v295_v21  ;;  %v351_v21 = vld [vmem:[%s5689_s30 + $0x388] sm:$0xff] }
  0xc9   : > { %1397 = vmatprep.subr.bf16.mxu0 %v4921_v26  ;;  %1782 = vmatpush1.bf16.msra.mxu1 %v4946_v32  ;;  %v4987_v26 = vld [vmem:[#allocation5 + $0x36c] ss:$16 sps:$4 sm:$0xff]   ;;  %v4981_v32 = vld [vmem:[#allocation5 + $0x3a4] ss:$16 sps:$4 sm:$0xff]  }
  0xca   : > { %1783 = vmatprep.subr.bf16.mxu1 %v4951_v34  ;;  %v298_v34 = vld [vmem:[%s5689_s30 + $0x1e0] sm:$0xff]  ;;  %v355_v22 = vld [vmem:[%s5689_s30 + $0x3a8] sm:$0xff] }
  0xcb   : > { %v342_v19 = vld [vmem:[%s5689_s30 + $0x340] sm:$0xff] }
  0xcc   : > { %1398 = vmatpush1.bf16.msra.mxu0 %v4919_v31  ;;  %v294_v31 = vld [vmem:[%s5689_s30 + $0x1c0] sm:$0xff] }
  0xcd   : > { %1399 = vmatprep.subr.bf16.mxu0 %v4924_v33  ;;  %1784 = vmatpush1.bf16.msra.mxu1 %v4949_v38  ;;  %v4993_v33 = vld [vmem:[#allocation5 + $0x38c] ss:$16 sps:$4 sm:$0xff]   ;;  %v4990_v38 = vld [vmem:[#allocation5 + $0x3c4] ss:$16 sps:$4 sm:$0xff]   ;;  %v394_v41 = vpack.c.bf16 %v298_v34, %v294_v31 }
  0xce   : > { %1251 = vmatmul.mubr.bf16.gmra.mrb[8].mxu0 %v374_v35  ;;  %1637 = vmatmul.mubr.bf16.gmra.mrb[8].mxu1 %v374_v35  ;;  %v303_v35 = vld [vmem:[%s5689_s30 + $0x208] sm:$0xff]  ;;  %v346_v20 = vld [vmem:[%s5689_s30 + $0x360] sm:$0xff]  ;;  %v245_v34 = vld [vmem:[%s5689_s30 + $0x38] sm:$0xff] }
  0xcf   : > { %1260 = vmatprep.mubr.bf16.mxu0 %v379_v36  ;;  %1646 = vmatprep.mubr.bf16.mxu1 %v379_v36  ;;  %v307_v36 = vld [vmem:[%s5689_s30 + $0x228] sm:$0xff]  ;;  %v358_v31 = vld [vmem:[%s5689_s30 + $0x3c0] sm:$0xff] }
  0xd0   : > { %1400 = vmatpush1.bf16.msra.mxu0 %v4922_v37  ;;  %1785 = vmatprep.subr.bf16.mxu1 %v4957_v40  ;;  %v4979_v37 = vld [vmem:[#allocation5 + $0x3a0] ss:$16 sps:$4 sm:$0xff]   ;;  %v4996_v40 = vld [vmem:[#allocation5 + $0x3ac] ss:$16 sps:$4 sm:$0xff]   ;;  %v399_v44 = vpack.c.bf16 %v307_v36, %v303_v35 }
  0xd1   : > { %1401 = vmatprep.subr.bf16.mxu0 %v4927_v39  ;;  %1786 = vmatpush1.bf16.msra.mxu1 %v4955_v46  ;;  %v4991_v39 = vld [vmem:[#allocation5 + $0x388] ss:$16 sps:$4 sm:$0xff]   ;;  %v5002_v46 = vld [vmem:[#allocation5 + $0x3cc] ss:$16 sps:$4 sm:$0xff]  }
  0xd2   : > { %1787 = vmatprep.subr.bf16.mxu1 %v4960_v48  ;;  %v306_v48 = vld [vmem:[%s5689_s30 + $0x220] sm:$0xff] }
  0xd4   : > { %1402 = vmatpush1.bf16.msra.mxu0 %v4925_v45  ;;  %v4999_v45 = vld [vmem:[#allocation5 + $0x3e4] ss:$16 sps:$4 sm:$0xff]  }
  0xd5   : > { %1403 = vmatprep.subr.bf16.mxu0 %v4930_v47  ;;  %1788 = vmatpush1.bf16.msra.mxu1 %v4958_v52  ;;  %v302_v47 = vld [vmem:[%s5689_s30 + $0x200] sm:$0xff]  ;;  %v5000_v52 = vld [vmem:[#allocation5 + $0x3c8] ss:$16 sps:$4 sm:$0xff]  }
  0xd6   : > { %1261 = vmatmul.mubr.bf16.gmra.mrb[12].mxu0 %v378_v49  ;;  %1647 = vmatmul.mubr.bf16.gmra.mrb[12].mxu1 %v378_v49  ;;  %v311_v49 = vld [vmem:[%s5689_s30 + $0x248] sm:$0xff] }
  0xd7   : > { %1270 = vmatprep.mubr.bf16.mxu0 %v383_v50  ;;  %1656 = vmatprep.mubr.bf16.mxu1 %v383_v50  ;;  %v315_v50 = vld [vmem:[%s5689_s30 + $0x268] sm:$0xff] }
  0xd8   : > { %1404 = vmatpush1.bf16.msra.mxu0 %v4928_v51  ;;  %1789 = vmatprep.subr.bf16.mxu1 %v4966_v55  ;;  %v4997_v51 = vld [vmem:[#allocation5 + $0x3e0] ss:$16 sps:$4 sm:$0xff]   ;;  %v5003_v55 = vld [vmem:[#allocation5 + $0x3e8] ss:$16 sps:$4 sm:$0xff]   ;;  %v403_v56 = vpack.c.bf16 %v315_v50, %v311_v49 }
  0xd9   : > { %1405 = vmatprep.subr.bf16.mxu0 %v4933_v54  ;;  %1790 = vmatpush1.bf16.msra.mxu1 %v4964_v60  ;;  %v398_v54 = vpack.c.bf16 %v306_v48, %v302_v47  ;;  %v323_v60 = vld [vmem:[%s5689_s30 + $0x2a8] sm:$0xff]  ;;  %v248_v47 = vld [vmem:[%s5689_s30 + $0x50] sm:$0xff]  ;;  %v257_v49 = vld [vmem:[%s5689_s30 + $0x98] sm:$0xff] }
  0xda   : > { %1791 = vmatprep.subr.bf16.mxu1 %v4969_v62  ;;  %v252_v48 = vld [vmem:[%s5689_s30 + $0x70] sm:$0xff]  ;;  %v261_v50 = vld [vmem:[%s5689_s30 + $0xb8] sm:$0xff] }
  0xdc   : > { %1406 = vmatpush1.bf16.msra.mxu0 %v4931_v59  ;;  %v319_v59 = vld [vmem:[%s5689_s30 + $0x288] sm:$0xff] }
  0xdd   : > { %1407 = vmatprep.subr.bf16.mxu0 %v4936_v61  ;;  %1792 = vmatpush1.bf16.msra.mxu1 %v4967_v2  ;;  %v402_v61 = vpack.c.bf16 %v314_v58, %v310_v57  ;;  %v407_v62 = vpack.c.bf16 %v323_v60, %v319_v59  ;;  %v331_v2 = vld [vmem:[%s5689_s30 + $0x2e8] sm:$0xff]  ;;  %v5018_v57 = vld [vmem:[#allocation7 + $0x40] ss:$16 sps:$4 sm:$0xff]   ;;  %v5026_v59 = vld [vmem:[#allocation7 + $0x64] ss:$16 sps:$4 sm:$0xff]  }
  0xde   : > { %1271 = vmatmul.mubr.bf16.gmra.mrb[16].mxu0 %v382_v63  ;;  %1657 = vmatmul.mubr.bf16.gmra.mrb[16].mxu1 %v382_v63  ;;  %v318_v63 = vld [vmem:[%s5689_s30 + $0x280] sm:$0xff]  ;;  %v5021_v58 = vld [vmem:[#allocation7 + $0x48] ss:$16 sps:$4 sm:$0xff]   ;;  %v5029_v60 = vld [vmem:[#allocation7 + $0x6c] ss:$16 sps:$4 sm:$0xff]  }
  0xdf   : > { %1280 = vmatprep.mubr.bf16.mxu0 %v387_v0  ;;  %1666 = vmatprep.mubr.bf16.mxu1 %v387_v0  ;;  %v322_v0 = vld [vmem:[%s5689_s30 + $0x2a0] sm:$0xff] }
  0xe0   : > { %1408 = vmatpush1.bf16.msra.mxu0 %v4934_v1  ;;  %1793 = vmatprep.subr.bf16.mxu1 %v4975_v4  ;;  %v327_v1 = vld [vmem:[%s5689_s30 + $0x2c8] sm:$0xff] }
  0xe1   : > { %1409 = vmatprep.subr.bf16.mxu0 %v4945_v3  ;;  %1794 = vmatpush1.bf16.msra.mxu1 %v4973_v10  ;;  %v406_v3 = vpack.c.bf16 %v322_v0, %v318_v63  ;;  %v411_v4 = vpack.c.bf16 %v331_v2, %v327_v1  ;;  %v415_v10 = vpack.c.bf16 %v339_v8, %v335_v7  ;;  %v265_v63 = vld [vmem:[%s5689_s30 + $0xd8] sm:$0xff]  ;;  %v5024_v1 = vld [vmem:[#allocation7 + $0x60] ss:$16 sps:$4 sm:$0xff]  }
  0xe2   : > { %1795 = vmatprep.subr.bf16.mxu1 %v4978_v12  ;;  %v334_v12 = vld [vmem:[%s5689_s30 + $0x300] sm:$0xff]  ;;  %v269_v0 = vld [vmem:[%s5689_s30 + $0xf8] sm:$0xff] }
  0xe3   : > { %v5027_v2 = vld [vmem:[#allocation7 + $0x68] ss:$16 sps:$4 sm:$0xff]   ;;  %v5030_v7 = vld [vmem:[#allocation7 + $0x80] ss:$16 sps:$4 sm:$0xff]  }
  0xe4   : > { %1410 = vmatpush1.bf16.msra.mxu0 %v4943_v9  ;;  %v410_v9 = vpack.c.bf16 %v330_v6, %v326_v5  ;;  %v381_v6 = vpack.c.bf16 %v269_v0, %v265_v63  ;;  %v5033_v8 = vld [vmem:[#allocation7 + $0x88] ss:$16 sps:$4 sm:$0xff]   ;;  %v5078_v63 = vld [vmem:[#allocation7 + $0x180] ss:$16 sps:$4 sm:$0xff]  }
  0xe5   : > { %1411 = vmatprep.subr.bf16.mxu0 %v4954_v11  ;;  %1796 = vmatpush1.bf16.msra.mxu1 %v4976_v16  ;;  %v5008_v11 = vld [vmem:[#allocation7 + $0x4] ss:$16 sps:$4 sm:$0xff]   ;;  %v347_v16 = vld [vmem:[%s5689_s30 + $0x368] sm:$0xff] }
  0xe6   : > { %1281 = vmatmul.mubr.bf16.gmra.mrb[20].mxu0 %v386_v13  ;;  %1667 = vmatmul.mubr.bf16.gmra.mrb[20].mxu1 %v386_v13  ;;  %v338_v13 = vld [vmem:[%s5689_s30 + $0x320] sm:$0xff]  ;;  %v5081_v0 = vld [vmem:[#allocation7 + $0x188] ss:$16 sps:$4 sm:$0xff]  }
  0xe7   : > { %1290 = vmatprep.mubr.bf16.mxu0 %v391_v14  ;;  %1676 = vmatprep.mubr.bf16.mxu1 %v391_v14  ;;  %v5011_v14 = vld [vmem:[#allocation7 + $0xc] ss:$16 sps:$4 sm:$0xff]  }
  0xe8   : > { %1412 = vmatpush1.bf16.msra.mxu0 %v4952_v15  ;;  %1797 = vmatprep.subr.bf16.mxu1 %v4984_v18  ;;  %v343_v15 = vld [vmem:[%s5689_s30 + $0x348] sm:$0xff] }
  0xe9   : > { %1413 = vmatprep.subr.bf16.mxu0 %v4963_v17  ;;  %1798 = vmatpush1.bf16.msra.mxu1 %v4982_v24  ;;  %v414_v17 = vpack.c.bf16 %v338_v13, %v334_v12  ;;  %v419_v18 = vpack.c.bf16 %v347_v16, %v343_v15  ;;  %v423_v24 = vpack.c.bf16 %v355_v22, %v351_v21  ;;  %v268_v12 = vld [vmem:[%s5689_s30 + $0xf0] sm:$0xff]  ;;  %v273_v13 = vld [vmem:[%s5689_s30 + $0x118] sm:$0xff] }
  0xea   : > { %1799 = vmatprep.subr.bf16.mxu1 %v4987_v26  ;;  %v354_v26 = vld [vmem:[%s5689_s30 + $0x3a0] sm:$0xff]  ;;  %v5039_v16 = vld [vmem:[#allocation7 + $0xa8] ss:$16 sps:$4 sm:$0xff]  }
  0xeb   : > { %v5036_v15 = vld [vmem:[#allocation7 + $0xa0] ss:$16 sps:$4 sm:$0xff]   ;;  %v5045_v22 = vld [vmem:[#allocation7 + $0xc8] ss:$16 sps:$4 sm:$0xff]  }
  0xec   : > { %1414 = vmatpush1.bf16.msra.mxu0 %v4961_v23  ;;  %v418_v23 = vpack.c.bf16 %v346_v20, %v342_v19  ;;  %v5042_v21 = vld [vmem:[#allocation7 + $0xc0] ss:$16 sps:$4 sm:$0xff]  }
  0xed   : > { %1415 = vmatprep.subr.bf16.mxu0 %v4972_v25  ;;  %1800 = vmatpush1.bf16.msra.mxu1 %v4985_v30  ;;  %v350_v25 = vld [vmem:[%s5689_s30 + $0x380] sm:$0xff] }
  0xee   : > { %1291 = vmatmul.mubr.bf16.gmra.mrb[24].mxu0 %v390_v27  ;;  %1677 = vmatmul.mubr.bf16.gmra.mrb[24].mxu1 %v390_v27  ;;  %v359_v27 = vld [vmem:[%s5689_s30 + $0x3c8] sm:$0xff] }
  0xef   : > { %1300 = vmatprep.mubr.bf16.mxu0 %v395_v28  ;;  %1686 = vmatprep.mubr.bf16.mxu1 %v395_v28  ;;  %v363_v28 = vld [vmem:[%s5689_s30 + $0x3e8] sm:$0xff] }
  0xf0   : > { %1416 = vmatpush1.bf16.msra.mxu0 %v4970_v29  ;;  %1801 = vmatprep.subr.bf16.mxu1 %v4993_v33  ;;  %v422_v29 = vpack.c.bf16 %v354_v26, %v350_v25  ;;  %v427_v30 = vpack.c.bf16 %v363_v28, %v359_v27  ;;  %v241_v33 = vld [vmem:[%s5689_s30 + $0x18] sm:$0xff]  ;;  %v272_v25 = vld [vmem:[%s5689_s30 + $0x110] sm:$0xff] }
  0xf1   : > { %1417 = vmatprep.subr.bf16.mxu0 %v4981_v32  ;;  %1802 = vmatpush1.bf16.msra.mxu1 %v4991_v39  ;;  %v362_v32 = vld [vmem:[%s5689_s30 + $0x3e0] sm:$0xff]  ;;  %v369_v36 = vpack.c.bf16 %v245_v34, %v241_v33  ;;  %v249_v39 = vld [vmem:[%s5689_s30 + $0x58] sm:$0xff]  ;;  %v276_v26 = vld [vmem:[%s5689_s30 + $0x130] sm:$0xff] }
  0xf2   : > { %1803 = vmatprep.subr.bf16.mxu1 %v4996_v40  ;;  %v426_v35 = vpack.c.bf16 %v362_v32, %v358_v31  ;;  %v253_v40 = vld [vmem:[%s5689_s30 + $0x78] sm:$0xff]  ;;  %v5056_v31 = vld [vmem:[#allocation7 + $0x104] ss:$16 sps:$4 sm:$0xff]   ;;  %v384_v33 = vpack.c.bf16 %v276_v26, %v272_v25 }
  0xf3   : > { %v281_v27 = vld [vmem:[%s5689_s30 + $0x158] sm:$0xff] }
  0xf4   : > { %1418 = vmatpush1.bf16.msra.mxu0 %v4979_v37  ;;  %v240_v37 = vld [vmem:[%s5689_s30 + $0x10] sm:$0xff]  ;;  %v285_v28 = vld [vmem:[%s5689_s30 + $0x178] sm:$0xff] }
  0xf5   : > { %1419 = vmatprep.subr.bf16.mxu0 %v4990_v38  ;;  %1804 = vmatpush1.bf16.msra.mxu1 %v4994_v43  ;;  %v244_v38 = vld [vmem:[%s5689_s30 + $0x30] sm:$0xff]  ;;  %v5059_v32 = vld [vmem:[#allocation7 + $0x10c] ss:$16 sps:$4 sm:$0xff]   ;;  %v389_v34 = vpack.c.bf16 %v285_v28, %v281_v27 }
  0xf6   : > { %1301 = vmatmul.mubr.bf16.gmra.mrb[28].mxu0 %v394_v41  ;;  %1687 = vmatmul.mubr.bf16.gmra.mrb[28].mxu1 %v394_v41  ;;  %v368_v41 = vpack.c.bf16 %v244_v38, %v240_v37  ;;  %v5006_v43 = vld [vmem:[#allocation7] ss:$16 sps:$4 sm:$0xff]   ;;  %v5062_v37 = vld [vmem:[#allocation7 + $0x124] ss:$16 sps:$4 sm:$0xff]   ;;  %v5065_v38 = vld [vmem:[#allocation7 + $0x12c] ss:$16 sps:$4 sm:$0xff]  }
  0xf7   : > { %1310 = vmatprep.mubr.bf16.mxu0 %v399_v44  ;;  %1696 = vmatprep.mubr.bf16.mxu1 %v399_v44  ;;  %v5009_v44 = vld [vmem:[#allocation7 + $0x8] ss:$16 sps:$4 sm:$0xff]   ;;  %v320_v27 = vld [vmem:[%s5689_s30 + $0x290] sm:$0xff] }
  0xf8   : > { %1420 = vmatpush1.bf16.msra.mxu0 %v4988_v42  ;;  %1805 = vmatprep.subr.bf16.mxu1 %v5002_v46  ;;  %v373_v42 = vpack.c.bf16 %v253_v40, %v249_v39  ;;  %v5017_v46 = vld [vmem:[#allocation7 + $0x2c] ss:$16 sps:$4 sm:$0xff]   ;;  %v280_v39 = vld [vmem:[%s5689_s30 + $0x150] sm:$0xff] }
  0xf9   : > { %1421 = vmatprep.subr.bf16.mxu0 %v4999_v45  ;;  %1806 = vmatpush1.bf16.msra.mxu1 %v5000_v52  ;;  %v5014_v45 = vld [vmem:[#allocation7 + $0x24] ss:$16 sps:$4 sm:$0xff]   ;;  %v5015_v52 = vld [vmem:[#allocation7 + $0x28] ss:$16 sps:$4 sm:$0xff]  }
  0xfa   : > { %1807 = vmatprep.subr.bf16.mxu1 %v5005_v53  ;;  %v5020_v53 = vld [vmem:[#allocation7 + $0x44] ss:$16 sps:$4 sm:$0xff]  }
  0xfb   : > { %v284_v40 = vld [vmem:[%s5689_s30 + $0x170] sm:$0xff] }
  0xfc   : > { %1422 = vmatpush1.bf16.msra.mxu0 %v4997_v51  ;;  %v5012_v51 = vld [vmem:[#allocation7 + $0x20] ss:$16 sps:$4 sm:$0xff]  }
  0xfd   : > { %1808 = vmatpush1.bf16.msra.mxu1 %v5003_v55  ;;  %2930 = vmatprep.subr.bf16.mxu0 %v5008_v11  ;;  %v372_v55 = vpack.c.bf16 %v252_v48, %v248_v47  ;;  %v264_v11 = vld [vmem:[%s5689_s30 + $0xd0] sm:$0xff]  ;;  %v388_v47 = vpack.c.bf16 %v284_v40, %v280_v39 }
  0xfe   : > { %1311 = vmatmul.mubr.bf16.gmra.mrb[32].mxu0 %v398_v54  ;;  %1697 = vmatmul.mubr.bf16.gmra.mrb[32].mxu1 %v398_v54  ;;  %v5023_v54 = vld [vmem:[#allocation7 + $0x4c] ss:$16 sps:$4 sm:$0xff]   ;;  %v380_v19 = vpack.c.bf16 %v268_v12, %v264_v11  ;;  %v324_v28 = vld [vmem:[%s5689_s30 + $0x2b0] sm:$0xff] }
  0xff   : > { %1320 = vmatprep.mubr.bf16.mxu0 %v403_v56  ;;  %1706 = vmatprep.mubr.bf16.mxu1 %v403_v56  ;;  %v377_v56 = vpack.c.bf16 %v261_v50, %v257_v49  ;;  %v5066_v49 = vld [vmem:[#allocation7 + $0x140] ss:$16 sps:$4 sm:$0xff]   ;;  %v5069_v50 = vld [vmem:[#allocation7 + $0x148] ss:$16 sps:$4 sm:$0xff]   ;;  %v5098_v39 = vld [vmem:[#allocation7 + $0x1e4] ss:$16 sps:$4 sm:$0xff]  }
 0x100   : > { %3316 = vmatprep.subr.bf16.mxu1 %v5011_v14  ;;  %v277_v14 = vld [vmem:[%s5689_s30 + $0x138] sm:$0xff]  ;;  %v5096_v40 = vld [vmem:[#allocation7 + $0x1e0] ss:$16 sps:$4 sm:$0xff]  }
 0x101   : > { %v385_v20 = vpack.c.bf16 %v277_v14, %v273_v13  ;;  %v5090_v13 = vld [vmem:[#allocation7 + $0x1c0] ss:$16 sps:$4 sm:$0xff]   ;;  %v5093_v14 = vld [vmem:[#allocation7 + $0x1c8] ss:$16 sps:$4 sm:$0xff]  }
 0x106   : > { %1321 = vmatmul.mubr.bf16.gmra.mrb[36].mxu0 %v402_v61  ;;  %1707 = vmatmul.mubr.bf16.gmra.mrb[36].mxu1 %v402_v61  ;;  %v256_v61 = vld [vmem:[%s5689_s30 + $0x90] sm:$0xff] }
 0x107   : > { %1330 = vmatprep.mubr.bf16.mxu0 %v407_v62  ;;  %1716 = vmatprep.mubr.bf16.mxu1 %v407_v62  ;;  %v260_v62 = vld [vmem:[%s5689_s30 + $0xb0] sm:$0xff] }
 0x108   : > { %v376_v5 = vpack.c.bf16 %v260_v62, %v256_v61 }
 0x10e   : > { %1331 = vmatmul.mubr.bf16.gmra.mrb[40].mxu0 %v406_v3  ;;  %1717 = vmatmul.mubr.bf16.gmra.mrb[40].mxu1 %v406_v3  ;;  %v5032_v3 = vld [vmem:[#allocation7 + $0x84] ss:$16 sps:$4 sm:$0xff]  }
 0x10f   : > { %1340 = vmatprep.mubr.bf16.mxu0 %v411_v4  ;;  %1726 = vmatprep.mubr.bf16.mxu1 %v411_v4  ;;  %v5035_v4 = vld [vmem:[#allocation7 + $0x8c] ss:$16 sps:$4 sm:$0xff]  }
 0x116   : > { %1341 = vmatmul.mubr.bf16.gmra.mrb[44].mxu0 %v410_v9  ;;  %1727 = vmatmul.mubr.bf16.gmra.mrb[44].mxu1 %v410_v9  ;;  %v5038_v9 = vld [vmem:[#allocation7 + $0xa4] ss:$16 sps:$4 sm:$0xff]  }
 0x117   : > { %1350 = vmatprep.mubr.bf16.mxu0 %v415_v10  ;;  %1736 = vmatprep.mubr.bf16.mxu1 %v415_v10  ;;  %v5041_v10 = vld [vmem:[#allocation7 + $0xac] ss:$16 sps:$4 sm:$0xff]  }
 0x11e   : > { %1351 = vmatmul.mubr.bf16.gmra.mrb[48].mxu0 %v414_v17  ;;  %1737 = vmatmul.mubr.bf16.gmra.mrb[48].mxu1 %v414_v17  ;;  %v5044_v17 = vld [vmem:[#allocation7 + $0xc4] ss:$16 sps:$4 sm:$0xff]  }
 0x11f   : > { %1360 = vmatprep.mubr.bf16.mxu0 %v419_v18  ;;  %1746 = vmatprep.mubr.bf16.mxu1 %v419_v18  ;;  %v5047_v18 = vld [vmem:[#allocation7 + $0xcc] ss:$16 sps:$4 sm:$0xff]  }
 0x126   : > { %1361 = vmatmul.mubr.bf16.gmra.mrb[52].mxu0 %v418_v23  ;;  %1747 = vmatmul.mubr.bf16.gmra.mrb[52].mxu1 %v418_v23  ;;  %v5050_v23 = vld [vmem:[#allocation7 + $0xe4] ss:$16 sps:$4 sm:$0xff]  }
 0x127   : > { %1370 = vmatprep.mubr.bf16.mxu0 %v423_v24  ;;  %1756 = vmatprep.mubr.bf16.mxu1 %v423_v24  ;;  %v5053_v24 = vld [vmem:[#allocation7 + $0xec] ss:$16 sps:$4 sm:$0xff]  }
 0x12e   : > { %1371 = vmatmul.mubr.bf16.gmra.mrb[56].mxu0 %v422_v29  ;;  %1757 = vmatmul.mubr.bf16.gmra.mrb[56].mxu1 %v422_v29  ;;  %v5048_v29 = vld [vmem:[#allocation7 + $0xe0] ss:$16 sps:$4 sm:$0xff]  }
 0x12f   : > { %1380 = vmatprep.mubr.bf16.mxu0 %v427_v30  ;;  %1766 = vmatprep.mubr.bf16.mxu1 %v427_v30  ;;  %v5051_v30 = vld [vmem:[#allocation7 + $0xe8] ss:$16 sps:$4 sm:$0xff]  }
 0x136   : > { %1381 = vmatmul.mubr.bf16.gmra.mrb[60].mxu0 %v426_v35  ;;  %1767 = vmatmul.mubr.bf16.gmra.mrb[60].mxu1 %v426_v35  ;;  %v5054_v35 = vld [vmem:[#allocation7 + $0x100] ss:$16 sps:$4 sm:$0xff]  }
 0x137   : > { %1423 = vmatprep.mubr.bf16.mxu0 %v369_v36  ;;  %1809 = vmatprep.mubr.bf16.mxu1 %v369_v36  ;;  %v5057_v36 = vld [vmem:[#allocation7 + $0x108] ss:$16 sps:$4 sm:$0xff]  }
 0x13e   : > { %1424 = vmatmul.mubr.bf16.vlgmr.msra.gmra.mrb[0].mxu0 %v368_v41  ;;  %1810 = vmatmul.mubr.bf16.vlgmr.msra.gmra.mrb[0].mxu1 %v368_v41  ;;  %v289_v41 = vld [vmem:[%s5689_s30 + $0x198] sm:$0xff] }
 0x13f   : > { %1433 = vmatprep.mubr.bf16.mxu0 %v373_v42  ;;  %1819 = vmatprep.mubr.bf16.mxu1 %v373_v42  ;;  %v293_v42 = vld [vmem:[%s5689_s30 + $0x1b8] sm:$0xff] }
 0x140   : > { %2931 = vmatpush1.bf16.msra.mxu0 %v5006_v43  ;;  %3317 = vmatpush1.bf16.msra.mxu1 %v5009_v44  ;;  %v5060_v43 = vld [vmem:[#allocation7 + $0x120] ss:$16 sps:$4 sm:$0xff]   ;;  %v5063_v44 = vld [vmem:[#allocation7 + $0x128] ss:$16 sps:$4 sm:$0xff]   ;;  %v393_v48 = vpack.c.bf16 %v293_v42, %v289_v41  ;;  %v5101_v41 = vld [vmem:[#allocation7 + $0x1ec] ss:$16 sps:$4 sm:$0xff]  }
 0x141   : > { %2932 = vmatprep.subr.bf16.mxu0 %v5014_v45  ;;  %3318 = vmatprep.subr.bf16.mxu1 %v5017_v46  ;;  %v5068_v45 = vld [vmem:[#allocation7 + $0x144] ss:$16 sps:$4 sm:$0xff]   ;;  %v5071_v46 = vld [vmem:[#allocation7 + $0x14c] ss:$16 sps:$4 sm:$0xff]   ;;  %v5099_v42 = vld [vmem:[#allocation7 + $0x1e8] ss:$16 sps:$4 sm:$0xff]  }
 0x144   : > { %2933 = vmatpush1.bf16.msra.mxu0 %v5012_v51  ;;  %3319 = vmatpush1.bf16.msra.mxu1 %v5015_v52  ;;  %v5074_v51 = vld [vmem:[#allocation7 + $0x164] ss:$16 sps:$4 sm:$0xff]   ;;  %v5077_v52 = vld [vmem:[#allocation7 + $0x16c] ss:$16 sps:$4 sm:$0xff]  }
 0x145   : > { %2934 = vmatprep.subr.bf16.mxu0 %v5020_v53  ;;  %3320 = vmatprep.subr.bf16.mxu1 %v5023_v54  ;;  %v288_v53 = vld [vmem:[%s5689_s30 + $0x190] sm:$0xff] }
 0x146   : > { %1434 = vmatmul.mubr.bf16.gmra.mrb[4].mxu0 %v372_v55  ;;  %1820 = vmatmul.mubr.bf16.gmra.mrb[4].mxu1 %v372_v55  ;;  %v292_v54 = vld [vmem:[%s5689_s30 + $0x1b0] sm:$0xff]  ;;  %v297_v55 = vld [vmem:[%s5689_s30 + $0x1d8] sm:$0xff] }
 0x147   : > { %1443 = vmatprep.mubr.bf16.mxu0 %v377_v56  ;;  %1829 = vmatprep.mubr.bf16.mxu1 %v377_v56  ;;  %v301_v56 = vld [vmem:[%s5689_s30 + $0x1f8] sm:$0xff]  ;;  %v392_v61 = vpack.c.bf16 %v292_v54, %v288_v53 }
 0x148   : > { %2935 = vmatpush1.bf16.msra.mxu0 %v5018_v57  ;;  %3321 = vmatpush1.bf16.msra.mxu1 %v5021_v58  ;;  %v5072_v57 = vld [vmem:[#allocation7 + $0x160] ss:$16 sps:$4 sm:$0xff]   ;;  %v5075_v58 = vld [vmem:[#allocation7 + $0x168] ss:$16 sps:$4 sm:$0xff]   ;;  %v397_v62 = vpack.c.bf16 %v301_v56, %v297_v55 }
 0x149   : > { %2936 = vmatprep.subr.bf16.mxu0 %v5026_v59  ;;  %3322 = vmatprep.subr.bf16.mxu1 %v5029_v60  ;;  %v5080_v59 = vld [vmem:[#allocation7 + $0x184] ss:$16 sps:$4 sm:$0xff]   ;;  %v5083_v60 = vld [vmem:[#allocation7 + $0x18c] ss:$16 sps:$4 sm:$0xff]  }
 0x14a   : > { %v353_v53 = vld [vmem:[%s5689_s30 + $0x398] sm:$0xff] }
 0x14b   : > { %v357_v54 = vld [vmem:[%s5689_s30 + $0x3b8] sm:$0xff] }
 0x14c   : > { %2937 = vmatpush1.bf16.msra.mxu0 %v5024_v1  ;;  %3323 = vmatpush1.bf16.msra.mxu1 %v5027_v2  ;;  %v5086_v1 = vld [vmem:[#allocation7 + $0x1a4] ss:$16 sps:$4 sm:$0xff]   ;;  %v5089_v2 = vld [vmem:[#allocation7 + $0x1ac] ss:$16 sps:$4 sm:$0xff]   ;;  %v425_v56 = vpack.c.bf16 %v357_v54, %v353_v53 }
 0x14d   : > { %2938 = vmatprep.subr.bf16.mxu0 %v5032_v3  ;;  %3324 = vmatprep.subr.bf16.mxu1 %v5035_v4  ;;  %v296_v3 = vld [vmem:[%s5689_s30 + $0x1d0] sm:$0xff]  ;;  %v5125_v53 = vld [vmem:[#allocation7 + $0x26c] ss:$16 sps:$4 sm:$0xff]  }
 0x14e   : > { %1444 = vmatmul.mubr.bf16.gmra.mrb[8].mxu0 %v376_v5  ;;  %1830 = vmatmul.mubr.bf16.gmra.mrb[8].mxu1 %v376_v5  ;;  %v300_v4 = vld [vmem:[%s5689_s30 + $0x1f0] sm:$0xff]  ;;  %v305_v5 = vld [vmem:[%s5689_s30 + $0x218] sm:$0xff] }
 0x14f   : > { %1453 = vmatprep.mubr.bf16.mxu0 %v381_v6  ;;  %1839 = vmatprep.mubr.bf16.mxu1 %v381_v6  ;;  %v309_v6 = vld [vmem:[%s5689_s30 + $0x238] sm:$0xff]  ;;  %v396_v11 = vpack.c.bf16 %v300_v4, %v296_v3 }
 0x150   : > { %2939 = vmatpush1.bf16.msra.mxu0 %v5030_v7  ;;  %3325 = vmatpush1.bf16.msra.mxu1 %v5033_v8  ;;  %v5084_v7 = vld [vmem:[#allocation7 + $0x1a0] ss:$16 sps:$4 sm:$0xff]   ;;  %v5087_v8 = vld [vmem:[#allocation7 + $0x1a8] ss:$16 sps:$4 sm:$0xff]   ;;  %v401_v12 = vpack.c.bf16 %v309_v6, %v305_v5 }
 0x151   : > { %2940 = vmatprep.subr.bf16.mxu0 %v5038_v9  ;;  %3326 = vmatprep.subr.bf16.mxu1 %v5041_v10  ;;  %v5092_v9 = vld [vmem:[#allocation7 + $0x1c4] ss:$16 sps:$4 sm:$0xff]   ;;  %v5095_v10 = vld [vmem:[#allocation7 + $0x1cc] ss:$16 sps:$4 sm:$0xff]  }
 0x154   : > { %2941 = vmatpush1.bf16.msra.mxu0 %v5036_v15  ;;  %3327 = vmatpush1.bf16.msra.mxu1 %v5039_v16  ;;  %v304_v15 = vld [vmem:[%s5689_s30 + $0x210] sm:$0xff] }
 0x155   : > { %2942 = vmatprep.subr.bf16.mxu0 %v5044_v17  ;;  %3328 = vmatprep.subr.bf16.mxu1 %v5047_v18  ;;  %v308_v16 = vld [vmem:[%s5689_s30 + $0x230] sm:$0xff]  ;;  %v313_v17 = vld [vmem:[%s5689_s30 + $0x258] sm:$0xff] }
 0x156   : > { %1454 = vmatmul.mubr.bf16.gmra.mrb[12].mxu0 %v380_v19  ;;  %1840 = vmatmul.mubr.bf16.gmra.mrb[12].mxu1 %v380_v19  ;;  %v317_v18 = vld [vmem:[%s5689_s30 + $0x278] sm:$0xff]  ;;  %v400_v19 = vpack.c.bf16 %v308_v16, %v304_v15 }
 0x157   : > { %1463 = vmatprep.mubr.bf16.mxu0 %v385_v20  ;;  %1849 = vmatprep.mubr.bf16.mxu1 %v385_v20  ;;  %v405_v20 = vpack.c.bf16 %v317_v18, %v313_v17 }
 0x158   : > { %2943 = vmatpush1.bf16.msra.mxu0 %v5042_v21  ;;  %3329 = vmatpush1.bf16.msra.mxu1 %v5045_v22  ;;  %v312_v21 = vld [vmem:[%s5689_s30 + $0x250] sm:$0xff] }
 0x159   : > { %2944 = vmatprep.subr.bf16.mxu0 %v5050_v23  ;;  %3330 = vmatprep.subr.bf16.mxu1 %v5053_v24  ;;  %v316_v22 = vld [vmem:[%s5689_s30 + $0x270] sm:$0xff]  ;;  %v321_v23 = vld [vmem:[%s5689_s30 + $0x298] sm:$0xff] }
 0x15a   : > { %v325_v24 = vld [vmem:[%s5689_s30 + $0x2b8] sm:$0xff]  ;;  %v404_v25 = vpack.c.bf16 %v316_v22, %v312_v21  ;;  %v5102_v22 = vld [vmem:[#allocation7 + $0x200] ss:$16 sps:$4 sm:$0xff]  }
 0x15b   : > { %v409_v26 = vpack.c.bf16 %v325_v24, %v321_v23  ;;  %v5105_v23 = vld [vmem:[#allocation7 + $0x208] ss:$16 sps:$4 sm:$0xff]   ;;  %v5110_v24 = vld [vmem:[#allocation7 + $0x224] ss:$16 sps:$4 sm:$0xff]  }
 0x15c   : > { %2945 = vmatpush1.bf16.msra.mxu0 %v5048_v29  ;;  %3331 = vmatpush1.bf16.msra.mxu1 %v5051_v30  ;;  %v329_v29 = vld [vmem:[%s5689_s30 + $0x2d8] sm:$0xff] }
 0x15d   : > { %2946 = vmatprep.subr.bf16.mxu0 %v5056_v31  ;;  %3332 = vmatprep.subr.bf16.mxu1 %v5059_v32  ;;  %v333_v30 = vld [vmem:[%s5689_s30 + $0x2f8] sm:$0xff]  ;;  %v408_v31 = vpack.c.bf16 %v324_v28, %v320_v27 }
 0x15e   : > { %1464 = vmatmul.mubr.bf16.gmra.mrb[16].mxu0 %v384_v33  ;;  %1850 = vmatmul.mubr.bf16.gmra.mrb[16].mxu1 %v384_v33  ;;  %v413_v32 = vpack.c.bf16 %v333_v30, %v329_v29  ;;  %v328_v33 = vld [vmem:[%s5689_s30 + $0x2d0] sm:$0xff] }
 0x15f   : > { %1473 = vmatprep.mubr.bf16.mxu0 %v389_v34  ;;  %1859 = vmatprep.mubr.bf16.mxu1 %v389_v34  ;;  %v332_v34 = vld [vmem:[%s5689_s30 + $0x2f0] sm:$0xff] }
 0x160   : > { %2947 = vmatpush1.bf16.msra.mxu0 %v5054_v35  ;;  %3333 = vmatpush1.bf16.msra.mxu1 %v5057_v36  ;;  %v337_v35 = vld [vmem:[%s5689_s30 + $0x318] sm:$0xff]  ;;  %v5108_v30 = vld [vmem:[#allocation7 + $0x220] ss:$16 sps:$4 sm:$0xff]  }
 0x161   : > { %2948 = vmatprep.subr.bf16.mxu0 %v5062_v37  ;;  %3334 = vmatprep.subr.bf16.mxu1 %v5065_v38  ;;  %v341_v36 = vld [vmem:[%s5689_s30 + $0x338] sm:$0xff]  ;;  %v412_v37 = vpack.c.bf16 %v332_v34, %v328_v33  ;;  %v5116_v34 = vld [vmem:[#allocation7 + $0x244] ss:$16 sps:$4 sm:$0xff]  }
 0x162   : > { %v417_v38 = vpack.c.bf16 %v341_v36, %v337_v35  ;;  %v5119_v35 = vld [vmem:[#allocation7 + $0x24c] ss:$16 sps:$4 sm:$0xff]  }
 0x164   : > { %2949 = vmatpush1.bf16.msra.mxu0 %v5060_v43  ;;  %3335 = vmatpush1.bf16.msra.mxu1 %v5063_v44  ;;  %v336_v43 = vld [vmem:[%s5689_s30 + $0x310] sm:$0xff] }
 0x165   : > { %2950 = vmatprep.subr.bf16.mxu0 %v5068_v45  ;;  %3336 = vmatprep.subr.bf16.mxu1 %v5071_v46  ;;  %v340_v44 = vld [vmem:[%s5689_s30 + $0x330] sm:$0xff]  ;;  %v345_v45 = vld [vmem:[%s5689_s30 + $0x358] sm:$0xff] }
 0x166   : > { %1474 = vmatmul.mubr.bf16.gmra.mrb[20].mxu0 %v388_v47  ;;  %1860 = vmatmul.mubr.bf16.gmra.mrb[20].mxu1 %v388_v47  ;;  %v349_v46 = vld [vmem:[%s5689_s30 + $0x378] sm:$0xff]  ;;  %v416_v47 = vpack.c.bf16 %v340_v44, %v336_v43 }
 0x167   : > { %1483 = vmatprep.mubr.bf16.mxu0 %v393_v48  ;;  %1869 = vmatprep.mubr.bf16.mxu1 %v393_v48  ;;  %v421_v48 = vpack.c.bf16 %v349_v46, %v345_v45 }
 0x168   : > { %2951 = vmatpush1.bf16.msra.mxu0 %v5066_v49  ;;  %3337 = vmatpush1.bf16.msra.mxu1 %v5069_v50  ;;  %v5104_v49 = vld [vmem:[#allocation7 + $0x204] ss:$16 sps:$4 sm:$0xff]   ;;  %v5107_v50 = vld [vmem:[#allocation7 + $0x20c] ss:$16 sps:$4 sm:$0xff]  }
 0x169   : > { %2952 = vmatprep.subr.bf16.mxu0 %v5074_v51  ;;  %3338 = vmatprep.subr.bf16.mxu1 %v5077_v52  ;;  %v344_v51 = vld [vmem:[%s5689_s30 + $0x350] sm:$0xff] }
 0x16a   : > { %v348_v52 = vld [vmem:[%s5689_s30 + $0x370] sm:$0xff] }
 0x16b   : > { %v420_v55 = vpack.c.bf16 %v348_v52, %v344_v51  ;;  %v5117_v51 = vld [vmem:[#allocation7 + $0x248] ss:$16 sps:$4 sm:$0xff]   ;;  %v5122_v52 = vld [vmem:[#allocation7 + $0x264] ss:$16 sps:$4 sm:$0xff]  }
 0x16c   : > { %2953 = vmatpush1.bf16.msra.mxu0 %v5072_v57  ;;  %3339 = vmatpush1.bf16.msra.mxu1 %v5075_v58  ;;  %v352_v57 = vld [vmem:[%s5689_s30 + $0x390] sm:$0xff] }
 0x16d   : > { %2954 = vmatprep.subr.bf16.mxu0 %v5080_v59  ;;  %3340 = vmatprep.subr.bf16.mxu1 %v5083_v60  ;;  %v356_v58 = vld [vmem:[%s5689_s30 + $0x3b0] sm:$0xff]  ;;  %v361_v59 = vld [vmem:[%s5689_s30 + $0x3d8] sm:$0xff] }
 0x16e   : > { %1484 = vmatmul.mubr.bf16.gmra.mrb[24].mxu0 %v392_v61  ;;  %1870 = vmatmul.mubr.bf16.gmra.mrb[24].mxu1 %v392_v61  ;;  %v365_v60 = vld [vmem:[%s5689_s30 + $0x3f8] sm:$0xff]  ;;  %v424_v61 = vpack.c.bf16 %v356_v58, %v352_v57  ;;  %v5120_v58 = vld [vmem:[#allocation7 + $0x260] ss:$16 sps:$4 sm:$0xff]  }
 0x16f   : > { %1493 = vmatprep.mubr.bf16.mxu0 %v397_v62  ;;  %1879 = vmatprep.mubr.bf16.mxu1 %v397_v62  ;;  %v429_v62 = vpack.c.bf16 %v365_v60, %v361_v59  ;;  %v5123_v59 = vld [vmem:[#allocation7 + $0x268] ss:$16 sps:$4 sm:$0xff]  }
 0x170   : > { %2955 = vmatpush1.bf16.msra.mxu0 %v5078_v63  ;;  %3341 = vmatpush1.bf16.msra.mxu1 %v5081_v0  ;;  %v360_v63 = vld [vmem:[%s5689_s30 + $0x3d0] sm:$0xff] }
 0x171   : > { %2956 = vmatprep.subr.bf16.mxu0 %v5086_v1  ;;  %3342 = vmatprep.subr.bf16.mxu1 %v5089_v2  ;;  %v364_v0 = vld [vmem:[%s5689_s30 + $0x3f0] sm:$0xff] }
 0x172   : > { %v428_v1 = vpack.c.bf16 %v364_v0, %v360_v63  ;;  %v5131_v63 = vld [vmem:[#allocation7 + $0x28c] ss:$16 sps:$4 sm:$0xff]  }
 0x174   : > { %2957 = vmatpush1.bf16.msra.mxu0 %v5084_v7  ;;  %3343 = vmatpush1.bf16.msra.mxu1 %v5087_v8 }
 0x175   : > { %2958 = vmatprep.subr.bf16.mxu0 %v5092_v9  ;;  %3344 = vmatprep.subr.bf16.mxu1 %v5095_v10 }
 0x176   : > { %1494 = vmatmul.mubr.bf16.gmra.mrb[28].mxu0 %v396_v11  ;;  %1880 = vmatmul.mubr.bf16.gmra.mrb[28].mxu1 %v396_v11 }
 0x177   : > { %1503 = vmatprep.mubr.bf16.mxu0 %v401_v12  ;;  %1889 = vmatprep.mubr.bf16.mxu1 %v401_v12 }
 0x178   : > { %2959 = vmatpush1.bf16.msra.mxu0 %v5090_v13  ;;  %3345 = vmatpush1.bf16.msra.mxu1 %v5093_v14 }
 0x179   : > { %2960 = vmatprep.subr.bf16.mxu0 %v5098_v39  ;;  %3346 = vmatprep.subr.bf16.mxu1 %v5101_v41 }
 0x17c   : > { %2961 = vmatpush1.bf16.msra.mxu0 %v5096_v40  ;;  %3347 = vmatpush1.bf16.msra.mxu1 %v5099_v42 }
 0x17d   : > { %3123 = vmatprep.subr.bf16.mxu0 %v5104_v49  ;;  %3509 = vmatprep.subr.bf16.mxu1 %v5107_v50  ;;  %v5114_v50 = vld [vmem:[#allocation7 + $0x240] ss:$16 sps:$4 sm:$0xff]  }
 0x17e   : > { %1504 = vmatmul.mubr.bf16.gmra.mrb[32].mxu0 %v400_v19  ;;  %1890 = vmatmul.mubr.bf16.gmra.mrb[32].mxu1 %v400_v19 }
 0x17f   : > { %1513 = vmatprep.mubr.bf16.mxu0 %v405_v20  ;;  %1899 = vmatprep.mubr.bf16.mxu1 %v405_v20 }
 0x186   : > { %1514 = vmatmul.mubr.bf16.gmra.mrb[36].mxu0 %v404_v25  ;;  %1900 = vmatmul.mubr.bf16.gmra.mrb[36].mxu1 %v404_v25  ;;  %v5113_v25 = vld [vmem:[#allocation7 + $0x22c] ss:$16 sps:$4 sm:$0xff]  }
 0x187   : > { %1523 = vmatprep.mubr.bf16.mxu0 %v409_v26  ;;  %1909 = vmatprep.mubr.bf16.mxu1 %v409_v26 }
 0x18e   : > { %1524 = vmatmul.mubr.bf16.gmra.mrb[40].mxu0 %v408_v31  ;;  %1910 = vmatmul.mubr.bf16.gmra.mrb[40].mxu1 %v408_v31  ;;  %v5111_v31 = vld [vmem:[#allocation7 + $0x228] ss:$16 sps:$4 sm:$0xff]  }
 0x18f   : > { %1533 = vmatprep.mubr.bf16.mxu0 %v413_v32  ;;  %1919 = vmatprep.mubr.bf16.mxu1 %v413_v32 }
 0x196   : > { %1534 = vmatmul.mubr.bf16.gmra.mrb[44].mxu0 %v412_v37  ;;  %1920 = vmatmul.mubr.bf16.gmra.mrb[44].mxu1 %v412_v37 }
 0x197   : > { %1543 = vmatprep.mubr.bf16.mxu0 %v417_v38  ;;  %1929 = vmatprep.mubr.bf16.mxu1 %v417_v38 }
 0x19e   : > { %1544 = vmatmul.mubr.bf16.gmra.mrb[48].mxu0 %v416_v47  ;;  %1930 = vmatmul.mubr.bf16.gmra.mrb[48].mxu1 %v416_v47 }
 0x19f   : > { %1553 = vmatprep.mubr.bf16.mxu0 %v421_v48  ;;  %1939 = vmatprep.mubr.bf16.mxu1 %v421_v48 }
 0x1a6   : > { %1554 = vmatmul.mubr.bf16.gmra.mrb[52].mxu0 %v420_v55  ;;  %1940 = vmatmul.mubr.bf16.gmra.mrb[52].mxu1 %v420_v55 }
 0x1a7   : > { %1563 = vmatprep.mubr.bf16.mxu0 %v425_v56  ;;  %1949 = vmatprep.mubr.bf16.mxu1 %v425_v56 }
 0x1ae   : > { %1564 = vmatmul.mubr.bf16.gmra.mrb[56].mxu0 %v424_v61  ;;  %1950 = vmatmul.mubr.bf16.gmra.mrb[56].mxu1 %v424_v61 }
 0x1af   : > { %1573 = vmatprep.mubr.bf16.mxu0 %v429_v62  ;;  %1959 = vmatprep.mubr.bf16.mxu1 %v429_v62  ;;  %v5128_v62 = vld [vmem:[#allocation7 + $0x284] ss:$16 sps:$4 sm:$0xff]  }
 0x1b6   : > { %1574 = vmatmul.mubr.bf16.gmra.mrb[60].mxu0 %v428_v1  ;;  %1960 = vmatmul.mubr.bf16.gmra.mrb[60].mxu1 %v428_v1 }
 0x211   : > { %v1425_v2 = vpop.f32.mrb[0].mxu0  ;;  %v1811_v3 = vpop.f32.mrb[0].mxu1 }
 0x212   : > { %v1427_v4 = vpop.f32.mrb[1].mxu0  ;;  %v1813_v5 = vpop.f32.mrb[1].mxu1  ;;  %v1970_v8 = vmax.f32 %v1425_v2, 0.0  ;;  %v1972_v9 = vmax.f32 %v1811_v3, 0.0 }
 0x213   : > { %v1429_v6 = vpop.f32.mrb[2].mxu0  ;;  %v1815_v7 = vpop.f32.mrb[2].mxu1  ;;  %v1971_v14 = vmax.f32 %v1427_v4, 0.0  ;;  %v1973_v15 = vmax.f32 %v1813_v5, 0.0 }
 0x214   : > { %v1974_v10 = vmax.f32 %v1429_v6, 0.0  ;;  %v1976_v11 = vmax.f32 %v1815_v7, 0.0  ;;  %v1431_v12 = vpop.f32.mrb[3].mxu0  ;;  %v1817_v13 = vpop.f32.mrb[3].mxu1 }
 0x215   : > { %v1975_v16 = vmax.f32 %v1431_v12, 0.0  ;;  %v1977_v17 = vmax.f32 %v1817_v13, 0.0 }
 0x216   : > { %v2098_v18 = vpack.c.bf16 %v1974_v10, %v1970_v8  ;;  %v5827_v19 = vpack.c.bf16 %v1976_v11, %v1972_v9 }
 0x217   : > { %v2099_v20 = vpack.c.bf16 %v1975_v16, %v1971_v14  ;;  %v5829_v21 = vpack.c.bf16 %v1977_v17, %v1973_v15  ;;  %v5126_v14 = vld [vmem:[#allocation7 + $0x280] ss:$16 sps:$4 sm:$0xff]   ;;  %v5129_v15 = vld [vmem:[#allocation7 + $0x288] ss:$16 sps:$4 sm:$0xff]   ;;  %v5134_v16 = vld [vmem:[#allocation7 + $0x2a4] ss:$16 sps:$4 sm:$0xff]  }
 0x218   : > { %v5137_v17 = vld [vmem:[#allocation7 + $0x2ac] ss:$16 sps:$4 sm:$0xff]  }
 0x219   : > { %v1435_v26 = vpop.f32.mrb[4].mxu0  ;;  %v1821_v27 = vpop.f32.mrb[4].mxu1  ;;  %2962 = vmatprep.mubr.bf16.mxu0 %v2099_v20  ;;  %3348 = vmatprep.mubr.bf16.mxu1 %v2099_v20 }
 0x21a   : > { %v1437_v28 = vpop.f32.mrb[5].mxu0  ;;  %v1823_v29 = vpop.f32.mrb[5].mxu1  ;;  %2963 = vmatmul.mubr.bf16.vlgmr.msra.gmra.mrb[64].mxu0 %v2098_v18  ;;  %3349 = vmatmul.mubr.bf16.vlgmr.msra.gmra.mrb[64].mxu1 %v2098_v18  ;;  %v1978_v36 = vmax.f32 %v1435_v26, 0.0  ;;  %v1980_v37 = vmax.f32 %v1821_v27, 0.0 }
 0x21b   : > { %v1439_v32 = vpop.f32.mrb[6].mxu0  ;;  %v1825_v33 = vpop.f32.mrb[6].mxu1  ;;  %3124 = vmatpush1.bf16.msra.mxu0 %v5102_v22  ;;  %3510 = vmatpush1.bf16.msra.mxu1 %v5105_v23  ;;  %v1979_v42 = vmax.f32 %v1437_v28, 0.0  ;;  %v1981_v43 = vmax.f32 %v1823_v29, 0.0  ;;  %v5140_v28 = vld [vmem:[#allocation7 + $0x2c4] ss:$16 sps:$4 sm:$0xff]  }
 0x21c   : > { %v1982_v38 = vmax.f32 %v1439_v32, 0.0  ;;  %v1984_v39 = vmax.f32 %v1825_v33, 0.0  ;;  %v1441_v40 = vpop.f32.mrb[7].mxu0  ;;  %v1827_v41 = vpop.f32.mrb[7].mxu1  ;;  %3125 = vmatprep.subr.bf16.mxu0 %v5110_v24  ;;  %3511 = vmatprep.subr.bf16.mxu1 %v5113_v25  ;;  %v5132_v24 = vld [vmem:[#allocation7 + $0x2a0] ss:$16 sps:$4 sm:$0xff]  }
 0x21d   : > { %v1983_v44 = vmax.f32 %v1441_v40, 0.0  ;;  %v1985_v45 = vmax.f32 %v1827_v41, 0.0  ;;  %v5135_v25 = vld [vmem:[#allocation7 + $0x2a8] ss:$16 sps:$4 sm:$0xff]   ;;  %v5143_v29 = vld [vmem:[#allocation7 + $0x2cc] ss:$16 sps:$4 sm:$0xff]  }
 0x21e   : > { %v2102_v46 = vpack.c.bf16 %v1982_v38, %v1978_v36  ;;  %v5831_v47 = vpack.c.bf16 %v1984_v39, %v1980_v37 }
 0x21f   : > { %v2103_v48 = vpack.c.bf16 %v1983_v44, %v1979_v42  ;;  %v5833_v49 = vpack.c.bf16 %v1985_v45, %v1981_v43  ;;  %3126 = vmatpush1.bf16.msra.mxu0 %v5108_v30  ;;  %3512 = vmatpush1.bf16.msra.mxu1 %v5111_v31  ;;  %v5138_v44 = vld [vmem:[#allocation7 + $0x2c0] ss:$16 sps:$4 sm:$0xff]   ;;  %v5141_v45 = vld [vmem:[#allocation7 + $0x2c8] ss:$16 sps:$4 sm:$0xff]  }
 0x220   : > { %3127 = vmatprep.subr.bf16.mxu0 %v5116_v34  ;;  %3513 = vmatprep.subr.bf16.mxu1 %v5119_v35 }
 0x221   : > { %v1445_v54 = vpop.f32.mrb[8].mxu0  ;;  %v1831_v55 = vpop.f32.mrb[8].mxu1  ;;  %2972 = vmatprep.mubr.bf16.mxu0 %v2103_v48  ;;  %3358 = vmatprep.mubr.bf16.mxu1 %v2103_v48  ;;  %v5149_v48 = vld [vmem:[#allocation7 + $0x2ec] ss:$16 sps:$4 sm:$0xff]  }
 0x222   : > { %v1447_v56 = vpop.f32.mrb[9].mxu0  ;;  %v1833_v57 = vpop.f32.mrb[9].mxu1  ;;  %2973 = vmatmul.mubr.bf16.gmra.mrb[68].mxu0 %v2102_v46  ;;  %3359 = vmatmul.mubr.bf16.gmra.mrb[68].mxu1 %v2102_v46  ;;  %v1986_v0 = vmax.f32 %v1445_v54, 0.0  ;;  %v1988_v1 = vmax.f32 %v1831_v55, 0.0  ;;  %v5146_v46 = vld [vmem:[#allocation7 + $0x2e4] ss:$16 sps:$4 sm:$0xff]  }
 0x223   : > { %v1449_v60 = vpop.f32.mrb[10].mxu0  ;;  %v1835_v61 = vpop.f32.mrb[10].mxu1  ;;  %3128 = vmatpush1.bf16.msra.mxu0 %v5114_v50  ;;  %3514 = vmatpush1.bf16.msra.mxu1 %v5117_v51  ;;  %v1987_v6 = vmax.f32 %v1447_v56, 0.0  ;;  %v1989_v7 = vmax.f32 %v1833_v57, 0.0  ;;  %v5144_v54 = vld [vmem:[#allocation7 + $0x2e0] ss:$16 sps:$4 sm:$0xff]  }
 0x224   : > { %v1990_v2 = vmax.f32 %v1449_v60, 0.0  ;;  %v1992_v3 = vmax.f32 %v1835_v61, 0.0  ;;  %v1451_v4 = vpop.f32.mrb[11].mxu0  ;;  %v1837_v5 = vpop.f32.mrb[11].mxu1  ;;  %3129 = vmatprep.subr.bf16.mxu0 %v5122_v52  ;;  %3515 = vmatprep.subr.bf16.mxu1 %v5125_v53  ;;  %v5147_v55 = vld [vmem:[#allocation7 + $0x2e8] ss:$16 sps:$4 sm:$0xff]  }
 0x225   : > { %v1991_v8 = vmax.f32 %v1451_v4, 0.0  ;;  %v1993_v9 = vmax.f32 %v1837_v5, 0.0 }
 0x226   : > { %v2106_v10 = vpack.c.bf16 %v1990_v2, %v1986_v0  ;;  %v5835_v11 = vpack.c.bf16 %v1992_v3, %v1988_v1 }
 0x227   : > { %v2107_v12 = vpack.c.bf16 %v1991_v8, %v1987_v6  ;;  %v5837_v13 = vpack.c.bf16 %v1993_v9, %v1989_v7  ;;  %3130 = vmatpush1.bf16.msra.mxu0 %v5120_v58  ;;  %3516 = vmatpush1.bf16.msra.mxu1 %v5123_v59  ;;  %v5152_v58 = vld [vmem:[#allocation7 + $0x304] ss:$16 sps:$4 sm:$0xff]   ;;  %v5155_v59 = vld [vmem:[#allocation7 + $0x30c] ss:$16 sps:$4 sm:$0xff]  }
 0x228   : > { %3131 = vmatprep.subr.bf16.mxu0 %v5128_v62  ;;  %3517 = vmatprep.subr.bf16.mxu1 %v5131_v63 }
 0x229   : > { %v1455_v18 = vpop.f32.mrb[12].mxu0  ;;  %v1841_v20 = vpop.f32.mrb[12].mxu1  ;;  %2982 = vmatprep.mubr.bf16.mxu0 %v2107_v12  ;;  %3368 = vmatprep.mubr.bf16.mxu1 %v2107_v12  ;;  %v5153_v12 = vld [vmem:[#allocation7 + $0x308] ss:$16 sps:$4 sm:$0xff]  }
 0x22a   : > { %v1457_v22 = vpop.f32.mrb[13].mxu0  ;;  %v1843_v23 = vpop.f32.mrb[13].mxu1  ;;  %2983 = vmatmul.mubr.bf16.gmra.mrb[72].mxu0 %v2106_v10  ;;  %3369 = vmatmul.mubr.bf16.gmra.mrb[72].mxu1 %v2106_v10  ;;  %v1994_v30 = vmax.f32 %v1455_v18, 0.0  ;;  %v1996_v31 = vmax.f32 %v1841_v20, 0.0  ;;  %v5150_v10 = vld [vmem:[#allocation7 + $0x300] ss:$16 sps:$4 sm:$0xff]  }
 0x22b   : > { %v1459_v26 = vpop.f32.mrb[14].mxu0  ;;  %v1845_v27 = vpop.f32.mrb[14].mxu1  ;;  %3132 = vmatpush1.bf16.msra.mxu0 %v5126_v14  ;;  %3518 = vmatpush1.bf16.msra.mxu1 %v5129_v15  ;;  %v1995_v36 = vmax.f32 %v1457_v22, 0.0  ;;  %v1997_v37 = vmax.f32 %v1843_v23, 0.0  ;;  %v5158_v14 = vld [vmem:[#allocation7 + $0x324] ss:$16 sps:$4 sm:$0xff]  }
 0x22c   : > { %v1998_v32 = vmax.f32 %v1459_v26, 0.0  ;;  %v2000_v33 = vmax.f32 %v1845_v27, 0.0  ;;  %v1461_v34 = vpop.f32.mrb[15].mxu0  ;;  %v1847_v35 = vpop.f32.mrb[15].mxu1  ;;  %3133 = vmatprep.subr.bf16.mxu0 %v5134_v16  ;;  %3519 = vmatprep.subr.bf16.mxu1 %v5137_v17  ;;  %v5161_v15 = vld [vmem:[#allocation7 + $0x32c] ss:$16 sps:$4 sm:$0xff]  }
 0x22d   : > { %v1999_v38 = vmax.f32 %v1461_v34, 0.0  ;;  %v2001_v39 = vmax.f32 %v1847_v35, 0.0  ;;  %v5156_v22 = vld [vmem:[#allocation7 + $0x320] ss:$16 sps:$4 sm:$0xff]   ;;  %v5159_v23 = vld [vmem:[#allocation7 + $0x328] ss:$16 sps:$4 sm:$0xff]  }
 0x22e   : > { %v2110_v40 = vpack.c.bf16 %v1998_v32, %v1994_v30  ;;  %v5839_v41 = vpack.c.bf16 %v2000_v33, %v1996_v31  ;;  %v5164_v26 = vld [vmem:[#allocation7 + $0x344] ss:$16 sps:$4 sm:$0xff]   ;;  %v5167_v27 = vld [vmem:[#allocation7 + $0x34c] ss:$16 sps:$4 sm:$0xff]  }
 0x22f   : > { %v2111_v42 = vpack.c.bf16 %v1999_v38, %v1995_v36  ;;  %v5841_v43 = vpack.c.bf16 %v2001_v39, %v1997_v37  ;;  %3134 = vmatpush1.bf16.msra.mxu0 %v5132_v24  ;;  %3520 = vmatpush1.bf16.msra.mxu1 %v5135_v25 }
 0x230   : > { %3135 = vmatprep.subr.bf16.mxu0 %v5140_v28  ;;  %3521 = vmatprep.subr.bf16.mxu1 %v5143_v29 }
 0x231   : > { %v1465_v50 = vpop.f32.mrb[16].mxu0  ;;  %v1851_v51 = vpop.f32.mrb[16].mxu1  ;;  %2992 = vmatprep.mubr.bf16.mxu0 %v2111_v42  ;;  %3378 = vmatprep.mubr.bf16.mxu1 %v2111_v42 }
 0x232   : > { %v1467_v52 = vpop.f32.mrb[17].mxu0  ;;  %v1853_v53 = vpop.f32.mrb[17].mxu1  ;;  %2993 = vmatmul.mubr.bf16.gmra.mrb[76].mxu0 %v2110_v40  ;;  %3379 = vmatmul.mubr.bf16.gmra.mrb[76].mxu1 %v2110_v40  ;;  %v2002_v60 = vmax.f32 %v1465_v50, 0.0  ;;  %v2004_v61 = vmax.f32 %v1851_v51, 0.0 }
 0x233   : > { %v1469_v56 = vpop.f32.mrb[18].mxu0  ;;  %v1855_v57 = vpop.f32.mrb[18].mxu1  ;;  %3136 = vmatpush1.bf16.msra.mxu0 %v5138_v44  ;;  %3522 = vmatpush1.bf16.msra.mxu1 %v5141_v45  ;;  %v2003_v2 = vmax.f32 %v1467_v52, 0.0  ;;  %v2005_v3 = vmax.f32 %v1853_v53, 0.0  ;;  %v5162_v44 = vld [vmem:[#allocation7 + $0x340] ss:$16 sps:$4 sm:$0xff]  }
 0x234   : > { %v2006_v62 = vmax.f32 %v1469_v56, 0.0  ;;  %v2008_v63 = vmax.f32 %v1855_v57, 0.0  ;;  %v1471_v0 = vpop.f32.mrb[19].mxu0  ;;  %v1857_v1 = vpop.f32.mrb[19].mxu1  ;;  %3137 = vmatprep.subr.bf16.mxu0 %v5146_v46  ;;  %3523 = vmatprep.subr.bf16.mxu1 %v5149_v48  ;;  %v5165_v45 = vld [vmem:[#allocation7 + $0x348] ss:$16 sps:$4 sm:$0xff]  }
 0x235   : > { %v2007_v4 = vmax.f32 %v1471_v0, 0.0  ;;  %v2009_v5 = vmax.f32 %v1857_v1, 0.0  ;;  %v5170_v46 = vld [vmem:[#allocation7 + $0x364] ss:$16 sps:$4 sm:$0xff]   ;;  %v5173_v48 = vld [vmem:[#allocation7 + $0x36c] ss:$16 sps:$4 sm:$0xff]  }
 0x236   : > { %v2114_v6 = vpack.c.bf16 %v2006_v62, %v2002_v60  ;;  %v5843_v7 = vpack.c.bf16 %v2008_v63, %v2004_v61 }
 0x237   : > { %v2115_v8 = vpack.c.bf16 %v2007_v4, %v2003_v2  ;;  %v5845_v9 = vpack.c.bf16 %v2009_v5, %v2005_v3  ;;  %3138 = vmatpush1.bf16.msra.mxu0 %v5144_v54  ;;  %3524 = vmatpush1.bf16.msra.mxu1 %v5147_v55  ;;  %v5168_v54 = vld [vmem:[#allocation7 + $0x360] ss:$16 sps:$4 sm:$0xff]   ;;  %v5171_v55 = vld [vmem:[#allocation7 + $0x368] ss:$16 sps:$4 sm:$0xff]  }
 0x238   : > { %3139 = vmatprep.subr.bf16.mxu0 %v5152_v58  ;;  %3525 = vmatprep.subr.bf16.mxu1 %v5155_v59  ;;  %v5176_v58 = vld [vmem:[#allocation7 + $0x384] ss:$16 sps:$4 sm:$0xff]   ;;  %v5179_v59 = vld [vmem:[#allocation7 + $0x38c] ss:$16 sps:$4 sm:$0xff]  }
 0x239   : > { %v1475_v16 = vpop.f32.mrb[20].mxu0  ;;  %v1861_v17 = vpop.f32.mrb[20].mxu1  ;;  %3002 = vmatprep.mubr.bf16.mxu0 %v2115_v8  ;;  %3388 = vmatprep.mubr.bf16.mxu1 %v2115_v8 }
 0x23a   : > { %v1477_v18 = vpop.f32.mrb[21].mxu0  ;;  %v1863_v20 = vpop.f32.mrb[21].mxu1  ;;  %3003 = vmatmul.mubr.bf16.gmra.mrb[80].mxu0 %v2114_v6  ;;  %3389 = vmatmul.mubr.bf16.gmra.mrb[80].mxu1 %v2114_v6  ;;  %v2010_v28 = vmax.f32 %v1475_v16, 0.0  ;;  %v2012_v29 = vmax.f32 %v1861_v17, 0.0  ;;  %v5182_v16 = vld [vmem:[#allocation7 + $0x3a4] ss:$16 sps:$4 sm:$0xff]  }
 0x23b   : > { %v1479_v24 = vpop.f32.mrb[22].mxu0  ;;  %v1865_v25 = vpop.f32.mrb[22].mxu1  ;;  %3140 = vmatpush1.bf16.msra.mxu0 %v5150_v10  ;;  %3526 = vmatpush1.bf16.msra.mxu1 %v5153_v12  ;;  %v2011_v34 = vmax.f32 %v1477_v18, 0.0  ;;  %v2013_v35 = vmax.f32 %v1863_v20, 0.0  ;;  %v5185_v17 = vld [vmem:[#allocation7 + $0x3ac] ss:$16 sps:$4 sm:$0xff]  }
 0x23c   : > { %v2014_v30 = vmax.f32 %v1479_v24, 0.0  ;;  %v2016_v31 = vmax.f32 %v1865_v25, 0.0  ;;  %v1481_v32 = vpop.f32.mrb[23].mxu0  ;;  %v1867_v33 = vpop.f32.mrb[23].mxu1  ;;  %3141 = vmatprep.subr.bf16.mxu0 %v5158_v14  ;;  %3527 = vmatprep.subr.bf16.mxu1 %v5161_v15  ;;  %v5174_v14 = vld [vmem:[#allocation7 + $0x380] ss:$16 sps:$4 sm:$0xff]  }
 0x23d   : > { %v2015_v36 = vmax.f32 %v1481_v32, 0.0  ;;  %v2017_v37 = vmax.f32 %v1867_v33, 0.0  ;;  %v5177_v15 = vld [vmem:[#allocation7 + $0x388] ss:$16 sps:$4 sm:$0xff]   ;;  %v5180_v24 = vld [vmem:[#allocation7 + $0x3a0] ss:$16 sps:$4 sm:$0xff]  }
 0x23e   : > { %v2118_v38 = vpack.c.bf16 %v2014_v30, %v2010_v28  ;;  %v5847_v39 = vpack.c.bf16 %v2016_v31, %v2012_v29  ;;  %v5183_v25 = vld [vmem:[#allocation7 + $0x3a8] ss:$16 sps:$4 sm:$0xff]   ;;  %v5188_v28 = vld [vmem:[#allocation7 + $0x3c4] ss:$16 sps:$4 sm:$0xff]   ;;  %v5191_v29 = vld [vmem:[#allocation7 + $0x3cc] ss:$16 sps:$4 sm:$0xff]  }
 0x23f   : > { %v2119_v40 = vpack.c.bf16 %v2015_v36, %v2011_v34  ;;  %v5849_v42 = vpack.c.bf16 %v2017_v37, %v2013_v35  ;;  %3142 = vmatpush1.bf16.msra.mxu0 %v5156_v22  ;;  %3528 = vmatpush1.bf16.msra.mxu1 %v5159_v23 }
 0x240   : > { %3143 = vmatprep.subr.bf16.mxu0 %v5164_v26  ;;  %3529 = vmatprep.subr.bf16.mxu1 %v5167_v27 }
 0x241   : > { %v1485_v50 = vpop.f32.mrb[24].mxu0  ;;  %v1871_v51 = vpop.f32.mrb[24].mxu1  ;;  %3012 = vmatprep.mubr.bf16.mxu0 %v2119_v40  ;;  %3398 = vmatprep.mubr.bf16.mxu1 %v2119_v40 }
 0x242   : > { %v1487_v52 = vpop.f32.mrb[25].mxu0  ;;  %v1873_v53 = vpop.f32.mrb[25].mxu1  ;;  %3013 = vmatmul.mubr.bf16.gmra.mrb[84].mxu0 %v2118_v38  ;;  %3399 = vmatmul.mubr.bf16.gmra.mrb[84].mxu1 %v2118_v38  ;;  %v2018_v60 = vmax.f32 %v1485_v50, 0.0  ;;  %v2020_v61 = vmax.f32 %v1871_v51, 0.0  ;;  %v5186_v50 = vld [vmem:[#allocation7 + $0x3c0] ss:$16 sps:$4 sm:$0xff]  }
 0x243   : > { %v1489_v56 = vpop.f32.mrb[26].mxu0  ;;  %v1875_v57 = vpop.f32.mrb[26].mxu1  ;;  %3144 = vmatpush1.bf16.msra.mxu0 %v5162_v44  ;;  %3530 = vmatpush1.bf16.msra.mxu1 %v5165_v45  ;;  %v2019_v2 = vmax.f32 %v1487_v52, 0.0  ;;  %v2021_v3 = vmax.f32 %v1873_v53, 0.0  ;;  %v5189_v51 = vld [vmem:[#allocation7 + $0x3c8] ss:$16 sps:$4 sm:$0xff]  }
 0x244   : > { %v2022_v62 = vmax.f32 %v1489_v56, 0.0  ;;  %v2024_v63 = vmax.f32 %v1875_v57, 0.0  ;;  %v1491_v0 = vpop.f32.mrb[27].mxu0  ;;  %v1877_v1 = vpop.f32.mrb[27].mxu1  ;;  %3145 = vmatprep.subr.bf16.mxu0 %v5170_v46  ;;  %3531 = vmatprep.subr.bf16.mxu1 %v5173_v48  ;;  %v5194_v52 = vld [vmem:[#allocation7 + $0x3e4] ss:$16 sps:$4 sm:$0xff]  }
 0x245   : > { %v2023_v4 = vmax.f32 %v1491_v0, 0.0  ;;  %v2025_v5 = vmax.f32 %v1877_v1, 0.0  ;;  %v5197_v53 = vld [vmem:[#allocation7 + $0x3ec] ss:$16 sps:$4 sm:$0xff]  }
 0x246   : > { %v2122_v6 = vpack.c.bf16 %v2022_v62, %v2018_v60  ;;  %v5851_v8 = vpack.c.bf16 %v2024_v63, %v2020_v61  ;;  %v5192_v60 = vld [vmem:[#allocation7 + $0x3e0] ss:$16 sps:$4 sm:$0xff]   ;;  %v5195_v61 = vld [vmem:[#allocation7 + $0x3e8] ss:$16 sps:$4 sm:$0xff]  }
 0x247   : > { %v2123_v10 = vpack.c.bf16 %v2023_v4, %v2019_v2  ;;  %v5853_v12 = vpack.c.bf16 %v2025_v5, %v2021_v3  ;;  %3146 = vmatpush1.bf16.msra.mxu0 %v5168_v54  ;;  %3532 = vmatpush1.bf16.msra.mxu1 %v5171_v55 }
 0x248   : > { %3147 = vmatprep.subr.bf16.mxu0 %v5176_v58  ;;  %3533 = vmatprep.subr.bf16.mxu1 %v5179_v59 }
 0x249   : > { %v1495_v18 = vpop.f32.mrb[28].mxu0  ;;  %v1881_v20 = vpop.f32.mrb[28].mxu1  ;;  %3022 = vmatprep.mubr.bf16.mxu0 %v2123_v10  ;;  %3408 = vmatprep.mubr.bf16.mxu1 %v2123_v10 }
 0x24a   : > { %v1497_v22 = vpop.f32.mrb[29].mxu0  ;;  %v1883_v23 = vpop.f32.mrb[29].mxu1  ;;  %3023 = vmatmul.mubr.bf16.gmra.mrb[88].mxu0 %v2122_v6  ;;  %3409 = vmatmul.mubr.bf16.gmra.mrb[88].mxu1 %v2122_v6  ;;  %v2026_v30 = vmax.f32 %v1495_v18, 0.0  ;;  %v2028_v31 = vmax.f32 %v1881_v20, 0.0 }
 0x24b   : > { %v1499_v26 = vpop.f32.mrb[30].mxu0  ;;  %v1885_v27 = vpop.f32.mrb[30].mxu1  ;;  %3148 = vmatpush1.bf16.msra.mxu0 %v5174_v14  ;;  %3534 = vmatpush1.bf16.msra.mxu1 %v5177_v15  ;;  %v2027_v36 = vmax.f32 %v1497_v22, 0.0  ;;  %v2029_v37 = vmax.f32 %v1883_v23, 0.0 }
 0x24c   : > { %v2030_v32 = vmax.f32 %v1499_v26, 0.0  ;;  %v2032_v33 = vmax.f32 %v1885_v27, 0.0  ;;  %v1501_v34 = vpop.f32.mrb[31].mxu0  ;;  %v1887_v35 = vpop.f32.mrb[31].mxu1  ;;  %3149 = vmatprep.subr.bf16.mxu0 %v5182_v16  ;;  %3535 = vmatprep.subr.bf16.mxu1 %v5185_v17 }
 0x24d   : > { %v2031_v38 = vmax.f32 %v1501_v34, 0.0  ;;  %v2033_v40 = vmax.f32 %v1887_v35, 0.0 }
 0x24e   : > { %v2126_v44 = vpack.c.bf16 %v2030_v32, %v2026_v30  ;;  %v5855_v45 = vpack.c.bf16 %v2032_v33, %v2028_v31 }
 0x24f   : > { %v2127_v46 = vpack.c.bf16 %v2031_v38, %v2027_v36  ;;  %v5857_v48 = vpack.c.bf16 %v2033_v40, %v2029_v37  ;;  %3150 = vmatpush1.bf16.msra.mxu0 %v5180_v24  ;;  %3536 = vmatpush1.bf16.msra.mxu1 %v5183_v25 }
 0x250   : > { %3151 = vmatprep.subr.bf16.mxu0 %v5188_v28  ;;  %3537 = vmatprep.subr.bf16.mxu1 %v5191_v29 }
 0x251   : > { %v1505_v54 = vpop.f32.mrb[32].mxu0  ;;  %v1891_v55 = vpop.f32.mrb[32].mxu1  ;;  %3032 = vmatprep.mubr.bf16.mxu0 %v2127_v46  ;;  %3418 = vmatprep.mubr.bf16.mxu1 %v2127_v46 }
 0x252   : > { %v1507_v56 = vpop.f32.mrb[33].mxu0  ;;  %v1893_v57 = vpop.f32.mrb[33].mxu1  ;;  %3033 = vmatmul.mubr.bf16.gmra.mrb[92].mxu0 %v2126_v44  ;;  %3419 = vmatmul.mubr.bf16.gmra.mrb[92].mxu1 %v2126_v44  ;;  %v2034_v62 = vmax.f32 %v1505_v54, 0.0  ;;  %v2036_v63 = vmax.f32 %v1891_v55, 0.0 }
 0x253   : > { %v1509_v58 = vpop.f32.mrb[34].mxu0  ;;  %v1895_v59 = vpop.f32.mrb[34].mxu1  ;;  %3152 = vmatpush1.bf16.msra.mxu0 %v5186_v50  ;;  %3538 = vmatpush1.bf16.msra.mxu1 %v5189_v51  ;;  %v2035_v4 = vmax.f32 %v1507_v56, 0.0  ;;  %v2037_v5 = vmax.f32 %v1893_v57, 0.0 }
 0x254   : > { %v2038_v0 = vmax.f32 %v1509_v58, 0.0  ;;  %v2040_v1 = vmax.f32 %v1895_v59, 0.0  ;;  %v1511_v2 = vpop.f32.mrb[35].mxu0  ;;  %v1897_v3 = vpop.f32.mrb[35].mxu1  ;;  %3153 = vmatprep.subr.bf16.mxu0 %v5194_v52  ;;  %3539 = vmatprep.subr.bf16.mxu1 %v5197_v53 }
 0x255   : > { %v2039_v6 = vmax.f32 %v1511_v2, 0.0  ;;  %v2041_v10 = vmax.f32 %v1897_v3, 0.0 }
 0x256   : > { %v2130_v14 = vpack.c.bf16 %v2038_v0, %v2034_v62  ;;  %v5859_v15 = vpack.c.bf16 %v2040_v1, %v2036_v63 }
 0x257   : > { %v2131_v16 = vpack.c.bf16 %v2039_v6, %v2035_v4  ;;  %v5861_v17 = vpack.c.bf16 %v2041_v10, %v2037_v5  ;;  %3154 = vmatpush1.bf16.msra.mxu0 %v5192_v60  ;;  %3540 = vmatpush1.bf16.msra.mxu1 %v5195_v61 }
 0x259   : > { %v1515_v18 = vpop.f32.mrb[36].mxu0  ;;  %v1901_v20 = vpop.f32.mrb[36].mxu1  ;;  %3042 = vmatprep.mubr.bf16.mxu0 %v2131_v16  ;;  %3428 = vmatprep.mubr.bf16.mxu1 %v2131_v16 }
 0x25a   : > { %v1517_v22 = vpop.f32.mrb[37].mxu0  ;;  %v1903_v23 = vpop.f32.mrb[37].mxu1  ;;  %3043 = vmatmul.mubr.bf16.gmra.mrb[96].mxu0 %v2130_v14  ;;  %3429 = vmatmul.mubr.bf16.gmra.mrb[96].mxu1 %v2130_v14  ;;  %v2042_v26 = vmax.f32 %v1515_v18, 0.0  ;;  %v2044_v27 = vmax.f32 %v1901_v20, 0.0 }
 0x25b   : > { %v1519_v24 = vpop.f32.mrb[38].mxu0  ;;  %v1905_v25 = vpop.f32.mrb[38].mxu1  ;;  %v2043_v32 = vmax.f32 %v1517_v22, 0.0  ;;  %v2045_v33 = vmax.f32 %v1903_v23, 0.0 }
 0x25c   : > { %v2046_v28 = vmax.f32 %v1519_v24, 0.0  ;;  %v2048_v29 = vmax.f32 %v1905_v25, 0.0  ;;  %v1521_v30 = vpop.f32.mrb[39].mxu0  ;;  %v1907_v31 = vpop.f32.mrb[39].mxu1 }
 0x25d   : > { %v2047_v34 = vmax.f32 %v1521_v30, 0.0  ;;  %v2049_v35 = vmax.f32 %v1907_v31, 0.0 }
 0x25e   : > { %v2134_v36 = vpack.c.bf16 %v2046_v28, %v2042_v26  ;;  %v5863_v37 = vpack.c.bf16 %v2048_v29, %v2044_v27 }
 0x25f   : > { %v2135_v38 = vpack.c.bf16 %v2047_v34, %v2043_v32  ;;  %v5865_v40 = vpack.c.bf16 %v2049_v35, %v2045_v33 }
 0x261   : > { %v1525_v44 = vpop.f32.mrb[40].mxu0  ;;  %v1911_v46 = vpop.f32.mrb[40].mxu1  ;;  %3052 = vmatprep.mubr.bf16.mxu0 %v2135_v38  ;;  %3438 = vmatprep.mubr.bf16.mxu1 %v2135_v38 }
 0x262   : > { %v1527_v50 = vpop.f32.mrb[41].mxu0  ;;  %v1913_v51 = vpop.f32.mrb[41].mxu1  ;;  %3053 = vmatmul.mubr.bf16.gmra.mrb[100].mxu0 %v2134_v36  ;;  %3439 = vmatmul.mubr.bf16.gmra.mrb[100].mxu1 %v2134_v36  ;;  %v2050_v54 = vmax.f32 %v1525_v44, 0.0  ;;  %v2052_v55 = vmax.f32 %v1911_v46, 0.0 }
 0x263   : > { %v1529_v52 = vpop.f32.mrb[42].mxu0  ;;  %v1915_v53 = vpop.f32.mrb[42].mxu1  ;;  %v2051_v60 = vmax.f32 %v1527_v50, 0.0  ;;  %v2053_v61 = vmax.f32 %v1913_v51, 0.0 }
 0x264   : > { %v2054_v56 = vmax.f32 %v1529_v52, 0.0  ;;  %v2056_v57 = vmax.f32 %v1915_v53, 0.0  ;;  %v1531_v58 = vpop.f32.mrb[43].mxu0  ;;  %v1917_v59 = vpop.f32.mrb[43].mxu1 }
 0x265   : > { %v2055_v62 = vmax.f32 %v1531_v58, 0.0  ;;  %v2057_v63 = vmax.f32 %v1917_v59, 0.0 }
 0x266   : > { %v2138_v0 = vpack.c.bf16 %v2054_v56, %v2050_v54  ;;  %v5867_v1 = vpack.c.bf16 %v2056_v57, %v2052_v55 }
 0x267   : > { %v2139_v2 = vpack.c.bf16 %v2055_v62, %v2051_v60  ;;  %v5869_v3 = vpack.c.bf16 %v2057_v63, %v2053_v61 }
 0x269   : > { %v1535_v4 = vpop.f32.mrb[44].mxu0  ;;  %v1921_v5 = vpop.f32.mrb[44].mxu1  ;;  %3062 = vmatprep.mubr.bf16.mxu0 %v2139_v2  ;;  %3448 = vmatprep.mubr.bf16.mxu1 %v2139_v2 }
 0x26a   : > { %v1537_v6 = vpop.f32.mrb[45].mxu0  ;;  %v1923_v10 = vpop.f32.mrb[45].mxu1  ;;  %3063 = vmatmul.mubr.bf16.gmra.mrb[104].mxu0 %v2138_v0  ;;  %3449 = vmatmul.mubr.bf16.gmra.mrb[104].mxu1 %v2138_v0  ;;  %v2058_v18 = vmax.f32 %v1535_v4, 0.0  ;;  %v2060_v20 = vmax.f32 %v1921_v5, 0.0 }
 0x26b   : > { %v1539_v14 = vpop.f32.mrb[46].mxu0  ;;  %v1925_v16 = vpop.f32.mrb[46].mxu1  ;;  %v2059_v26 = vmax.f32 %v1537_v6, 0.0  ;;  %v2061_v27 = vmax.f32 %v1923_v10, 0.0 }
 0x26c   : > { %v2062_v22 = vmax.f32 %v1539_v14, 0.0  ;;  %v2064_v23 = vmax.f32 %v1925_v16, 0.0  ;;  %v1541_v24 = vpop.f32.mrb[47].mxu0  ;;  %v1927_v25 = vpop.f32.mrb[47].mxu1 }
 0x26d   : > { %v2063_v28 = vmax.f32 %v1541_v24, 0.0  ;;  %v2065_v29 = vmax.f32 %v1927_v25, 0.0 }
 0x26e   : > { %v2142_v30 = vpack.c.bf16 %v2062_v22, %v2058_v18  ;;  %v5871_v31 = vpack.c.bf16 %v2064_v23, %v2060_v20 }
 0x26f   : > { %v2143_v32 = vpack.c.bf16 %v2063_v28, %v2059_v26  ;;  %v5873_v33 = vpack.c.bf16 %v2065_v29, %v2061_v27 }
 0x271   : > { %v1545_v34 = vpop.f32.mrb[48].mxu0  ;;  %v1931_v35 = vpop.f32.mrb[48].mxu1  ;;  %3072 = vmatprep.mubr.bf16.mxu0 %v2143_v32  ;;  %3458 = vmatprep.mubr.bf16.mxu1 %v2143_v32 }
 0x272   : > { %v1547_v36 = vpop.f32.mrb[49].mxu0  ;;  %v1933_v38 = vpop.f32.mrb[49].mxu1  ;;  %3073 = vmatmul.mubr.bf16.gmra.mrb[108].mxu0 %v2142_v30  ;;  %3459 = vmatmul.mubr.bf16.gmra.mrb[108].mxu1 %v2142_v30  ;;  %v2066_v50 = vmax.f32 %v1545_v34, 0.0  ;;  %v2068_v51 = vmax.f32 %v1931_v35, 0.0 }
 0x273   : > { %v1549_v44 = vpop.f32.mrb[50].mxu0  ;;  %v1935_v46 = vpop.f32.mrb[50].mxu1  ;;  %v2067_v56 = vmax.f32 %v1547_v36, 0.0  ;;  %v2069_v57 = vmax.f32 %v1933_v38, 0.0 }
 0x274   : > { %v2070_v52 = vmax.f32 %v1549_v44, 0.0  ;;  %v2072_v53 = vmax.f32 %v1935_v46, 0.0  ;;  %v1551_v54 = vpop.f32.mrb[51].mxu0  ;;  %v1937_v55 = vpop.f32.mrb[51].mxu1 }
 0x275   : > { %v2071_v58 = vmax.f32 %v1551_v54, 0.0  ;;  %v2073_v59 = vmax.f32 %v1937_v55, 0.0 }
 0x276   : > { %v2146_v60 = vpack.c.bf16 %v2070_v52, %v2066_v50  ;;  %v5875_v61 = vpack.c.bf16 %v2072_v53, %v2068_v51 }
 0x277   : > { %v2147_v62 = vpack.c.bf16 %v2071_v58, %v2067_v56  ;;  %v5877_v63 = vpack.c.bf16 %v2073_v59, %v2069_v57 }
 0x279   : > { %v1555_v0 = vpop.f32.mrb[52].mxu0  ;;  %v1941_v2 = vpop.f32.mrb[52].mxu1  ;;  %3082 = vmatprep.mubr.bf16.mxu0 %v2147_v62  ;;  %3468 = vmatprep.mubr.bf16.mxu1 %v2147_v62 }
 0x27a   : > { %v1557_v4 = vpop.f32.mrb[53].mxu0  ;;  %v1943_v5 = vpop.f32.mrb[53].mxu1  ;;  %3083 = vmatmul.mubr.bf16.gmra.mrb[112].mxu0 %v2146_v60  ;;  %3469 = vmatmul.mubr.bf16.gmra.mrb[112].mxu1 %v2146_v60  ;;  %v2074_v14 = vmax.f32 %v1555_v0, 0.0  ;;  %v2076_v16 = vmax.f32 %v1941_v2, 0.0 }
 0x27b   : > { %v1559_v6 = vpop.f32.mrb[54].mxu0  ;;  %v1945_v10 = vpop.f32.mrb[54].mxu1  ;;  %v2075_v24 = vmax.f32 %v1557_v4, 0.0  ;;  %v2077_v25 = vmax.f32 %v1943_v5, 0.0 }
 0x27c   : > { %v2078_v18 = vmax.f32 %v1559_v6, 0.0  ;;  %v2080_v20 = vmax.f32 %v1945_v10, 0.0  ;;  %v1561_v22 = vpop.f32.mrb[55].mxu0  ;;  %v1947_v23 = vpop.f32.mrb[55].mxu1 }
 0x27d   : > { %v2079_v26 = vmax.f32 %v1561_v22, 0.0  ;;  %v2081_v27 = vmax.f32 %v1947_v23, 0.0 }
 0x27e   : > { %v2150_v28 = vpack.c.bf16 %v2078_v18, %v2074_v14  ;;  %v5879_v29 = vpack.c.bf16 %v2080_v20, %v2076_v16 }
 0x27f   : > { %v2151_v30 = vpack.c.bf16 %v2079_v26, %v2075_v24  ;;  %v5881_v32 = vpack.c.bf16 %v2081_v27, %v2077_v25 }
 0x281   : > { %v1565_v34 = vpop.f32.mrb[56].mxu0  ;;  %v1951_v35 = vpop.f32.mrb[56].mxu1  ;;  %3092 = vmatprep.mubr.bf16.mxu0 %v2151_v30  ;;  %3478 = vmatprep.mubr.bf16.mxu1 %v2151_v30 }
 0x282   : > { %v1567_v36 = vpop.f32.mrb[57].mxu0  ;;  %v1953_v38 = vpop.f32.mrb[57].mxu1  ;;  %3093 = vmatmul.mubr.bf16.gmra.mrb[116].mxu0 %v2150_v28  ;;  %3479 = vmatmul.mubr.bf16.gmra.mrb[116].mxu1 %v2150_v28  ;;  %v2082_v50 = vmax.f32 %v1565_v34, 0.0  ;;  %v2084_v51 = vmax.f32 %v1951_v35, 0.0 }
 0x283   : > { %v1569_v44 = vpop.f32.mrb[58].mxu0  ;;  %v1955_v46 = vpop.f32.mrb[58].mxu1  ;;  %v2083_v56 = vmax.f32 %v1567_v36, 0.0  ;;  %v2085_v57 = vmax.f32 %v1953_v38, 0.0 }
 0x284   : > { %v2086_v52 = vmax.f32 %v1569_v44, 0.0  ;;  %v2088_v53 = vmax.f32 %v1955_v46, 0.0  ;;  %v1571_v54 = vpop.f32.mrb[59].mxu0  ;;  %v1957_v55 = vpop.f32.mrb[59].mxu1  ;;  %v5204_v44 = vld [vmem:[%s5689_s30 + $0x28] sm:$0xff] }
 0x285   : > { %v2087_v58 = vmax.f32 %v1571_v54, 0.0  ;;  %v2089_v59 = vmax.f32 %v1957_v55, 0.0 }
 0x286   : > { %v2154_v60 = vpack.c.bf16 %v2086_v52, %v2082_v50  ;;  %v5883_v62 = vpack.c.bf16 %v2088_v53, %v2084_v51  ;;  %v5205_v50 = vld [vmem:[%s5689_s30 + $0x38] sm:$0xff] }
 0x287   : > { %v2155_v0 = vpack.c.bf16 %v2087_v58, %v2083_v56  ;;  %v5885_v2 = vpack.c.bf16 %v2089_v59, %v2085_v57 }
 0x289   : > { %v1575_v4 = vpop.f32.mrb[60].mxu0  ;;  %v1961_v5 = vpop.f32.mrb[60].mxu1  ;;  %3102 = vmatprep.mubr.bf16.mxu0 %v2155_v0  ;;  %3488 = vmatprep.mubr.bf16.mxu1 %v2155_v0  ;;  %v5206_v0 = vld [vmem:[%s5689_s30 + $0x40] sm:$0xff] }
 0x28a   : > { %v1577_v6 = vpop.f32.mrb[61].mxu0  ;;  %v1963_v10 = vpop.f32.mrb[61].mxu1  ;;  %3103 = vmatmul.mubr.bf16.gmra.mrb[120].mxu0 %v2154_v60  ;;  %3489 = vmatmul.mubr.bf16.gmra.mrb[120].mxu1 %v2154_v60  ;;  %v2090_v18 = vmax.f32 %v1575_v4, 0.0  ;;  %v2092_v20 = vmax.f32 %v1961_v5, 0.0  ;;  %v5207_v4 = vld [vmem:[%s5689_s30 + $0x50] sm:$0xff] }
 0x28b   : > { %v1579_v14 = vpop.f32.mrb[62].mxu0  ;;  %v1965_v16 = vpop.f32.mrb[62].mxu1  ;;  %v2091_v26 = vmax.f32 %v1577_v6, 0.0  ;;  %v2093_v27 = vmax.f32 %v1963_v10, 0.0 }
 0x28c   : > { %v2094_v22 = vmax.f32 %v1579_v14, 0.0  ;;  %v2096_v23 = vmax.f32 %v1965_v16, 0.0  ;;  %v1581_v24 = vpop.f32.mrb[63].mxu0  ;;  %v1967_v25 = vpop.f32.mrb[63].mxu1 }
 0x28d   : > { %v2095_v28 = vmax.f32 %v1581_v24, 0.0  ;;  %v2097_v30 = vmax.f32 %v1967_v25, 0.0 }
 0x28e   : > { %v2158_v34 = vpack.c.bf16 %v2094_v22, %v2090_v18  ;;  %v5887_v35 = vpack.c.bf16 %v2096_v23, %v2092_v20  ;;  %v5208_v18 = vld [vmem:[%s5689_s30 + $0x48] sm:$0xff]  ;;  %v5209_v22 = vld [vmem:[%s5689_s30 + $0x58] sm:$0xff] }
 0x28f   : > { %v2159_v36 = vpack.c.bf16 %v2095_v28, %v2091_v26  ;;  %v5889_v38 = vpack.c.bf16 %v2097_v30, %v2093_v27  ;;  %v5210_v26 = vld [vmem:[%s5689_s30 + $0x60] sm:$0xff]  ;;  %v5211_v28 = vld [vmem:[%s5689_s30 + $0x70] sm:$0xff] }
 0x291   : > { %3112 = vmatprep.mubr.bf16.mxu0 %v2159_v36  ;;  %3498 = vmatprep.mubr.bf16.mxu1 %v2159_v36  ;;  %v5213_v36 = vld [vmem:[%s5689_s30 + $0x78] sm:$0xff] }
 0x292   : > { %3113 = vmatmul.mubr.bf16.gmra.mrb[124].mxu0 %v2158_v34  ;;  %3499 = vmatmul.mubr.bf16.gmra.mrb[124].mxu1 %v2158_v34  ;;  %v5212_v34 = vld [vmem:[%s5689_s30 + $0x68] sm:$0xff] }
 0x293   : > { %3155 = vmatprep.mubr.bf16.mxu0 %v5829_v21  ;;  %3541 = vmatprep.mubr.bf16.mxu1 %v5829_v21 }
 0x29a   : > { %3156 = vmatmul.mubr.bf16.vlgmr.msra.gmra.mrb[64].mxu0 %v5827_v19  ;;  %3542 = vmatmul.mubr.bf16.vlgmr.msra.gmra.mrb[64].mxu1 %v5827_v19 }
 0x29b   : > { %3165 = vmatprep.mubr.bf16.mxu0 %v5833_v49  ;;  %3551 = vmatprep.mubr.bf16.mxu1 %v5833_v49 }
 0x2a2   : > { %3166 = vmatmul.mubr.bf16.gmra.mrb[68].mxu0 %v5831_v47  ;;  %3552 = vmatmul.mubr.bf16.gmra.mrb[68].mxu1 %v5831_v47 }
 0x2a3   : > { %3175 = vmatprep.mubr.bf16.mxu0 %v5837_v13  ;;  %3561 = vmatprep.mubr.bf16.mxu1 %v5837_v13 }
 0x2aa   : > { %3176 = vmatmul.mubr.bf16.gmra.mrb[72].mxu0 %v5835_v11  ;;  %3562 = vmatmul.mubr.bf16.gmra.mrb[72].mxu1 %v5835_v11 }
 0x2ab   : > { %3185 = vmatprep.mubr.bf16.mxu0 %v5841_v43  ;;  %3571 = vmatprep.mubr.bf16.mxu1 %v5841_v43 }
 0x2b2   : > { %3186 = vmatmul.mubr.bf16.gmra.mrb[76].mxu0 %v5839_v41  ;;  %3572 = vmatmul.mubr.bf16.gmra.mrb[76].mxu1 %v5839_v41 }
 0x2b3   : > { %3195 = vmatprep.mubr.bf16.mxu0 %v5845_v9  ;;  %3581 = vmatprep.mubr.bf16.mxu1 %v5845_v9 }
 0x2ba   : > { %3196 = vmatmul.mubr.bf16.gmra.mrb[80].mxu0 %v5843_v7  ;;  %3582 = vmatmul.mubr.bf16.gmra.mrb[80].mxu1 %v5843_v7 }
 0x2bb   : > { %3205 = vmatprep.mubr.bf16.mxu0 %v5849_v42  ;;  %3591 = vmatprep.mubr.bf16.mxu1 %v5849_v42 }
 0x2c2   : > { %3206 = vmatmul.mubr.bf16.gmra.mrb[84].mxu0 %v5847_v39  ;;  %3592 = vmatmul.mubr.bf16.gmra.mrb[84].mxu1 %v5847_v39  ;;  %v5198_v39 = vld [vmem:[%s5689_s30] sm:$0xff] }
 0x2c3   : > { %3215 = vmatprep.mubr.bf16.mxu0 %v5853_v12  ;;  %3601 = vmatprep.mubr.bf16.mxu1 %v5853_v12 }
 0x2ca   : > { %3216 = vmatmul.mubr.bf16.gmra.mrb[88].mxu0 %v5851_v8  ;;  %3602 = vmatmul.mubr.bf16.gmra.mrb[88].mxu1 %v5851_v8  ;;  %v5199_v8 = vld [vmem:[%s5689_s30 + $0x10] sm:$0xff] }
 0x2cb   : > { %3225 = vmatprep.mubr.bf16.mxu0 %v5857_v48  ;;  %3611 = vmatprep.mubr.bf16.mxu1 %v5857_v48 }
 0x2d2   : > { %3226 = vmatmul.mubr.bf16.gmra.mrb[92].mxu0 %v5855_v45  ;;  %3612 = vmatmul.mubr.bf16.gmra.mrb[92].mxu1 %v5855_v45 }
 0x2d3   : > { %3235 = vmatprep.mubr.bf16.mxu0 %v5861_v17  ;;  %3621 = vmatprep.mubr.bf16.mxu1 %v5861_v17 }
 0x2da   : > { %3236 = vmatmul.mubr.bf16.gmra.mrb[96].mxu0 %v5859_v15  ;;  %3622 = vmatmul.mubr.bf16.gmra.mrb[96].mxu1 %v5859_v15 }
 0x2db   : > { %3245 = vmatprep.mubr.bf16.mxu0 %v5865_v40  ;;  %3631 = vmatprep.mubr.bf16.mxu1 %v5865_v40 }
 0x2e2   : > { %3246 = vmatmul.mubr.bf16.gmra.mrb[100].mxu0 %v5863_v37  ;;  %3632 = vmatmul.mubr.bf16.gmra.mrb[100].mxu1 %v5863_v37  ;;  %v5200_v37 = vld [vmem:[%s5689_s30 + $0x8] sm:$0xff] }
 0x2e3   : > { %3255 = vmatprep.mubr.bf16.mxu0 %v5869_v3  ;;  %3641 = vmatprep.mubr.bf16.mxu1 %v5869_v3 }
 0x2ea   : > { %3256 = vmatmul.mubr.bf16.gmra.mrb[104].mxu0 %v5867_v1  ;;  %3642 = vmatmul.mubr.bf16.gmra.mrb[104].mxu1 %v5867_v1  ;;  %v5201_v1 = vld [vmem:[%s5689_s30 + $0x18] sm:$0xff] }
 0x2eb   : > { %3265 = vmatprep.mubr.bf16.mxu0 %v5873_v33  ;;  %3651 = vmatprep.mubr.bf16.mxu1 %v5873_v33 }
 0x2f2   : > { %3266 = vmatmul.mubr.bf16.gmra.mrb[108].mxu0 %v5871_v31  ;;  %3652 = vmatmul.mubr.bf16.gmra.mrb[108].mxu1 %v5871_v31 }
 0x2f3   : > { %3275 = vmatprep.mubr.bf16.mxu0 %v5877_v63  ;;  %3661 = vmatprep.mubr.bf16.mxu1 %v5877_v63 }
 0x2fa   : > { %3276 = vmatmul.mubr.bf16.gmra.mrb[112].mxu0 %v5875_v61  ;;  %3662 = vmatmul.mubr.bf16.gmra.mrb[112].mxu1 %v5875_v61  ;;  %v5202_v61 = vld [vmem:[%s5689_s30 + $0x20] sm:$0xff] }
 0x2fb   : > { %3285 = vmatprep.mubr.bf16.mxu0 %v5881_v32  ;;  %3671 = vmatprep.mubr.bf16.mxu1 %v5881_v32 }
 0x302   : > { %3286 = vmatmul.mubr.bf16.gmra.mrb[116].mxu0 %v5879_v29  ;;  %3672 = vmatmul.mubr.bf16.gmra.mrb[116].mxu1 %v5879_v29  ;;  %v5203_v29 = vld [vmem:[%s5689_s30 + $0x30] sm:$0xff] }
 0x303   : > { %3295 = vmatprep.mubr.bf16.mxu0 %v5885_v2  ;;  %3681 = vmatprep.mubr.bf16.mxu1 %v5885_v2 }
 0x30a   : > { %3296 = vmatmul.mubr.bf16.gmra.mrb[120].mxu0 %v5883_v62  ;;  %3682 = vmatmul.mubr.bf16.gmra.mrb[120].mxu1 %v5883_v62 }
 0x30b   : > { %3305 = vmatprep.mubr.bf16.mxu0 %v5889_v38  ;;  %3691 = vmatprep.mubr.bf16.mxu1 %v5889_v38 }
 0x312   : > { %3306 = vmatmul.mubr.bf16.gmra.mrb[124].mxu0 %v5887_v35  ;;  %3692 = vmatmul.mubr.bf16.gmra.mrb[124].mxu1 %v5887_v35 }
 0x36d   : > { %v3157_v19 = vpop.f32.mrb[64].mxu0  ;;  %v3543_v21 = vpop.f32.mrb[64].mxu1 }
 0x36e   : > { %v3702_v47 = vmax.f32 %v3157_v19, 0.0  ;;  %v3704_v49 = vmax.f32 %v3543_v21, 0.0  ;;  %v3159_v11 = vpop.f32.mrb[65].mxu0  ;;  %v3545_v13 = vpop.f32.mrb[65].mxu1 }
 0x36f   : > { %v3703_v41 = vmax.f32 %v3159_v11, 0.0  ;;  %v3705_v43 = vmax.f32 %v3545_v13, 0.0  ;;  %v3161_v7 = vpop.f32.mrb[66].mxu0  ;;  %v3547_v9 = vpop.f32.mrb[66].mxu1 }
 0x370   : > { %v3830_v42 = vadd.f32 %v5198_v39, %v3702_v47  ;;  %v3832_v12 = vadd.f32 %v5199_v8, %v3704_v49  ;;  %v3706_v45 = vmax.f32 %v3161_v7, 0.0  ;;  %v3708_v48 = vmax.f32 %v3547_v9, 0.0  ;;  %v3163_v15 = vpop.f32.mrb[67].mxu0  ;;  %v3549_v17 = vpop.f32.mrb[67].mxu1  ;;  %v5214_v39 = vld [vmem:[%s5689_s30 + $0x80] sm:$0xff]  ;;  %v5215_v8 = vld [vmem:[%s5689_s30 + $0x90] sm:$0xff] }
 0x371   : > { %v3831_v40 = vadd.f32 %v5200_v37, %v3703_v41  ;;  %v3833_v3 = vadd.f32 %v5201_v1, %v3705_v43  ;;  %v3707_v31 = vmax.f32 %v3163_v15, 0.0  ;;  %v3709_v33 = vmax.f32 %v3549_v17, 0.0  ;;  %v5216_v37 = vld [vmem:[%s5689_s30 + $0x88] sm:$0xff]  ;;  %v5217_v1 = vld [vmem:[%s5689_s30 + $0x98] sm:$0xff] }
 0x372   : > { %3958 = vst [vmem:[%s5961_s23] sm:$0xff] %v3830_v42  ;;  %3960 = vst [vmem:[%s5961_s23 + $0x10] sm:$0xff] %v3832_v12  ;;  %v3834_v63 = vadd.f32 %v5202_v61, %v3706_v45  ;;  %v3836_v32 = vadd.f32 %v5203_v29, %v3708_v48  ;;  %v5218_v61 = vld [vmem:[%s5689_s30 + $0xa0] sm:$0xff]  ;;  %v5219_v29 = vld [vmem:[%s5689_s30 + $0xb0] sm:$0xff] }
 0x373   : > { %3959 = vst [vmem:[%s5961_s23 + $0x8] sm:$0xff] %v3831_v40  ;;  %3961 = vst [vmem:[%s5961_s23 + $0x18] sm:$0xff] %v3833_v3  ;;  %v3835_v46 = vadd.f32 %v5204_v44, %v3707_v31  ;;  %v3837_v51 = vadd.f32 %v5205_v50, %v3709_v33  ;;  %v5220_v44 = vld [vmem:[%s5689_s30 + $0xa8] sm:$0xff]  ;;  %v5221_v50 = vld [vmem:[%s5689_s30 + $0xb8] sm:$0xff] }
 0x374   : > { %3962 = vst [vmem:[%s5961_s23 + $0x20] sm:$0xff] %v3834_v63  ;;  %3964 = vst [vmem:[%s5961_s23 + $0x30] sm:$0xff] %v3836_v32 }
 0x375   : > { %3963 = vst [vmem:[%s5961_s23 + $0x28] sm:$0xff] %v3835_v46  ;;  %3965 = vst [vmem:[%s5961_s23 + $0x38] sm:$0xff] %v3837_v51  ;;  %v3167_v52 = vpop.f32.mrb[68].mxu0  ;;  %v3553_v53 = vpop.f32.mrb[68].mxu1 }
 0x376   : > { %v3710_v54 = vmax.f32 %v3167_v52, 0.0  ;;  %v3712_v55 = vmax.f32 %v3553_v53, 0.0  ;;  %v3169_v56 = vpop.f32.mrb[69].mxu0  ;;  %v3555_v57 = vpop.f32.mrb[69].mxu1 }
 0x377   : > { %v3711_v58 = vmax.f32 %v3169_v56, 0.0  ;;  %v3713_v59 = vmax.f32 %v3555_v57, 0.0  ;;  %v3171_v60 = vpop.f32.mrb[70].mxu0  ;;  %v3557_v62 = vpop.f32.mrb[70].mxu1 }
 0x378   : > { %v3838_v2 = vadd.f32 %v5206_v0, %v3710_v54  ;;  %v3840_v5 = vadd.f32 %v5207_v4, %v3712_v55  ;;  %v3714_v6 = vmax.f32 %v3171_v60, 0.0  ;;  %v3716_v10 = vmax.f32 %v3557_v62, 0.0  ;;  %v3173_v14 = vpop.f32.mrb[71].mxu0  ;;  %v3559_v16 = vpop.f32.mrb[71].mxu1  ;;  %v5222_v0 = vld [vmem:[%s5689_s30 + $0xc0] sm:$0xff]  ;;  %v5223_v4 = vld [vmem:[%s5689_s30 + $0xd0] sm:$0xff] }
 0x379   : > { %v3839_v20 = vadd.f32 %v5208_v18, %v3711_v58  ;;  %v3841_v23 = vadd.f32 %v5209_v22, %v3713_v59  ;;  %v3715_v24 = vmax.f32 %v3173_v14, 0.0  ;;  %v3717_v25 = vmax.f32 %v3559_v16, 0.0  ;;  %v5224_v18 = vld [vmem:[%s5689_s30 + $0xc8] sm:$0xff]  ;;  %v5225_v22 = vld [vmem:[%s5689_s30 + $0xd8] sm:$0xff] }
 0x37a   : > { %3966 = vst [vmem:[%s5961_s23 + $0x40] sm:$0xff] %v3838_v2  ;;  %3968 = vst [vmem:[%s5961_s23 + $0x50] sm:$0xff] %v3840_v5  ;;  %v3842_v27 = vadd.f32 %v5210_v26, %v3714_v6  ;;  %v3844_v30 = vadd.f32 %v5211_v28, %v3716_v10  ;;  %v5226_v26 = vld [vmem:[%s5689_s30 + $0xe0] sm:$0xff]  ;;  %v5227_v28 = vld [vmem:[%s5689_s30 + $0xf0] sm:$0xff] }
 0x37b   : > { %3967 = vst [vmem:[%s5961_s23 + $0x48] sm:$0xff] %v3839_v20  ;;  %3969 = vst [vmem:[%s5961_s23 + $0x58] sm:$0xff] %v3841_v23  ;;  %v3843_v35 = vadd.f32 %v5212_v34, %v3715_v24  ;;  %v3845_v38 = vadd.f32 %v5213_v36, %v3717_v25  ;;  %v5228_v34 = vld [vmem:[%s5689_s30 + $0xe8] sm:$0xff]  ;;  %v5229_v36 = vld [vmem:[%s5689_s30 + $0xf8] sm:$0xff] }
 0x37c   : > { %3970 = vst [vmem:[%s5961_s23 + $0x60] sm:$0xff] %v3842_v27  ;;  %3972 = vst [vmem:[%s5961_s23 + $0x70] sm:$0xff] %v3844_v30 }
 0x37d   : > { %3971 = vst [vmem:[%s5961_s23 + $0x68] sm:$0xff] %v3843_v35  ;;  %3973 = vst [vmem:[%s5961_s23 + $0x78] sm:$0xff] %v3845_v38  ;;  %v3177_v19 = vpop.f32.mrb[72].mxu0  ;;  %v3563_v21 = vpop.f32.mrb[72].mxu1 }
 0x37e   : > { %v3718_v47 = vmax.f32 %v3177_v19, 0.0  ;;  %v3720_v49 = vmax.f32 %v3563_v21, 0.0  ;;  %v3179_v11 = vpop.f32.mrb[73].mxu0  ;;  %v3565_v13 = vpop.f32.mrb[73].mxu1 }
 0x37f   : > { %v3719_v41 = vmax.f32 %v3179_v11, 0.0  ;;  %v3721_v43 = vmax.f32 %v3565_v13, 0.0  ;;  %v3181_v7 = vpop.f32.mrb[74].mxu0  ;;  %v3567_v9 = vpop.f32.mrb[74].mxu1 }
 0x380   : > { %v3846_v42 = vadd.f32 %v5214_v39, %v3718_v47  ;;  %v3848_v12 = vadd.f32 %v5215_v8, %v3720_v49  ;;  %v3722_v45 = vmax.f32 %v3181_v7, 0.0  ;;  %v3724_v48 = vmax.f32 %v3567_v9, 0.0  ;;  %v3183_v15 = vpop.f32.mrb[75].mxu0  ;;  %v3569_v17 = vpop.f32.mrb[75].mxu1  ;;  %v5230_v39 = vld [vmem:[%s5689_s30 + $0x100] sm:$0xff]  ;;  %v5231_v8 = vld [vmem:[%s5689_s30 + $0x110] sm:$0xff] }
 0x381   : > { %v3847_v40 = vadd.f32 %v5216_v37, %v3719_v41  ;;  %v3849_v3 = vadd.f32 %v5217_v1, %v3721_v43  ;;  %v3723_v31 = vmax.f32 %v3183_v15, 0.0  ;;  %v3725_v33 = vmax.f32 %v3569_v17, 0.0  ;;  %v5232_v37 = vld [vmem:[%s5689_s30 + $0x108] sm:$0xff]  ;;  %v5233_v1 = vld [vmem:[%s5689_s30 + $0x118] sm:$0xff] }
 0x382   : > { %3974 = vst [vmem:[%s5961_s23 + $0x80] sm:$0xff] %v3846_v42  ;;  %3976 = vst [vmem:[%s5961_s23 + $0x90] sm:$0xff] %v3848_v12  ;;  %v3850_v63 = vadd.f32 %v5218_v61, %v3722_v45  ;;  %v3852_v32 = vadd.f32 %v5219_v29, %v3724_v48  ;;  %v5234_v61 = vld [vmem:[%s5689_s30 + $0x120] sm:$0xff]  ;;  %v5235_v29 = vld [vmem:[%s5689_s30 + $0x130] sm:$0xff] }
 0x383   : > { %3975 = vst [vmem:[%s5961_s23 + $0x88] sm:$0xff] %v3847_v40  ;;  %3977 = vst [vmem:[%s5961_s23 + $0x98] sm:$0xff] %v3849_v3  ;;  %v3851_v46 = vadd.f32 %v5220_v44, %v3723_v31  ;;  %v3853_v51 = vadd.f32 %v5221_v50, %v3725_v33  ;;  %v5236_v44 = vld [vmem:[%s5689_s30 + $0x128] sm:$0xff]  ;;  %v5237_v50 = vld [vmem:[%s5689_s30 + $0x138] sm:$0xff] }
 0x384   : > { %3978 = vst [vmem:[%s5961_s23 + $0xa0] sm:$0xff] %v3850_v63  ;;  %3980 = vst [vmem:[%s5961_s23 + $0xb0] sm:$0xff] %v3852_v32 }
 0x385   : > { %3979 = vst [vmem:[%s5961_s23 + $0xa8] sm:$0xff] %v3851_v46  ;;  %3981 = vst [vmem:[%s5961_s23 + $0xb8] sm:$0xff] %v3853_v51  ;;  %v3187_v52 = vpop.f32.mrb[76].mxu0  ;;  %v3573_v53 = vpop.f32.mrb[76].mxu1 }
 0x386   : > { %v3726_v54 = vmax.f32 %v3187_v52, 0.0  ;;  %v3728_v55 = vmax.f32 %v3573_v53, 0.0  ;;  %v3189_v56 = vpop.f32.mrb[77].mxu0  ;;  %v3575_v57 = vpop.f32.mrb[77].mxu1 }
 0x387   : > { %v3727_v58 = vmax.f32 %v3189_v56, 0.0  ;;  %v3729_v59 = vmax.f32 %v3575_v57, 0.0  ;;  %v3191_v60 = vpop.f32.mrb[78].mxu0  ;;  %v3577_v62 = vpop.f32.mrb[78].mxu1 }
 0x388   : > { %v3854_v2 = vadd.f32 %v5222_v0, %v3726_v54  ;;  %v3856_v5 = vadd.f32 %v5223_v4, %v3728_v55  ;;  %v3730_v6 = vmax.f32 %v3191_v60, 0.0  ;;  %v3732_v10 = vmax.f32 %v3577_v62, 0.0  ;;  %v3193_v14 = vpop.f32.mrb[79].mxu0  ;;  %v3579_v16 = vpop.f32.mrb[79].mxu1  ;;  %v5238_v0 = vld [vmem:[%s5689_s30 + $0x140] sm:$0xff]  ;;  %v5239_v4 = vld [vmem:[%s5689_s30 + $0x150] sm:$0xff] }
 0x389   : > { %v3855_v20 = vadd.f32 %v5224_v18, %v3727_v58  ;;  %v3857_v23 = vadd.f32 %v5225_v22, %v3729_v59  ;;  %v3731_v24 = vmax.f32 %v3193_v14, 0.0  ;;  %v3733_v25 = vmax.f32 %v3579_v16, 0.0  ;;  %v5240_v18 = vld [vmem:[%s5689_s30 + $0x148] sm:$0xff]  ;;  %v5241_v22 = vld [vmem:[%s5689_s30 + $0x158] sm:$0xff] }
 0x38a   : > { %3982 = vst [vmem:[%s5961_s23 + $0xc0] sm:$0xff] %v3854_v2  ;;  %3984 = vst [vmem:[%s5961_s23 + $0xd0] sm:$0xff] %v3856_v5  ;;  %v3858_v27 = vadd.f32 %v5226_v26, %v3730_v6  ;;  %v3860_v30 = vadd.f32 %v5227_v28, %v3732_v10  ;;  %v5242_v26 = vld [vmem:[%s5689_s30 + $0x160] sm:$0xff]  ;;  %v5243_v28 = vld [vmem:[%s5689_s30 + $0x170] sm:$0xff] }
 0x38b   : > { %3983 = vst [vmem:[%s5961_s23 + $0xc8] sm:$0xff] %v3855_v20  ;;  %3985 = vst [vmem:[%s5961_s23 + $0xd8] sm:$0xff] %v3857_v23  ;;  %v3859_v35 = vadd.f32 %v5228_v34, %v3731_v24  ;;  %v3861_v38 = vadd.f32 %v5229_v36, %v3733_v25  ;;  %v5244_v34 = vld [vmem:[%s5689_s30 + $0x168] sm:$0xff]  ;;  %v5245_v36 = vld [vmem:[%s5689_s30 + $0x178] sm:$0xff] }
 0x38c   : > { %3986 = vst [vmem:[%s5961_s23 + $0xe0] sm:$0xff] %v3858_v27  ;;  %3988 = vst [vmem:[%s5961_s23 + $0xf0] sm:$0xff] %v3860_v30 }
 0x38d   : > { %3987 = vst [vmem:[%s5961_s23 + $0xe8] sm:$0xff] %v3859_v35  ;;  %3989 = vst [vmem:[%s5961_s23 + $0xf8] sm:$0xff] %v3861_v38  ;;  %v3197_v19 = vpop.f32.mrb[80].mxu0  ;;  %v3583_v21 = vpop.f32.mrb[80].mxu1 }
 0x38e   : > { %v3734_v47 = vmax.f32 %v3197_v19, 0.0  ;;  %v3736_v49 = vmax.f32 %v3583_v21, 0.0  ;;  %v3199_v11 = vpop.f32.mrb[81].mxu0  ;;  %v3585_v13 = vpop.f32.mrb[81].mxu1 }
 0x38f   : > { %v3735_v41 = vmax.f32 %v3199_v11, 0.0  ;;  %v3737_v43 = vmax.f32 %v3585_v13, 0.0  ;;  %v3201_v7 = vpop.f32.mrb[82].mxu0  ;;  %v3587_v9 = vpop.f32.mrb[82].mxu1 }
 0x390   : > { %v3862_v42 = vadd.f32 %v5230_v39, %v3734_v47  ;;  %v3864_v12 = vadd.f32 %v5231_v8, %v3736_v49  ;;  %v3738_v45 = vmax.f32 %v3201_v7, 0.0  ;;  %v3740_v48 = vmax.f32 %v3587_v9, 0.0  ;;  %v3203_v15 = vpop.f32.mrb[83].mxu0  ;;  %v3589_v17 = vpop.f32.mrb[83].mxu1  ;;  %v5246_v39 = vld [vmem:[%s5689_s30 + $0x180] sm:$0xff]  ;;  %v5247_v8 = vld [vmem:[%s5689_s30 + $0x190] sm:$0xff] }
 0x391   : > { %v3863_v40 = vadd.f32 %v5232_v37, %v3735_v41  ;;  %v3865_v3 = vadd.f32 %v5233_v1, %v3737_v43  ;;  %v3739_v31 = vmax.f32 %v3203_v15, 0.0  ;;  %v3741_v33 = vmax.f32 %v3589_v17, 0.0  ;;  %v5248_v37 = vld [vmem:[%s5689_s30 + $0x188] sm:$0xff]  ;;  %v5249_v1 = vld [vmem:[%s5689_s30 + $0x198] sm:$0xff] }
 0x392   : > { %3990 = vst [vmem:[%s5961_s23 + $0x100] sm:$0xff] %v3862_v42  ;;  %3992 = vst [vmem:[%s5961_s23 + $0x110] sm:$0xff] %v3864_v12  ;;  %v3866_v63 = vadd.f32 %v5234_v61, %v3738_v45  ;;  %v3868_v32 = vadd.f32 %v5235_v29, %v3740_v48  ;;  %v5250_v61 = vld [vmem:[%s5689_s30 + $0x1a0] sm:$0xff]  ;;  %v5251_v29 = vld [vmem:[%s5689_s30 + $0x1b0] sm:$0xff] }
 0x393   : > { %3991 = vst [vmem:[%s5961_s23 + $0x108] sm:$0xff] %v3863_v40  ;;  %3993 = vst [vmem:[%s5961_s23 + $0x118] sm:$0xff] %v3865_v3  ;;  %v3867_v46 = vadd.f32 %v5236_v44, %v3739_v31  ;;  %v3869_v51 = vadd.f32 %v5237_v50, %v3741_v33  ;;  %v5252_v44 = vld [vmem:[%s5689_s30 + $0x1a8] sm:$0xff]  ;;  %v5253_v50 = vld [vmem:[%s5689_s30 + $0x1b8] sm:$0xff] }
 0x394   : > { %3994 = vst [vmem:[%s5961_s23 + $0x120] sm:$0xff] %v3866_v63  ;;  %3996 = vst [vmem:[%s5961_s23 + $0x130] sm:$0xff] %v3868_v32 }
 0x395   : > { %3995 = vst [vmem:[%s5961_s23 + $0x128] sm:$0xff] %v3867_v46  ;;  %3997 = vst [vmem:[%s5961_s23 + $0x138] sm:$0xff] %v3869_v51  ;;  %v3207_v52 = vpop.f32.mrb[84].mxu0  ;;  %v3593_v53 = vpop.f32.mrb[84].mxu1 }
 0x396   : > { %v3742_v54 = vmax.f32 %v3207_v52, 0.0  ;;  %v3744_v55 = vmax.f32 %v3593_v53, 0.0  ;;  %v3209_v56 = vpop.f32.mrb[85].mxu0  ;;  %v3595_v57 = vpop.f32.mrb[85].mxu1 }
 0x397   : > { %v3743_v58 = vmax.f32 %v3209_v56, 0.0  ;;  %v3745_v59 = vmax.f32 %v3595_v57, 0.0  ;;  %v3211_v60 = vpop.f32.mrb[86].mxu0  ;;  %v3597_v62 = vpop.f32.mrb[86].mxu1 }
 0x398   : > { %v3870_v2 = vadd.f32 %v5238_v0, %v3742_v54  ;;  %v3872_v5 = vadd.f32 %v5239_v4, %v3744_v55  ;;  %v3746_v6 = vmax.f32 %v3211_v60, 0.0  ;;  %v3748_v10 = vmax.f32 %v3597_v62, 0.0  ;;  %v3213_v14 = vpop.f32.mrb[87].mxu0  ;;  %v3599_v16 = vpop.f32.mrb[87].mxu1  ;;  %v5254_v0 = vld [vmem:[%s5689_s30 + $0x1c0] sm:$0xff]  ;;  %v5255_v4 = vld [vmem:[%s5689_s30 + $0x1d0] sm:$0xff] }
 0x399   : > { %v3871_v20 = vadd.f32 %v5240_v18, %v3743_v58  ;;  %v3873_v23 = vadd.f32 %v5241_v22, %v3745_v59  ;;  %v3747_v24 = vmax.f32 %v3213_v14, 0.0  ;;  %v3749_v25 = vmax.f32 %v3599_v16, 0.0  ;;  %v5256_v18 = vld [vmem:[%s5689_s30 + $0x1c8] sm:$0xff]  ;;  %v5257_v22 = vld [vmem:[%s5689_s30 + $0x1d8] sm:$0xff] }
 0x39a   : > { %3998 = vst [vmem:[%s5961_s23 + $0x140] sm:$0xff] %v3870_v2  ;;  %4000 = vst [vmem:[%s5961_s23 + $0x150] sm:$0xff] %v3872_v5  ;;  %v3874_v27 = vadd.f32 %v5242_v26, %v3746_v6  ;;  %v3876_v30 = vadd.f32 %v5243_v28, %v3748_v10  ;;  %v5258_v26 = vld [vmem:[%s5689_s30 + $0x1e0] sm:$0xff]  ;;  %v5259_v28 = vld [vmem:[%s5689_s30 + $0x1f0] sm:$0xff] }
 0x39b   : > { %3999 = vst [vmem:[%s5961_s23 + $0x148] sm:$0xff] %v3871_v20  ;;  %4001 = vst [vmem:[%s5961_s23 + $0x158] sm:$0xff] %v3873_v23  ;;  %v3875_v35 = vadd.f32 %v5244_v34, %v3747_v24  ;;  %v3877_v38 = vadd.f32 %v5245_v36, %v3749_v25  ;;  %v5260_v34 = vld [vmem:[%s5689_s30 + $0x1e8] sm:$0xff]  ;;  %v5261_v36 = vld [vmem:[%s5689_s30 + $0x1f8] sm:$0xff] }
 0x39c   : > { %4002 = vst [vmem:[%s5961_s23 + $0x160] sm:$0xff] %v3874_v27  ;;  %4004 = vst [vmem:[%s5961_s23 + $0x170] sm:$0xff] %v3876_v30 }
 0x39d   : > { %4003 = vst [vmem:[%s5961_s23 + $0x168] sm:$0xff] %v3875_v35  ;;  %4005 = vst [vmem:[%s5961_s23 + $0x178] sm:$0xff] %v3877_v38  ;;  %v3217_v19 = vpop.f32.mrb[88].mxu0  ;;  %v3603_v21 = vpop.f32.mrb[88].mxu1 }
 0x39e   : > { %v3750_v47 = vmax.f32 %v3217_v19, 0.0  ;;  %v3752_v49 = vmax.f32 %v3603_v21, 0.0  ;;  %v3219_v11 = vpop.f32.mrb[89].mxu0  ;;  %v3605_v13 = vpop.f32.mrb[89].mxu1 }
 0x39f   : > { %v3751_v41 = vmax.f32 %v3219_v11, 0.0  ;;  %v3753_v43 = vmax.f32 %v3605_v13, 0.0  ;;  %v3221_v7 = vpop.f32.mrb[90].mxu0  ;;  %v3607_v9 = vpop.f32.mrb[90].mxu1 }
 0x3a0   : > { %v3878_v42 = vadd.f32 %v5246_v39, %v3750_v47  ;;  %v3880_v12 = vadd.f32 %v5247_v8, %v3752_v49  ;;  %v3754_v45 = vmax.f32 %v3221_v7, 0.0  ;;  %v3756_v48 = vmax.f32 %v3607_v9, 0.0  ;;  %v3223_v15 = vpop.f32.mrb[91].mxu0  ;;  %v3609_v17 = vpop.f32.mrb[91].mxu1  ;;  %v5262_v39 = vld [vmem:[%s5689_s30 + $0x200] sm:$0xff]  ;;  %v5263_v8 = vld [vmem:[%s5689_s30 + $0x210] sm:$0xff] }
 0x3a1   : > { %v3879_v40 = vadd.f32 %v5248_v37, %v3751_v41  ;;  %v3881_v3 = vadd.f32 %v5249_v1, %v3753_v43  ;;  %v3755_v31 = vmax.f32 %v3223_v15, 0.0  ;;  %v3757_v33 = vmax.f32 %v3609_v17, 0.0  ;;  %v5264_v37 = vld [vmem:[%s5689_s30 + $0x208] sm:$0xff]  ;;  %v5265_v1 = vld [vmem:[%s5689_s30 + $0x218] sm:$0xff] }
 0x3a2   : > { %4006 = vst [vmem:[%s5961_s23 + $0x180] sm:$0xff] %v3878_v42  ;;  %4008 = vst [vmem:[%s5961_s23 + $0x190] sm:$0xff] %v3880_v12  ;;  %v3882_v63 = vadd.f32 %v5250_v61, %v3754_v45  ;;  %v3884_v32 = vadd.f32 %v5251_v29, %v3756_v48  ;;  %v5266_v61 = vld [vmem:[%s5689_s30 + $0x220] sm:$0xff]  ;;  %v5267_v29 = vld [vmem:[%s5689_s30 + $0x230] sm:$0xff] }
 0x3a3   : > { %4007 = vst [vmem:[%s5961_s23 + $0x188] sm:$0xff] %v3879_v40  ;;  %4009 = vst [vmem:[%s5961_s23 + $0x198] sm:$0xff] %v3881_v3  ;;  %v3883_v46 = vadd.f32 %v5252_v44, %v3755_v31  ;;  %v3885_v51 = vadd.f32 %v5253_v50, %v3757_v33  ;;  %v5268_v44 = vld [vmem:[%s5689_s30 + $0x228] sm:$0xff]  ;;  %v5269_v50 = vld [vmem:[%s5689_s30 + $0x238] sm:$0xff] }
 0x3a4   : > { %4010 = vst [vmem:[%s5961_s23 + $0x1a0] sm:$0xff] %v3882_v63  ;;  %4012 = vst [vmem:[%s5961_s23 + $0x1b0] sm:$0xff] %v3884_v32 }
 0x3a5   : > { %4011 = vst [vmem:[%s5961_s23 + $0x1a8] sm:$0xff] %v3883_v46  ;;  %4013 = vst [vmem:[%s5961_s23 + $0x1b8] sm:$0xff] %v3885_v51  ;;  %v3227_v52 = vpop.f32.mrb[92].mxu0  ;;  %v3613_v53 = vpop.f32.mrb[92].mxu1 }
 0x3a6   : > { %v3758_v54 = vmax.f32 %v3227_v52, 0.0  ;;  %v3760_v55 = vmax.f32 %v3613_v53, 0.0  ;;  %v3229_v56 = vpop.f32.mrb[93].mxu0  ;;  %v3615_v57 = vpop.f32.mrb[93].mxu1 }
 0x3a7   : > { %v3759_v58 = vmax.f32 %v3229_v56, 0.0  ;;  %v3761_v59 = vmax.f32 %v3615_v57, 0.0  ;;  %v3231_v60 = vpop.f32.mrb[94].mxu0  ;;  %v3617_v62 = vpop.f32.mrb[94].mxu1 }
 0x3a8   : > { %v3886_v2 = vadd.f32 %v5254_v0, %v3758_v54  ;;  %v3888_v5 = vadd.f32 %v5255_v4, %v3760_v55  ;;  %v3762_v6 = vmax.f32 %v3231_v60, 0.0  ;;  %v3764_v10 = vmax.f32 %v3617_v62, 0.0  ;;  %v3233_v14 = vpop.f32.mrb[95].mxu0  ;;  %v3619_v16 = vpop.f32.mrb[95].mxu1  ;;  %v5270_v0 = vld [vmem:[%s5689_s30 + $0x240] sm:$0xff]  ;;  %v5271_v4 = vld [vmem:[%s5689_s30 + $0x250] sm:$0xff] }
 0x3a9   : > { %v3887_v20 = vadd.f32 %v5256_v18, %v3759_v58  ;;  %v3889_v23 = vadd.f32 %v5257_v22, %v3761_v59  ;;  %v3763_v24 = vmax.f32 %v3233_v14, 0.0  ;;  %v3765_v25 = vmax.f32 %v3619_v16, 0.0  ;;  %v5272_v18 = vld [vmem:[%s5689_s30 + $0x248] sm:$0xff]  ;;  %v5273_v22 = vld [vmem:[%s5689_s30 + $0x258] sm:$0xff] }
 0x3aa   : > { %4014 = vst [vmem:[%s5961_s23 + $0x1c0] sm:$0xff] %v3886_v2  ;;  %4016 = vst [vmem:[%s5961_s23 + $0x1d0] sm:$0xff] %v3888_v5  ;;  %v3890_v27 = vadd.f32 %v5258_v26, %v3762_v6  ;;  %v3892_v30 = vadd.f32 %v5259_v28, %v3764_v10  ;;  %v5274_v26 = vld [vmem:[%s5689_s30 + $0x260] sm:$0xff]  ;;  %v5275_v28 = vld [vmem:[%s5689_s30 + $0x270] sm:$0xff] }
 0x3ab   : > { %4015 = vst [vmem:[%s5961_s23 + $0x1c8] sm:$0xff] %v3887_v20  ;;  %4017 = vst [vmem:[%s5961_s23 + $0x1d8] sm:$0xff] %v3889_v23  ;;  %v3891_v35 = vadd.f32 %v5260_v34, %v3763_v24  ;;  %v3893_v38 = vadd.f32 %v5261_v36, %v3765_v25  ;;  %v5276_v34 = vld [vmem:[%s5689_s30 + $0x268] sm:$0xff]  ;;  %v5277_v36 = vld [vmem:[%s5689_s30 + $0x278] sm:$0xff] }
 0x3ac   : > { %4018 = vst [vmem:[%s5961_s23 + $0x1e0] sm:$0xff] %v3890_v27  ;;  %4020 = vst [vmem:[%s5961_s23 + $0x1f0] sm:$0xff] %v3892_v30 }
 0x3ad   : > { %4019 = vst [vmem:[%s5961_s23 + $0x1e8] sm:$0xff] %v3891_v35  ;;  %4021 = vst [vmem:[%s5961_s23 + $0x1f8] sm:$0xff] %v3893_v38  ;;  %v3237_v19 = vpop.f32.mrb[96].mxu0  ;;  %v3623_v21 = vpop.f32.mrb[96].mxu1 }
 0x3ae   : > { %v3766_v47 = vmax.f32 %v3237_v19, 0.0  ;;  %v3768_v49 = vmax.f32 %v3623_v21, 0.0  ;;  %v3239_v11 = vpop.f32.mrb[97].mxu0  ;;  %v3625_v13 = vpop.f32.mrb[97].mxu1 }
 0x3af   : > { %v3767_v41 = vmax.f32 %v3239_v11, 0.0  ;;  %v3769_v43 = vmax.f32 %v3625_v13, 0.0  ;;  %v3241_v7 = vpop.f32.mrb[98].mxu0  ;;  %v3627_v9 = vpop.f32.mrb[98].mxu1 }
 0x3b0   : > { %v3894_v42 = vadd.f32 %v5262_v39, %v3766_v47  ;;  %v3896_v12 = vadd.f32 %v5263_v8, %v3768_v49  ;;  %v3770_v45 = vmax.f32 %v3241_v7, 0.0  ;;  %v3772_v48 = vmax.f32 %v3627_v9, 0.0  ;;  %v3243_v15 = vpop.f32.mrb[99].mxu0  ;;  %v3629_v17 = vpop.f32.mrb[99].mxu1  ;;  %v5278_v39 = vld [vmem:[%s5689_s30 + $0x280] sm:$0xff]  ;;  %v5279_v8 = vld [vmem:[%s5689_s30 + $0x290] sm:$0xff] }
 0x3b1   : > { %v3895_v40 = vadd.f32 %v5264_v37, %v3767_v41  ;;  %v3897_v3 = vadd.f32 %v5265_v1, %v3769_v43  ;;  %v3771_v31 = vmax.f32 %v3243_v15, 0.0  ;;  %v3773_v33 = vmax.f32 %v3629_v17, 0.0  ;;  %v5280_v37 = vld [vmem:[%s5689_s30 + $0x288] sm:$0xff]  ;;  %v5281_v1 = vld [vmem:[%s5689_s30 + $0x298] sm:$0xff] }
 0x3b2   : > { %4022 = vst [vmem:[%s5961_s23 + $0x200] sm:$0xff] %v3894_v42  ;;  %4024 = vst [vmem:[%s5961_s23 + $0x210] sm:$0xff] %v3896_v12  ;;  %v3898_v63 = vadd.f32 %v5266_v61, %v3770_v45  ;;  %v3900_v32 = vadd.f32 %v5267_v29, %v3772_v48  ;;  %v5282_v61 = vld [vmem:[%s5689_s30 + $0x2a0] sm:$0xff]  ;;  %v5283_v29 = vld [vmem:[%s5689_s30 + $0x2b0] sm:$0xff] }
 0x3b3   : > { %4023 = vst [vmem:[%s5961_s23 + $0x208] sm:$0xff] %v3895_v40  ;;  %4025 = vst [vmem:[%s5961_s23 + $0x218] sm:$0xff] %v3897_v3  ;;  %v3899_v46 = vadd.f32 %v5268_v44, %v3771_v31  ;;  %v3901_v51 = vadd.f32 %v5269_v50, %v3773_v33  ;;  %v5284_v44 = vld [vmem:[%s5689_s30 + $0x2a8] sm:$0xff]  ;;  %v5285_v50 = vld [vmem:[%s5689_s30 + $0x2b8] sm:$0xff] }
 0x3b4   : > { %4026 = vst [vmem:[%s5961_s23 + $0x220] sm:$0xff] %v3898_v63  ;;  %4028 = vst [vmem:[%s5961_s23 + $0x230] sm:$0xff] %v3900_v32 }
 0x3b5   : > { %4027 = vst [vmem:[%s5961_s23 + $0x228] sm:$0xff] %v3899_v46  ;;  %4029 = vst [vmem:[%s5961_s23 + $0x238] sm:$0xff] %v3901_v51  ;;  %v3247_v52 = vpop.f32.mrb[100].mxu0  ;;  %v3633_v53 = vpop.f32.mrb[100].mxu1 }
 0x3b6   : > { %v3774_v54 = vmax.f32 %v3247_v52, 0.0  ;;  %v3776_v55 = vmax.f32 %v3633_v53, 0.0  ;;  %v3249_v56 = vpop.f32.mrb[101].mxu0  ;;  %v3635_v57 = vpop.f32.mrb[101].mxu1 }
 0x3b7   : > { %v3775_v58 = vmax.f32 %v3249_v56, 0.0  ;;  %v3777_v59 = vmax.f32 %v3635_v57, 0.0  ;;  %v3251_v60 = vpop.f32.mrb[102].mxu0  ;;  %v3637_v62 = vpop.f32.mrb[102].mxu1 }
 0x3b8   : > { %v3902_v2 = vadd.f32 %v5270_v0, %v3774_v54  ;;  %v3904_v5 = vadd.f32 %v5271_v4, %v3776_v55  ;;  %v3778_v6 = vmax.f32 %v3251_v60, 0.0  ;;  %v3780_v10 = vmax.f32 %v3637_v62, 0.0  ;;  %v3253_v14 = vpop.f32.mrb[103].mxu0  ;;  %v3639_v16 = vpop.f32.mrb[103].mxu1  ;;  %v5286_v0 = vld [vmem:[%s5689_s30 + $0x2c0] sm:$0xff]  ;;  %v5287_v4 = vld [vmem:[%s5689_s30 + $0x2d0] sm:$0xff] }
 0x3b9   : > { %v3903_v20 = vadd.f32 %v5272_v18, %v3775_v58  ;;  %v3905_v23 = vadd.f32 %v5273_v22, %v3777_v59  ;;  %v3779_v24 = vmax.f32 %v3253_v14, 0.0  ;;  %v3781_v25 = vmax.f32 %v3639_v16, 0.0  ;;  %v5288_v18 = vld [vmem:[%s5689_s30 + $0x2c8] sm:$0xff]  ;;  %v5289_v22 = vld [vmem:[%s5689_s30 + $0x2d8] sm:$0xff] }
 0x3ba   : > { %4030 = vst [vmem:[%s5961_s23 + $0x240] sm:$0xff] %v3902_v2  ;;  %4032 = vst [vmem:[%s5961_s23 + $0x250] sm:$0xff] %v3904_v5  ;;  %v3906_v27 = vadd.f32 %v5274_v26, %v3778_v6  ;;  %v3908_v30 = vadd.f32 %v5275_v28, %v3780_v10  ;;  %v5290_v26 = vld [vmem:[%s5689_s30 + $0x2e0] sm:$0xff]  ;;  %v5291_v28 = vld [vmem:[%s5689_s30 + $0x2f0] sm:$0xff] }
 0x3bb   : > { %4031 = vst [vmem:[%s5961_s23 + $0x248] sm:$0xff] %v3903_v20  ;;  %4033 = vst [vmem:[%s5961_s23 + $0x258] sm:$0xff] %v3905_v23  ;;  %v3907_v35 = vadd.f32 %v5276_v34, %v3779_v24  ;;  %v3909_v38 = vadd.f32 %v5277_v36, %v3781_v25  ;;  %v5292_v34 = vld [vmem:[%s5689_s30 + $0x2e8] sm:$0xff]  ;;  %v5293_v36 = vld [vmem:[%s5689_s30 + $0x2f8] sm:$0xff] }
 0x3bc   : > { %4034 = vst [vmem:[%s5961_s23 + $0x260] sm:$0xff] %v3906_v27  ;;  %4036 = vst [vmem:[%s5961_s23 + $0x270] sm:$0xff] %v3908_v30 }
 0x3bd   : > { %4035 = vst [vmem:[%s5961_s23 + $0x268] sm:$0xff] %v3907_v35  ;;  %4037 = vst [vmem:[%s5961_s23 + $0x278] sm:$0xff] %v3909_v38  ;;  %v3257_v19 = vpop.f32.mrb[104].mxu0  ;;  %v3643_v21 = vpop.f32.mrb[104].mxu1 }
 0x3be   : > { %v3782_v47 = vmax.f32 %v3257_v19, 0.0  ;;  %v3784_v49 = vmax.f32 %v3643_v21, 0.0  ;;  %v3259_v11 = vpop.f32.mrb[105].mxu0  ;;  %v3645_v13 = vpop.f32.mrb[105].mxu1 }
 0x3bf   : > { %v3783_v41 = vmax.f32 %v3259_v11, 0.0  ;;  %v3785_v43 = vmax.f32 %v3645_v13, 0.0  ;;  %v3261_v7 = vpop.f32.mrb[106].mxu0  ;;  %v3647_v9 = vpop.f32.mrb[106].mxu1 }
 0x3c0   : > { %v3910_v42 = vadd.f32 %v5278_v39, %v3782_v47  ;;  %v3912_v12 = vadd.f32 %v5279_v8, %v3784_v49  ;;  %v3786_v45 = vmax.f32 %v3261_v7, 0.0  ;;  %v3788_v48 = vmax.f32 %v3647_v9, 0.0  ;;  %v3263_v15 = vpop.f32.mrb[107].mxu0  ;;  %v3649_v17 = vpop.f32.mrb[107].mxu1  ;;  %v5294_v39 = vld [vmem:[%s5689_s30 + $0x300] sm:$0xff]  ;;  %v5295_v8 = vld [vmem:[%s5689_s30 + $0x310] sm:$0xff] }
 0x3c1   : > { %v3911_v40 = vadd.f32 %v5280_v37, %v3783_v41  ;;  %v3913_v3 = vadd.f32 %v5281_v1, %v3785_v43  ;;  %v3787_v31 = vmax.f32 %v3263_v15, 0.0  ;;  %v3789_v33 = vmax.f32 %v3649_v17, 0.0  ;;  %v5296_v37 = vld [vmem:[%s5689_s30 + $0x308] sm:$0xff]  ;;  %v5297_v1 = vld [vmem:[%s5689_s30 + $0x318] sm:$0xff] }
 0x3c2   : > { %4038 = vst [vmem:[%s5961_s23 + $0x280] sm:$0xff] %v3910_v42  ;;  %4040 = vst [vmem:[%s5961_s23 + $0x290] sm:$0xff] %v3912_v12  ;;  %v3914_v63 = vadd.f32 %v5282_v61, %v3786_v45  ;;  %v3916_v32 = vadd.f32 %v5283_v29, %v3788_v48  ;;  %v5298_v61 = vld [vmem:[%s5689_s30 + $0x320] sm:$0xff]  ;;  %v5299_v29 = vld [vmem:[%s5689_s30 + $0x330] sm:$0xff] }
 0x3c3   : > { %4039 = vst [vmem:[%s5961_s23 + $0x288] sm:$0xff] %v3911_v40  ;;  %4041 = vst [vmem:[%s5961_s23 + $0x298] sm:$0xff] %v3913_v3  ;;  %v3915_v46 = vadd.f32 %v5284_v44, %v3787_v31  ;;  %v3917_v51 = vadd.f32 %v5285_v50, %v3789_v33  ;;  %v5300_v44 = vld [vmem:[%s5689_s30 + $0x328] sm:$0xff]  ;;  %v5301_v50 = vld [vmem:[%s5689_s30 + $0x338] sm:$0xff] }
 0x3c4   : > { %4042 = vst [vmem:[%s5961_s23 + $0x2a0] sm:$0xff] %v3914_v63  ;;  %4044 = vst [vmem:[%s5961_s23 + $0x2b0] sm:$0xff] %v3916_v32 }
 0x3c5   : > { %4043 = vst [vmem:[%s5961_s23 + $0x2a8] sm:$0xff] %v3915_v46  ;;  %4045 = vst [vmem:[%s5961_s23 + $0x2b8] sm:$0xff] %v3917_v51  ;;  %v3267_v52 = vpop.f32.mrb[108].mxu0  ;;  %v3653_v53 = vpop.f32.mrb[108].mxu1 }
 0x3c6   : > { %v3790_v54 = vmax.f32 %v3267_v52, 0.0  ;;  %v3792_v55 = vmax.f32 %v3653_v53, 0.0  ;;  %v3269_v56 = vpop.f32.mrb[109].mxu0  ;;  %v3655_v57 = vpop.f32.mrb[109].mxu1 }
 0x3c7   : > { %v3791_v58 = vmax.f32 %v3269_v56, 0.0  ;;  %v3793_v59 = vmax.f32 %v3655_v57, 0.0  ;;  %v3271_v60 = vpop.f32.mrb[110].mxu0  ;;  %v3657_v62 = vpop.f32.mrb[110].mxu1 }
 0x3c8   : > { %v3918_v2 = vadd.f32 %v5286_v0, %v3790_v54  ;;  %v3920_v5 = vadd.f32 %v5287_v4, %v3792_v55  ;;  %v3794_v6 = vmax.f32 %v3271_v60, 0.0  ;;  %v3796_v10 = vmax.f32 %v3657_v62, 0.0  ;;  %v3273_v14 = vpop.f32.mrb[111].mxu0  ;;  %v3659_v16 = vpop.f32.mrb[111].mxu1  ;;  %v5302_v0 = vld [vmem:[%s5689_s30 + $0x340] sm:$0xff]  ;;  %v5303_v4 = vld [vmem:[%s5689_s30 + $0x350] sm:$0xff] }
 0x3c9   : > { %v3919_v20 = vadd.f32 %v5288_v18, %v3791_v58  ;;  %v3921_v23 = vadd.f32 %v5289_v22, %v3793_v59  ;;  %v3795_v24 = vmax.f32 %v3273_v14, 0.0  ;;  %v3797_v25 = vmax.f32 %v3659_v16, 0.0  ;;  %v5304_v18 = vld [vmem:[%s5689_s30 + $0x348] sm:$0xff]  ;;  %v5305_v22 = vld [vmem:[%s5689_s30 + $0x358] sm:$0xff] }
 0x3ca   : > { %4046 = vst [vmem:[%s5961_s23 + $0x2c0] sm:$0xff] %v3918_v2  ;;  %4048 = vst [vmem:[%s5961_s23 + $0x2d0] sm:$0xff] %v3920_v5  ;;  %v3922_v27 = vadd.f32 %v5290_v26, %v3794_v6  ;;  %v3924_v30 = vadd.f32 %v5291_v28, %v3796_v10  ;;  %v5306_v26 = vld [vmem:[%s5689_s30 + $0x360] sm:$0xff]  ;;  %v5307_v28 = vld [vmem:[%s5689_s30 + $0x370] sm:$0xff] }
 0x3cb   : > { %4047 = vst [vmem:[%s5961_s23 + $0x2c8] sm:$0xff] %v3919_v20  ;;  %4049 = vst [vmem:[%s5961_s23 + $0x2d8] sm:$0xff] %v3921_v23  ;;  %v3923_v35 = vadd.f32 %v5292_v34, %v3795_v24  ;;  %v3925_v38 = vadd.f32 %v5293_v36, %v3797_v25  ;;  %v5308_v34 = vld [vmem:[%s5689_s30 + $0x368] sm:$0xff]  ;;  %v5309_v36 = vld [vmem:[%s5689_s30 + $0x378] sm:$0xff] }
 0x3cc   : > { %4050 = vst [vmem:[%s5961_s23 + $0x2e0] sm:$0xff] %v3922_v27  ;;  %4052 = vst [vmem:[%s5961_s23 + $0x2f0] sm:$0xff] %v3924_v30 }
 0x3cd   : > { %4051 = vst [vmem:[%s5961_s23 + $0x2e8] sm:$0xff] %v3923_v35  ;;  %4053 = vst [vmem:[%s5961_s23 + $0x2f8] sm:$0xff] %v3925_v38  ;;  %v3277_v19 = vpop.f32.mrb[112].mxu0  ;;  %v3663_v21 = vpop.f32.mrb[112].mxu1 }
 0x3ce   : > { %v3798_v47 = vmax.f32 %v3277_v19, 0.0  ;;  %v3800_v49 = vmax.f32 %v3663_v21, 0.0  ;;  %v3279_v11 = vpop.f32.mrb[113].mxu0  ;;  %v3665_v13 = vpop.f32.mrb[113].mxu1 }
 0x3cf   : > { %v3799_v41 = vmax.f32 %v3279_v11, 0.0  ;;  %v3801_v43 = vmax.f32 %v3665_v13, 0.0  ;;  %v3281_v7 = vpop.f32.mrb[114].mxu0  ;;  %v3667_v9 = vpop.f32.mrb[114].mxu1 }
 0x3d0   : > { %v3926_v42 = vadd.f32 %v5294_v39, %v3798_v47  ;;  %v3928_v12 = vadd.f32 %v5295_v8, %v3800_v49  ;;  %v3802_v45 = vmax.f32 %v3281_v7, 0.0  ;;  %v3804_v48 = vmax.f32 %v3667_v9, 0.0  ;;  %v3283_v15 = vpop.f32.mrb[115].mxu0  ;;  %v3669_v17 = vpop.f32.mrb[115].mxu1  ;;  %v5310_v39 = vld [vmem:[%s5689_s30 + $0x380] sm:$0xff]  ;;  %v5311_v8 = vld [vmem:[%s5689_s30 + $0x390] sm:$0xff] }
 0x3d1   : > { %v3927_v40 = vadd.f32 %v5296_v37, %v3799_v41  ;;  %v3929_v3 = vadd.f32 %v5297_v1, %v3801_v43  ;;  %v3803_v31 = vmax.f32 %v3283_v15, 0.0  ;;  %v3805_v33 = vmax.f32 %v3669_v17, 0.0  ;;  %v5312_v37 = vld [vmem:[%s5689_s30 + $0x388] sm:$0xff]  ;;  %v5313_v1 = vld [vmem:[%s5689_s30 + $0x398] sm:$0xff] }
 0x3d2   : > { %4054 = vst [vmem:[%s5961_s23 + $0x300] sm:$0xff] %v3926_v42  ;;  %4056 = vst [vmem:[%s5961_s23 + $0x310] sm:$0xff] %v3928_v12  ;;  %v3930_v63 = vadd.f32 %v5298_v61, %v3802_v45  ;;  %v3932_v32 = vadd.f32 %v5299_v29, %v3804_v48  ;;  %v5314_v61 = vld [vmem:[%s5689_s30 + $0x3a0] sm:$0xff]  ;;  %v5315_v29 = vld [vmem:[%s5689_s30 + $0x3b0] sm:$0xff] }
 0x3d3   : > { %4055 = vst [vmem:[%s5961_s23 + $0x308] sm:$0xff] %v3927_v40  ;;  %4057 = vst [vmem:[%s5961_s23 + $0x318] sm:$0xff] %v3929_v3  ;;  %v3931_v46 = vadd.f32 %v5300_v44, %v3803_v31  ;;  %v3933_v51 = vadd.f32 %v5301_v50, %v3805_v33  ;;  %v5316_v44 = vld [vmem:[%s5689_s30 + $0x3a8] sm:$0xff]  ;;  %v5317_v50 = vld [vmem:[%s5689_s30 + $0x3b8] sm:$0xff] }
 0x3d4   : > { %4058 = vst [vmem:[%s5961_s23 + $0x320] sm:$0xff] %v3930_v63  ;;  %4060 = vst [vmem:[%s5961_s23 + $0x330] sm:$0xff] %v3932_v32 }
 0x3d5   : > { %4059 = vst [vmem:[%s5961_s23 + $0x328] sm:$0xff] %v3931_v46  ;;  %4061 = vst [vmem:[%s5961_s23 + $0x338] sm:$0xff] %v3933_v51  ;;  %v3287_v52 = vpop.f32.mrb[116].mxu0  ;;  %v3673_v53 = vpop.f32.mrb[116].mxu1 }
 0x3d6   : > { %v3806_v54 = vmax.f32 %v3287_v52, 0.0  ;;  %v3808_v55 = vmax.f32 %v3673_v53, 0.0  ;;  %v3289_v56 = vpop.f32.mrb[117].mxu0  ;;  %v3675_v57 = vpop.f32.mrb[117].mxu1 }
 0x3d7   : > { %v3807_v58 = vmax.f32 %v3289_v56, 0.0  ;;  %v3809_v59 = vmax.f32 %v3675_v57, 0.0  ;;  %v3291_v60 = vpop.f32.mrb[118].mxu0  ;;  %v3677_v62 = vpop.f32.mrb[118].mxu1 }
 0x3d8   : > { %v3934_v2 = vadd.f32 %v5302_v0, %v3806_v54  ;;  %v3936_v5 = vadd.f32 %v5303_v4, %v3808_v55  ;;  %v3810_v6 = vmax.f32 %v3291_v60, 0.0  ;;  %v3812_v10 = vmax.f32 %v3677_v62, 0.0  ;;  %v3293_v14 = vpop.f32.mrb[119].mxu0  ;;  %v3679_v16 = vpop.f32.mrb[119].mxu1  ;;  %v5318_v0 = vld [vmem:[%s5689_s30 + $0x3c0] sm:$0xff]  ;;  %v5319_v4 = vld [vmem:[%s5689_s30 + $0x3d0] sm:$0xff] }
 0x3d9   : > { %v3935_v20 = vadd.f32 %v5304_v18, %v3807_v58  ;;  %v3937_v23 = vadd.f32 %v5305_v22, %v3809_v59  ;;  %v3811_v24 = vmax.f32 %v3293_v14, 0.0  ;;  %v3813_v25 = vmax.f32 %v3679_v16, 0.0  ;;  %v5320_v18 = vld [vmem:[%s5689_s30 + $0x3c8] sm:$0xff]  ;;  %v5321_v22 = vld [vmem:[%s5689_s30 + $0x3d8] sm:$0xff] }
 0x3da   : > { %4062 = vst [vmem:[%s5961_s23 + $0x340] sm:$0xff] %v3934_v2  ;;  %4064 = vst [vmem:[%s5961_s23 + $0x350] sm:$0xff] %v3936_v5  ;;  %v3938_v27 = vadd.f32 %v5306_v26, %v3810_v6  ;;  %v3940_v30 = vadd.f32 %v5307_v28, %v3812_v10  ;;  %v5322_v26 = vld [vmem:[%s5689_s30 + $0x3e0] sm:$0xff]  ;;  %v5323_v28 = vld [vmem:[%s5689_s30 + $0x3f0] sm:$0xff] }
 0x3db   : > { %4063 = vst [vmem:[%s5961_s23 + $0x348] sm:$0xff] %v3935_v20  ;;  %4065 = vst [vmem:[%s5961_s23 + $0x358] sm:$0xff] %v3937_v23  ;;  %v3939_v35 = vadd.f32 %v5308_v34, %v3811_v24  ;;  %v3941_v38 = vadd.f32 %v5309_v36, %v3813_v25  ;;  %v5324_v34 = vld [vmem:[%s5689_s30 + $0x3e8] sm:$0xff]  ;;  %v5325_v36 = vld [vmem:[%s5689_s30 + $0x3f8] sm:$0xff] }
 0x3dc   : > { %4066 = vst [vmem:[%s5961_s23 + $0x360] sm:$0xff] %v3938_v27  ;;  %4068 = vst [vmem:[%s5961_s23 + $0x370] sm:$0xff] %v3940_v30 }
 0x3dd   : > { %4067 = vst [vmem:[%s5961_s23 + $0x368] sm:$0xff] %v3939_v35  ;;  %4069 = vst [vmem:[%s5961_s23 + $0x378] sm:$0xff] %v3941_v38  ;;  %v3297_v19 = vpop.f32.mrb[120].mxu0  ;;  %v3683_v21 = vpop.f32.mrb[120].mxu1 }
 0x3de   : > { %v3814_v47 = vmax.f32 %v3297_v19, 0.0  ;;  %v3816_v49 = vmax.f32 %v3683_v21, 0.0  ;;  %v3299_v11 = vpop.f32.mrb[121].mxu0  ;;  %v3685_v13 = vpop.f32.mrb[121].mxu1 }
 0x3df   : > { %v3815_v41 = vmax.f32 %v3299_v11, 0.0  ;;  %v3817_v43 = vmax.f32 %v3685_v13, 0.0  ;;  %v3301_v7 = vpop.f32.mrb[122].mxu0  ;;  %v3687_v9 = vpop.f32.mrb[122].mxu1 }
 0x3e0   : > { %v3942_v42 = vadd.f32 %v5310_v39, %v3814_v47  ;;  %v3944_v12 = vadd.f32 %v5311_v8, %v3816_v49  ;;  %v3818_v45 = vmax.f32 %v3301_v7, 0.0  ;;  %v3820_v48 = vmax.f32 %v3687_v9, 0.0  ;;  %v3303_v15 = vpop.f32.mrb[123].mxu0  ;;  %v3689_v17 = vpop.f32.mrb[123].mxu1 }
 0x3e1   : > { %v3943_v40 = vadd.f32 %v5312_v37, %v3815_v41  ;;  %v3945_v3 = vadd.f32 %v5313_v1, %v3817_v43  ;;  %v3819_v31 = vmax.f32 %v3303_v15, 0.0  ;;  %v3821_v33 = vmax.f32 %v3689_v17, 0.0 }
 0x3e2   : > { %4070 = vst [vmem:[%s5961_s23 + $0x380] sm:$0xff] %v3942_v42  ;;  %4072 = vst [vmem:[%s5961_s23 + $0x390] sm:$0xff] %v3944_v12  ;;  %v3946_v63 = vadd.f32 %v5314_v61, %v3818_v45  ;;  %v3948_v32 = vadd.f32 %v5315_v29, %v3820_v48 }
 0x3e3   : > { %4071 = vst [vmem:[%s5961_s23 + $0x388] sm:$0xff] %v3943_v40  ;;  %4073 = vst [vmem:[%s5961_s23 + $0x398] sm:$0xff] %v3945_v3  ;;  %v3947_v46 = vadd.f32 %v5316_v44, %v3819_v31  ;;  %v3949_v51 = vadd.f32 %v5317_v50, %v3821_v33 }
 0x3e4   : > { %4074 = vst [vmem:[%s5961_s23 + $0x3a0] sm:$0xff] %v3946_v63  ;;  %4076 = vst [vmem:[%s5961_s23 + $0x3b0] sm:$0xff] %v3948_v32 }
 0x3e5   : > { %4075 = vst [vmem:[%s5961_s23 + $0x3a8] sm:$0xff] %v3947_v46  ;;  %4077 = vst [vmem:[%s5961_s23 + $0x3b8] sm:$0xff] %v3949_v51  ;;  %v3307_v52 = vpop.f32.mrb[124].mxu0  ;;  %v3693_v53 = vpop.f32.mrb[124].mxu1 }
 0x3e6   : > { %v3822_v54 = vmax.f32 %v3307_v52, 0.0  ;;  %v3824_v55 = vmax.f32 %v3693_v53, 0.0  ;;  %v3309_v56 = vpop.f32.mrb[125].mxu0  ;;  %v3695_v57 = vpop.f32.mrb[125].mxu1 }
 0x3e7   : > { %v3823_v58 = vmax.f32 %v3309_v56, 0.0  ;;  %v3825_v59 = vmax.f32 %v3695_v57, 0.0  ;;  %v3311_v60 = vpop.f32.mrb[126].mxu0  ;;  %v3697_v62 = vpop.f32.mrb[126].mxu1  ;;  %4093 = sbr.rel (!%p6296_p9) target bundleno = 1034 (0x40a), region = 48 }
 0x3e8   : > { %v3950_v2 = vadd.f32 %v5318_v0, %v3822_v54  ;;  %v3952_v5 = vadd.f32 %v5319_v4, %v3824_v55  ;;  %v3826_v6 = vmax.f32 %v3311_v60, 0.0  ;;  %v3828_v10 = vmax.f32 %v3697_v62, 0.0  ;;  %v3313_v14 = vpop.f32.mrb[127].mxu0  ;;  %v3699_v16 = vpop.f32.mrb[127].mxu1 }
 0x3e9   : > { %v3951_v20 = vadd.f32 %v5320_v18, %v3823_v58  ;;  %v3953_v23 = vadd.f32 %v5321_v22, %v3825_v59  ;;  %v3827_v24 = vmax.f32 %v3313_v14, 0.0  ;;  %v3829_v25 = vmax.f32 %v3699_v16, 0.0 }
 0x3ea   : > { %4078 = vst [vmem:[%s5961_s23 + $0x3c0] sm:$0xff] %v3950_v2  ;;  %4080 = vst [vmem:[%s5961_s23 + $0x3d0] sm:$0xff] %v3952_v5  ;;  %v3954_v27 = vadd.f32 %v5322_v26, %v3826_v6  ;;  %v3956_v30 = vadd.f32 %v5323_v28, %v3828_v10 }
 0x3eb   : > { %4079 = vst [vmem:[%s5961_s23 + $0x3c8] sm:$0xff] %v3951_v20  ;;  %4081 = vst [vmem:[%s5961_s23 + $0x3d8] sm:$0xff] %v3953_v23  ;;  %v3955_v35 = vadd.f32 %v5324_v34, %v3827_v24  ;;  %v3957_v38 = vadd.f32 %v5325_v36, %v3829_v25 }
 0x3ec   : > { %4082 = vst [vmem:[%s5961_s23 + $0x3e0] sm:$0xff] %v3954_v27  ;;  %4084 = vst [vmem:[%s5961_s23 + $0x3f0] sm:$0xff] %v3956_v30 }
 0x3ed   : > { %4083 = vst [vmem:[%s5961_s23 + $0x3e8] sm:$0xff] %v3955_v35  ;;  %4085 = vst [vmem:[%s5961_s23 + $0x3f8] sm:$0xff] %v3957_v38 }
 0x3ee   : > { %s6305_s19 = smov (!%p4096_p10, %s4095_s19), 32 }
 0x3ef   : > { %s6219_s10 = sshll.u32 %s6305_s19, 9 }
 0x3f0   : > { %s4101_s11 = ssub.s32 16384, %s6219_s10 }
 0x3f1   : > { %4102 = vsyncadd %s4087_s26, %s4101_s11  ;;  %p4479_p1 = scmp.ne.s32.totalorder %s6219_s10, 0  ;;  %s4491_s24 = sshll.u32 %s5533_s16, 14 }
 0x3f2   : > { %s6229_s7 = scalar_lea.hbm %s6281_s3, %s4491_s24  ;;  %s4108_s4 = sshll.u32 %s5961_s23, 4  ;;  %s6232_s4 = int_to_ptr.vmem [resolvable:$true] %s4108_s4 }
 0x3f3   : > { %s5410_s20 = scalar_lea.vmem %s6232_s4, %s6219_s10  ;;  %s5489_s22 = smov [#allocation8]  }
 0x3f4   : > { %p5411_p3 = scmp.ne.s32.totalorder %s6232_s4, %s5410_s20  ;;  %s5414_s8 = sshll.u32 %s5489_s22, 4  ;;  %s5415_s8 = int_to_ptr.vmem [resolvable:$false] %s5414_s8 }
 0x3f5   : > { %s5416_s16 = scalar_lea.vmem %s5415_s8, 32768  ;;  %p5417_p11 = scmp.lt.s32.totalorder %s6232_s4, %s5415_s8 }
 0x3f6   : > { %p5412_p5 = pnand %p5411_p3, %p4479_p1  ;;  %p5418_p13 = scmp.lt.s32.totalorder %s5416_s16, %s5410_s20 }
 0x3f8   : > { %p5413_p6 = pneg %p5412_p5  ;;  %p5419_p0 = por %p5418_p13, %p5417_p11 }
 0x3fa   : > { %p5420_p12 = pnand %p5419_p0, %p5413_p6 }
 0x3fc   : > { %5423 = shalt.err (!%p5420_p12)
}
 0x3fd   : > { %s5424_s9 = scalar_lea.hbm %s6229_s7, %s6219_s10  ;;  %s5428_s30 = scalar_lea.hbm %s6281_s3, 19456 }
 0x3fe   : > { %p5425_p7 = scmp.ne.s32.totalorder %s6229_s7, %s5424_s9  ;;  %p5429_p9 = scmp.lt.u32.totalorder %s6229_s7, %s6281_s3 }
 0x3ff   : > { %p5430_p10 = scmp.lt.u32.totalorder %s5428_s30, %s5424_s9  ;;  %p5432_p5 = scmp.lt.u32.totalorder %s5424_s9, %s6229_s7 }
 0x400   : > { %p5426_p2 = pnand %p5425_p7, %p4479_p1 }
 0x401   : > { %p5431_p3 = por %p5430_p10, %p5429_p9 }
 0x402   : > { %p5427_p8 = pneg %p5426_p2 }
 0x403   : > { %p5433_p6 = por %p5432_p5, %p5431_p3 }
 0x405   : > { %p5434_p11 = pnand %p5433_p6, %p5427_p8 }
 0x407   : > { %5437 = shalt.err (!%p5434_p11)
}
 0x408   : > { %s5490_s19 = smov 512   ;;  %s5491_s11 = smov 32  }
 0x409   : > { %4114 = dma.vmem_to_hbm [thread:$0]  (%p4479_p1), %s6232_s4, %s6219_s10, %s6229_s7, %s4087_s26, %s5490_s19, %s5490_s19, %s5491_s11  }
 0x40a PF: > { %s4123_s24 = sand.u32 1, %s5468_s12   ;;  %p6297_p13 = scmp.ne.s32.totalorder %s6288_s25, 0 }
 0x40b   : > { %s4124_s5 = scalar_lea.sflag [#allocation4], %s4123_s24 }
 0x40c   : > { %p4766_p0 = pnand %p4204_p4, %p6297_p13 }
 0x40e   : > { %5463 = dma.done.wait (!%p4766_p0), %s4124_s5, 16384  }
 0x40f   : > { %5465 = vsyncadd (!%p4766_p0), %s4124_s5, 4294950912  ;;  %p17_p12 = scmp.ge.s32.totalorder %s5537_s18, 4   ;;  %s6298_s12 = smov %s5472_s13 }
 0x410   : > { %s6299_s13 = smov %s5476_s14  ;;  %s6300_s14 = smov %s5549_s21 }
 0x411   : > { %s6301_s15 = smov %s5537_s18  ;;  %19 = sbr.rel (!%p17_p12) target bundleno = 6 (0x6), region = 85 }
 0x418   :  { %4129 = vsyncpa [#allocation3], 1 }
 0x419   :  { %4131 = vsyncpa [#allocation3 + $0x1], 1 }
 0x41a   :  { %4132 = vsyncpa [#allocation6], 1 }
 0x41b   :  { %4133 = vsyncpa [#allocation4], 1 }
 0x41c   :  { %4135 = vsyncpa [#allocation4 + $0x1], 1 }

</bundles_post_ra>
